<compile_context>
chip_gen: v6e
topology: v6e:2x2x1
jax: 0.10.0
libtpu: 0.0.40
codegen_flags: <defaults>
</compile_context>

<pallas_src>
import functools

import numpy as np
import jax
import jax.numpy as jnp
from jax.experimental import pallas as pl
from jax.experimental.pallas import tpu as pltpu

NEG_BIG = -1e30                       # mask value for padded logits
VMEM_LIMIT = 32 * 1024 * 1024         # safe on v5e/v6e (128 MiB) and v7x (64 MiB)
DEFAULT_TILE_N = 1024                 # big tiles amortize ~0.35 us / grid step


def _tile(n, target=DEFAULT_TILE_N):
    """Largest tile <= target that divides n and keeps sublane alignment."""
    if n <= target:
        return n
    t = (target // 8) * 8
    while t >= 8:
        if n % t == 0:
            return t
        t -= 8
    return n  # fallback: whole axis (only for pathological N)


def _split_cfg(n, tn):
    """Split the N axis into independent partial-max streams (v7x 2-TC)."""
    steps = n // tn
    if steps >= 2 and steps % 2 == 0:
        return 2, steps // 2
    return 1, steps


def _full2(a):
    """Whole-array block, constant index, for a 2-axis grid."""
    return pl.BlockSpec(a.shape, lambda b, n: (0,) * a.ndim)


def _full3(a):
    """Whole-array block, constant index, for a 3-axis grid."""
    return pl.BlockSpec(a.shape, lambda b, s, t: (0,) * a.ndim)


# ----------------------------- Pallas kernels ------------------------------

def _stn_convmax_kernel(x_ref, w1, s1, t1, w2, s2, t2, w3, s3, t3, gmax_ref):
    """STN3d conv1->conv2->conv3 (all relu(bn(.))) fused with max over points."""
    h = jnp.dot(x_ref[...].astype(jnp.bfloat16), w1[...],
                preferred_element_type=jnp.float32)
    h = jnp.maximum(h * s1[...] + t1[...], 0.0)
    h = jnp.dot(h.astype(jnp.bfloat16), w2[...], preferred_element_type=jnp.float32)
    h = jnp.maximum(h * s2[...] + t2[...], 0.0)
    h = jnp.dot(h.astype(jnp.bfloat16), w3[...], preferred_element_type=jnp.float32)
    h = jnp.maximum(h * s3[...] + t3[...], 0.0)
    tile_max = jnp.max(h, axis=0, keepdims=True)          # (1, 1024)

    @pl.when(pl.program_id(2) == 0)
    def _():
        gmax_ref[...] = jnp.full_like(gmax_ref, -jnp.inf)

    gmax_ref[...] = jnp.maximum(gmax_ref[...], tile_max)


def _conv1_fstn_kernel(x_ref, w1b, s1, t1,
                       fw1, fs1, ft1, fw2, fs2, ft2, fw3, fs3, ft3,
                       h_ref, gmax_ref):
    """Fused: e_conv1 (per-batch folded 3x3 transform) -> write h once ->
    fstn conv1->conv2->conv3 + running max for the feature transform."""
    h = jnp.dot(x_ref[...].astype(jnp.bfloat16), w1b[...],
                preferred_element_type=jnp.float32)
    h = jnp.maximum(h * s1[...] + t1[...], 0.0)
    h_bf = h.astype(jnp.bfloat16)
    h_ref[...] = h_bf                                      # h hits HBM exactly once

    f = jnp.dot(h_bf, fw1[...], preferred_element_type=jnp.float32)
    f = jnp.maximum(f * fs1[...] + ft1[...], 0.0)
    f = jnp.dot(f.astype(jnp.bfloat16), fw2[...], preferred_element_type=jnp.float32)
    f = jnp.maximum(f * fs2[...] + ft2[...], 0.0)
    f = jnp.dot(f.astype(jnp.bfloat16), fw3[...], preferred_element_type=jnp.float32)
    f = jnp.maximum(f * fs3[...] + ft3[...], 0.0)
    tile_max = jnp.max(f, axis=0, keepdims=True)           # (1, 1024)

    @pl.when(pl.program_id(2) == 0)
    def _():
        gmax_ref[...] = jnp.full_like(gmax_ref, -jnp.inf)

    gmax_ref[...] = jnp.maximum(gmax_ref[...], tile_max)


def _enc_tail_kernel(h_ref, w2b, s2, t2, w3, s3, t3, gmax_ref):
    """Fused: conv2 (trans_feat folded into per-batch weight) -> conv3(+bn3) -> max.
    pointfeat is never materialized."""
    h2 = jnp.dot(h_ref[...], w2b[...], preferred_element_type=jnp.float32)
    h2 = jnp.maximum(h2 * s2[...] + t2[...], 0.0)
    h3 = jnp.dot(h2.astype(jnp.bfloat16), w3[...], preferred_element_type=jnp.float32)
    h3 = h3 * s3[...] + t3[...]                            # bn3, no relu
    tile_max = jnp.max(h3, axis=0, keepdims=True)

    @pl.when(pl.program_id(2) == 0)
    def _():
        gmax_ref[...] = jnp.full_like(gmax_ref, -jnp.inf)

    gmax_ref[...] = jnp.maximum(gmax_ref[...], tile_max)


def _seg_head_kernel(h_ref, w1p, ss1, ts1b, w2, s2, t2, w3, s3, t3, w4, b4, o_ref):
    """Fused seg head: split s_conv1 (pointfeat part via per-batch folded weight,
    global part folded into per-batch shift) + conv2 + conv3 + conv4 + log_softmax."""
    h1 = jnp.dot(h_ref[...], w1p[...], preferred_element_type=jnp.float32)
    h1 = jnp.maximum(h1 * ss1[...] + ts1b[...], 0.0)
    h2 = jnp.dot(h1.astype(jnp.bfloat16), w2[...], preferred_element_type=jnp.float32)
    h2 = jnp.maximum(h2 * s2[...] + t2[...], 0.0)
    h3 = jnp.dot(h2.astype(jnp.bfloat16), w3[...], preferred_element_type=jnp.float32)
    h3 = jnp.maximum(h3 * s3[...] + t3[...], 0.0)
    logits = jnp.dot(h3.astype(jnp.bfloat16), w4[...],
                     preferred_element_type=jnp.float32)
    logits = logits + b4[...]                              # padded lanes get -1e30
    m = jnp.max(logits, axis=-1, keepdims=True)
    z = logits - m
    o_ref[...] = z - jnp.log(jnp.sum(jnp.exp(z), axis=-1, keepdims=True))


# ------------------------------ kernel wrappers -----------------------------

def stn_convmax(x, w1, s1, t1, w2, s2, t2, w3, s3, t3, tn):
    """x: (B,N,Cin) f32 -> (B,1024) per-batch max of the fused STN conv chain."""
    B, N, Cin = x.shape
    nsplit, nsteps = _split_cfg(N, tn)
    out = pl.pallas_call(
        _stn_convmax_kernel,
        out_shape=jax.ShapeDtypeStruct((B * nsplit, 1, 1024), jnp.float32),
        grid=(B, nsplit, nsteps),
        in_specs=[
            pl.BlockSpec((pl.Squeezed(), tn, Cin),
                         lambda b, s, t: (b, s * nsteps + t, 0)),
            _full3(w1), _full3(s1), _full3(t1),
            _full3(w2), _full3(s2), _full3(t2),
            _full3(w3), _full3(s3), _full3(t3),
        ],
        out_specs=pl.BlockSpec((pl.Squeezed(), 1, 1024),
                               lambda b, s, t: (b * nsplit + s, 0, 0)),
        compiler_params=pltpu.CompilerParams(
            dimension_semantics=("parallel", "parallel", "arbitrary"),
            vmem_limit_bytes=VMEM_LIMIT),
    )(x, w1, s1, t1, w2, s2, t2, w3, s3, t3)
    return out.reshape(B, nsplit, 1024).max(axis=1)


def conv1_fstn(pc, w1b, s1, t1, fw1, fs1, ft1, fw2, fs2, ft2, fw3, fs3, ft3, tn):
    """pc: (B,N,Cin) f32, w1b: (B,Cin,64) bf16 (3x3 transform folded).
    Returns (h (B,N,64) bf16, fstn global max (B,1024) f32)."""
    B, N, Cin = pc.shape
    nsplit, nsteps = _split_cfg(N, tn)
    h, gmax = pl.pallas_call(
        _conv1_fstn_kernel,
        out_shape=(jax.ShapeDtypeStruct((B, N, 64), jnp.bfloat16),
                   jax.ShapeDtypeStruct((B * nsplit, 1, 1024), jnp.float32)),
        grid=(B, nsplit, nsteps),
        in_specs=[
            pl.BlockSpec((pl.Squeezed(), tn, Cin),
                         lambda b, s, t: (b, s * nsteps + t, 0)),
            pl.BlockSpec((pl.Squeezed(), Cin, 64), lambda b, s, t: (b, 0, 0)),
            _full3(s1), _full3(t1),
            _full3(fw1), _full3(fs1), _full3(ft1),
            _full3(fw2), _full3(fs2), _full3(ft2),
            _full3(fw3), _full3(fs3), _full3(ft3),
        ],
        out_specs=[
            pl.BlockSpec((pl.Squeezed(), tn, 64),
                         lambda b, s, t: (b, s * nsteps + t, 0)),
            pl.BlockSpec((pl.Squeezed(), 1, 1024),
                         lambda b, s, t: (b * nsplit + s, 0, 0)),
        ],
        compiler_params=pltpu.CompilerParams(
            dimension_semantics=("parallel", "parallel", "arbitrary"),
            vmem_limit_bytes=VMEM_LIMIT),
    )(pc, w1b, s1, t1, fw1, fs1, ft1, fw2, fs2, ft2, fw3, fs3, ft3)
    return h, gmax.reshape(B, nsplit, 1024).max(axis=1)


def encoder_tail(h, w2b, s2, t2, w3, s3, t3, tn):
    """h: (B,N,64) bf16, w2b: (B,64,128) bf16 (trans_feat folded) -> g (B,1024)."""
    B, N, _ = h.shape
    nsplit, nsteps = _split_cfg(N, tn)
    gmax = pl.pallas_call(
        _enc_tail_kernel,
        out_shape=jax.ShapeDtypeStruct((B * nsplit, 1, 1024), jnp.float32),
        grid=(B, nsplit, nsteps),
        in_specs=[
            pl.BlockSpec((pl.Squeezed(), tn, 64),
                         lambda b, s, t: (b, s * nsteps + t, 0)),
            pl.BlockSpec((pl.Squeezed(), 64, 128), lambda b, s, t: (b, 0, 0)),
            _full3(s2), _full3(t2),
            _full3(w3), _full3(s3), _full3(t3),
        ],
        out_specs=pl.BlockSpec((pl.Squeezed(), 1, 1024),
                               lambda b, s, t: (b * nsplit + s, 0, 0)),
        compiler_params=pltpu.CompilerParams(
            dimension_semantics=("parallel", "parallel", "arbitrary"),
            vmem_limit_bytes=VMEM_LIMIT),
    )(h, w2b, s2, t2, w3, s3, t3)
    return gmax.reshape(B, nsplit, 1024).max(axis=1)


def seg_head(h, w1p_b, ss1, ts1_b, w2, s2, t2, w3, s3, t3, w4, b4, tn):
    """h: (B,N,64) bf16, w1p_b: (B,64,512) bf16, ts1_b: (B,1,512) f32
    -> (B,N,128) f32 padded log-probs."""
    B, N, _ = h.shape
    return pl.pallas_call(
        _seg_head_kernel,
        out_shape=jax.ShapeDtypeStruct((B, N, 128), jnp.float32),
        grid=(B, N // tn),
        in_specs=[
            pl.BlockSpec((pl.Squeezed(), tn, 64), lambda b, n: (b, n, 0)),
            pl.BlockSpec((pl.Squeezed(), 64, 512), lambda b, n: (b, 0, 0)),
            _full2(ss1),
            pl.BlockSpec((pl.Squeezed(), 1, 512), lambda b, n: (b, 0, 0)),
            _full2(w2), _full2(s2), _full2(t2),
            _full2(w3), _full2(s3), _full2(t3),
            _full2(w4), _full2(b4),
        ],
        out_specs=pl.BlockSpec((pl.Squeezed(), tn, 128), lambda b, n: (b, n, 0)),
        compiler_params=pltpu.CompilerParams(
            dimension_semantics=("parallel", "parallel"),
            vmem_limit_bytes=VMEM_LIMIT),
    )(h, w1p_b, ss1, ts1_b, w2, s2, t2, w3, s3, t3, w4, b4)


# --------------------------- parameter construction ------------------------

def make_linear(key, cin, cout):
    kw, kb = jax.random.split(key)
    bound = 1.0 / np.sqrt(cin)
    return {
        "w": jax.random.uniform(kw, (cin, cout), jnp.float32, -bound, bound),
        "b": jax.random.uniform(kb, (cout,), jnp.float32, -bound, bound),
    }


def make_bn(key, c, eps=1e-5):
    """BatchNorm1d in eval mode, folded into per-channel scale/shift."""
    k1, k2, k3, k4 = jax.random.split(key, 4)
    gamma = 1.0 + 0.1 * jax.random.normal(k1, (c,), jnp.float32)
    beta = 0.1 * jax.random.normal(k2, (c,), jnp.float32)
    mean = 0.1 * jax.random.normal(k3, (c,), jnp.float32)
    var = jax.random.uniform(k4, (c,), jnp.float32, 0.5, 1.5)
    scale = gamma * jax.lax.rsqrt(var + eps)
    return {"scale": scale, "shift": beta - mean * scale}


def make_stn(key, cin, k):
    ks = jax.random.split(key, 11)
    return {
        "conv1": make_linear(ks[0], cin, 64),    "bn1": make_bn(ks[1], 64),
        "conv2": make_linear(ks[2], 64, 128),    "bn2": make_bn(ks[3], 128),
        "conv3": make_linear(ks[4], 128, 1024),  "bn3": make_bn(ks[5], 1024),
        "fc1":   make_linear(ks[6], 1024, 512),  "bn4": make_bn(ks[7], 512),
        "fc2":   make_linear(ks[8], 512, 256),   "bn5": make_bn(ks[9], 256),
        "fc3":   make_linear(ks[10], 256, k * k),
    }


def make_params(key, num_class=13, channel=9):
    ks = jax.random.split(key, 16)
    p = {}
    p["stn"] = make_stn(ks[0], channel, 3)        # STN3d
    p["fstn"] = make_stn(ks[1], 64, 64)           # STNkd (feature transform)
    p["e_conv1"] = make_linear(ks[2], channel, 64);  p["e_bn1"] = make_bn(ks[3], 64)
    p["e_conv2"] = make_linear(ks[4], 64, 128);      p["e_bn2"] = make_bn(ks[5], 128)
    p["e_conv3"] = make_linear(ks[6], 128, 1024);    p["e_bn3"] = make_bn(ks[7], 1024)
    p["s_conv1"] = make_linear(ks[8], 1088, 512);    p["s_bn1"] = make_bn(ks[9], 512)
    p["s_conv2"] = make_linear(ks[10], 512, 256);    p["s_bn2"] = make_bn(ks[11], 256)
    p["s_conv3"] = make_linear(ks[12], 256, 128);    p["s_bn3"] = make_bn(ks[13], 128)
    p["s_conv4"] = make_linear(ks[14], 128, num_class)
    return p


def fold_linear_bn(lin, bn):
    """Return (w_bf16, scale (1,C), shift (1,C)) with the bias folded into shift."""
    w, b = lin["w"], lin["b"]
    C = w.shape[1]
    scale = bn["scale"]
    shift = bn["shift"] + b * scale
    return w.astype(jnp.bfloat16), scale.reshape(1, C), shift.reshape(1, C)


def fold_bias_bn(lin, bn):
    """Return (scale (1,C), shift (1,C)) only; the weight is handled separately."""
    b = lin["b"]
    C = b.shape[0]
    scale = bn["scale"]
    shift = bn["shift"] + b * scale
    return scale.reshape(1, C), shift.reshape(1, C)


# ------------------------------- forward pass ------------------------------

def _bn_apply(x, bn):
    return x * bn["scale"] + bn["shift"]


def stn_fc_jnp(g, p, k):
    """Tiny M=B FC chain (fc1->fc2->fc3 + identity): left to plain XLA."""
    h = jnp.maximum(_bn_apply(g @ p["fc1"]["w"] + p["fc1"]["b"], p["bn4"]), 0.0)
    h = jnp.maximum(_bn_apply(h @ p["fc2"]["w"] + p["fc2"]["b"], p["bn5"]), 0.0)
    h = h @ p["fc3"]["w"] + p["fc3"]["b"]
    h = h + jnp.eye(k, dtype=jnp.float32).reshape(1, k * k)
    return h.reshape(-1, k, k)


def pointnet_semseg_forward(params, pos, rgb, num_class=13, tile_n=DEFAULT_TILE_N):
    """pos: (B, N, 3), rgb: (B, N, 6).  Matches BasicPointNetSemSeg.forward."""
    B, N, _ = pos.shape
    tn = _tile(N, tile_n)
    pc = jnp.concatenate([pos, rgb], axis=2)                         # (B, N, 9)

    # --- STN3d: fused conv chain + max (Pallas), tiny FC chain (XLA) ---
    stn = params["stn"]
    aw1, as1, at1 = fold_linear_bn(stn["conv1"], stn["bn1"])
    aw2, as2, at2 = fold_linear_bn(stn["conv2"], stn["bn2"])
    aw3, as3, at3 = fold_linear_bn(stn["conv3"], stn["bn3"])
    g_stn = stn_convmax(pc, aw1, as1, at1, aw2, as2, at2, aw3, as3, at3, tn)
    trans = stn_fc_jnp(g_stn, stn, 3)                                # (B, 3, 3)

    # --- e_conv1 with the 3x3 transform folded into per-batch weights,
    #     fused with the whole fstn conv chain + max ---
    w1 = params["e_conv1"]["w"]                                      # (9, 64) f32
    s1, t1 = fold_bias_bn(params["e_conv1"], params["e_bn1"])
    w1_xyz = jnp.einsum("bij,jc->bic", trans, w1[:3])                # trans_b @ W1[:3]
    w1_rest = jnp.broadcast_to(w1[3:][None], (B, 6, 64))
    w1b = jnp.concatenate([w1_xyz, w1_rest], axis=1).astype(jnp.bfloat16)  # (B,9,64)

    fstn = params["fstn"]
    fw1, fs1, ft1 = fold_linear_bn(fstn["conv1"], fstn["bn1"])
    fw2, fs2, ft2 = fold_linear_bn(fstn["conv2"], fstn["bn2"])
    fw3, fs3, ft3 = fold_linear_bn(fstn["conv3"], fstn["bn3"])
    h, g_fstn = conv1_fstn(pc, w1b, s1, t1,
                           fw1, fs1, ft1, fw2, fs2, ft2, fw3, fs3, ft3, tn)
    trans_feat = stn_fc_jnp(g_fstn, fstn, 64)                        # (B, 64, 64)

    # --- fold trans_feat into conv2 / seg-conv1 weights: pointfeat never exists ---
    w2b = jnp.einsum("bij,jc->bic", trans_feat,
                     params["e_conv2"]["w"]).astype(jnp.bfloat16)    # (B, 64, 128)
    s2, t2 = fold_bias_bn(params["e_conv2"], params["e_bn2"])
    w3, s3, t3 = fold_linear_bn(params["e_conv3"], params["e_bn3"])
    g = encoder_tail(h, w2b, s2, t2, w3, s3, t3, tn)                 # (B, 1024)

    # --- seg head; s_conv1 split so (B,N,1088) is never materialized; the
    #     per-batch global part  g @ W[:1024]  is folded into the BN shift ---
    wsc1 = params["s_conv1"]["w"]                                    # (1088, 512)
    ss1, base_t1 = fold_bias_bn(params["s_conv1"], params["s_bn1"])
    w1p_b = jnp.einsum("bij,jc->bic", trans_feat,
                       wsc1[1024:]).astype(jnp.bfloat16)             # (B, 64, 512)
    g_part = g @ wsc1[:1024]                                         # (B, 512) in XLA
    ts1_b = (base_t1 + g_part * ss1).reshape(B, 1, 512)              # per-batch shift

    wsc2, ss2, ts2 = fold_linear_bn(params["s_conv2"], params["s_bn2"])
    wsc3, ss3, ts3 = fold_linear_bn(params["s_conv3"], params["s_bn3"])

    nc = num_class
    w4 = params["s_conv4"]["w"]
    b4 = params["s_conv4"]["b"]
    w4p = jnp.zeros((128, 128), jnp.float32).at[:, :nc].set(w4).astype(jnp.bfloat16)
    b4p = jnp.full((1, 128), NEG_BIG, jnp.float32).at[0, :nc].set(b4)

    out_pad = seg_head(h, w1p_b, ss1, ts1_b,
                       wsc2, ss2, ts2, wsc3, ss3, ts3, w4p, b4p, tn)  # (B, N, 128)
    # TODO(synk): fuse this slice into the downstream loss/argmax consumer to
    # avoid re-reading the padded (B,N,128) log-prob tensor.
    out = out_pad[..., :nc].reshape(B * N, nc)

    return {"out": out, "trans": trans, "trans_feat": trans_feat}


# ----------------------------------- main -----------------------------------

if __name__ == "__main__":
    B, N, NUM_CLASS = 2, 16, 13
    key = jax.random.PRNGKey(0)
    k_pos, k_rgb, k_par = jax.random.split(key, 3)

    pos = jax.random.normal(k_pos, (B, N, 3), jnp.float32)
    rgb = jax.random.uniform(k_rgb, (B, N, 6), jnp.float32)
    params = make_params(k_par, num_class=NUM_CLASS, channel=9)

    fwd = jax.jit(functools.partial(pointnet_semseg_forward, num_class=NUM_CLASS))
    res = jax.block_until_ready(fwd(params, pos, rgb))

    assert res["out"].shape == (B * N, NUM_CLASS)
    assert res["trans"].shape == (B, 3, 3)
    assert res["trans_feat"].shape == (B, 64, 64)
    out_np = np.asarray(res["out"])
    assert np.all(np.isfinite(out_np))
    # log-softmax rows should exponentiate-and-sum to ~1
    assert np.allclose(np.exp(out_np).sum(-1), 1.0, atol=1e-3)

    print("KERNEL_OK")
</pallas_src>

<mosaic_0001>
module attributes {stable_mosaic.version = 11 : i64} {
  func.func @_stn_convmax_kernel(%arg0: i32, %arg1: i32, %arg2: i32, %arg3: memref<1x16x9xf32, #tpu.memory_space<vmem>>, %arg4: memref<9x64xbf16, #tpu.memory_space<vmem>>, %arg5: memref<1x64xf32, #tpu.memory_space<vmem>>, %arg6: memref<1x64xf32, #tpu.memory_space<vmem>>, %arg7: memref<64x128xbf16, #tpu.memory_space<vmem>>, %arg8: memref<1x128xf32, #tpu.memory_space<vmem>>, %arg9: memref<1x128xf32, #tpu.memory_space<vmem>>, %arg10: memref<128x1024xbf16, #tpu.memory_space<vmem>>, %arg11: memref<1x1024xf32, #tpu.memory_space<vmem>>, %arg12: memref<1x1024xf32, #tpu.memory_space<vmem>>, %arg13: memref<1x1x1024xf32, #tpu.memory_space<vmem>>) attributes {dimension_semantics = [#tpu.dimension_semantics<parallel>, #tpu.dimension_semantics<parallel>, #tpu.dimension_semantics<arbitrary>], iteration_bounds = array<i64: 2, 1, 1>, scalar_prefetch = 0 : i64, scratch_operands = 0 : i64, tpu.core_type = #tpu.core_type<tc>, window_params = [{transform_indices = @transform_0, window_bounds = array<i64: 1, 16, 9>}, {pipeline_mode = #tpu.pipeline_mode<synchronous>, transform_indices = @transform_1, window_bounds = array<i64: 9, 64>}, {pipeline_mode = #tpu.pipeline_mode<synchronous>, transform_indices = @transform_2, window_bounds = array<i64: 1, 64>}, {pipeline_mode = #tpu.pipeline_mode<synchronous>, transform_indices = @transform_3, window_bounds = array<i64: 1, 64>}, {pipeline_mode = #tpu.pipeline_mode<synchronous>, transform_indices = @transform_4, window_bounds = array<i64: 64, 128>}, {pipeline_mode = #tpu.pipeline_mode<synchronous>, transform_indices = @transform_5, window_bounds = array<i64: 1, 128>}, {pipeline_mode = #tpu.pipeline_mode<synchronous>, transform_indices = @transform_6, window_bounds = array<i64: 1, 128>}, {pipeline_mode = #tpu.pipeline_mode<synchronous>, transform_indices = @transform_7, window_bounds = array<i64: 128, 1024>}, {pipeline_mode = #tpu.pipeline_mode<synchronous>, transform_indices = @transform_8, window_bounds = array<i64: 1, 1024>}, {pipeline_mode = #tpu.pipeline_mode<synchronous>, transform_indices = @transform_9, window_bounds = array<i64: 1, 1024>}, {transform_indices = @transform_10, window_bounds = array<i64: 1, 1, 1024>}]} {
    %c0 = arith.constant 0 : index
    %c0_0 = arith.constant 0 : index
    %c0_1 = arith.constant 0 : index
    %0 = vector.load %arg3[%c0, %c0_0, %c0_1] : memref<1x16x9xf32, #tpu.memory_space<vmem>>, vector<1x16x9xf32>
    %1 = vector.shape_cast %0 : vector<1x16x9xf32> to vector<16x9xf32>
    %2 = arith.truncf %1 : vector<16x9xf32> to vector<16x9xbf16>
    %c0_2 = arith.constant 0 : index
    %c0_3 = arith.constant 0 : index
    %3 = vector.load %arg4[%c0_2, %c0_3] : memref<9x64xbf16, #tpu.memory_space<vmem>>, vector<9x64xbf16>
    %cst = arith.constant dense<0.000000e+00> : vector<16x64xf32>
    %4 = tpu.matmul %2, %3, %cst {dimension_numbers = #tpu.dot_dimension_numbers<[1], [0], [0], [1], [0, 0, 1, 1], [], []>} : vector<16x9xbf16>, vector<9x64xbf16>, vector<16x64xf32> -> vector<16x64xf32>
    %c0_4 = arith.constant 0 : index
    %c0_5 = arith.constant 0 : index
    %5 = vector.load %arg5[%c0_4, %c0_5] : memref<1x64xf32, #tpu.memory_space<vmem>>, vector<1x64xf32>
    %6 = vector.broadcast %5 : vector<1x64xf32> to vector<16x64xf32>
    %7 = arith.mulf %4, %6 : vector<16x64xf32>
    %c0_6 = arith.constant 0 : index
    %c0_7 = arith.constant 0 : index
    %8 = vector.load %arg6[%c0_6, %c0_7] : memref<1x64xf32, #tpu.memory_space<vmem>>, vector<1x64xf32>
    %9 = vector.broadcast %8 : vector<1x64xf32> to vector<16x64xf32>
    %10 = arith.addf %7, %9 : vector<16x64xf32>
    %cst_8 = arith.constant 0.000000e+00 : f32
    %11 = vector.broadcast %cst_8 : f32 to vector<16x64xf32>
    %12 = arith.maximumf %10, %11 : vector<16x64xf32>
    %13 = arith.truncf %12 : vector<16x64xf32> to vector<16x64xbf16>
    %c0_9 = arith.constant 0 : index
    %c0_10 = arith.constant 0 : index
    %14 = vector.load %arg7[%c0_9, %c0_10] : memref<64x128xbf16, #tpu.memory_space<vmem>>, vector<64x128xbf16>
    %cst_11 = arith.constant dense<0.000000e+00> : vector<16x128xf32>
    %15 = tpu.matmul %13, %14, %cst_11 {dimension_numbers = #tpu.dot_dimension_numbers<[1], [0], [0], [1], [0, 0, 1, 1], [], []>} : vector<16x64xbf16>, vector<64x128xbf16>, vector<16x128xf32> -> vector<16x128xf32>
    %c0_12 = arith.constant 0 : index
    %c0_13 = arith.constant 0 : index
    %16 = vector.load %arg8[%c0_12, %c0_13] : memref<1x128xf32, #tpu.memory_space<vmem>>, vector<1x128xf32>
    %17 = vector.broadcast %16 : vector<1x128xf32> to vector<16x128xf32>
    %18 = arith.mulf %15, %17 : vector<16x128xf32>
    %c0_14 = arith.constant 0 : index
    %c0_15 = arith.constant 0 : index
    %19 = vector.load %arg9[%c0_14, %c0_15] : memref<1x128xf32, #tpu.memory_space<vmem>>, vector<1x128xf32>
    %20 = vector.broadcast %19 : vector<1x128xf32> to vector<16x128xf32>
    %21 = arith.addf %18, %20 : vector<16x128xf32>
    %cst_16 = arith.constant 0.000000e+00 : f32
    %22 = vector.broadcast %cst_16 : f32 to vector<16x128xf32>
    %23 = arith.maximumf %21, %22 : vector<16x128xf32>
    %24 = arith.truncf %23 : vector<16x128xf32> to vector<16x128xbf16>
    %c0_17 = arith.constant 0 : index
    %c0_18 = arith.constant 0 : index
    %25 = vector.load %arg10[%c0_17, %c0_18] : memref<128x1024xbf16, #tpu.memory_space<vmem>>, vector<128x1024xbf16>
    %cst_19 = arith.constant dense<0.000000e+00> : vector<16x1024xf32>
    %26 = tpu.matmul %24, %25, %cst_19 {dimension_numbers = #tpu.dot_dimension_numbers<[1], [0], [0], [1], [0, 0, 1, 1], [], []>} : vector<16x128xbf16>, vector<128x1024xbf16>, vector<16x1024xf32> -> vector<16x1024xf32>
    %c0_20 = arith.constant 0 : index
    %c0_21 = arith.constant 0 : index
    %27 = vector.load %arg11[%c0_20, %c0_21] : memref<1x1024xf32, #tpu.memory_space<vmem>>, vector<1x1024xf32>
    %28 = vector.broadcast %27 : vector<1x1024xf32> to vector<16x1024xf32>
    %29 = arith.mulf %26, %28 : vector<16x1024xf32>
    %c0_22 = arith.constant 0 : index
    %c0_23 = arith.constant 0 : index
    %30 = vector.load %arg12[%c0_22, %c0_23] : memref<1x1024xf32, #tpu.memory_space<vmem>>, vector<1x1024xf32>
    %31 = vector.broadcast %30 : vector<1x1024xf32> to vector<16x1024xf32>
    %32 = arith.addf %29, %31 : vector<16x1024xf32>
    %cst_24 = arith.constant 0.000000e+00 : f32
    %33 = vector.broadcast %cst_24 : f32 to vector<16x1024xf32>
    %34 = arith.maximumf %32, %33 : vector<16x1024xf32>
    %cst_25 = arith.constant dense<0xFF800000> : vector<1024xf32>
    %35 = vector.multi_reduction <maximumf>, %34, %cst_25 [0] : vector<16x1024xf32> to vector<1024xf32>
    %36 = vector.shape_cast %35 : vector<1024xf32> to vector<1x1024xf32>
    %c0_i32 = arith.constant 0 : i32
    %37 = arith.cmpi eq, %arg2, %c0_i32 : i32
    %38 = arith.extui %37 : i1 to i32
    %c0_i32_26 = arith.constant 0 : i32
    %39 = arith.cmpi ne, %38, %c0_i32_26 : i32
    scf.if %39 {
      %cst_33 = arith.constant 0xFF800000 : f32
      %46 = vector.broadcast %cst_33 : f32 to vector<1x1024xf32>
      %c0_34 = arith.constant 0 : index
      %c0_35 = arith.constant 0 : index
      %c0_36 = arith.constant 0 : index
      %47 = vector.load %arg13[%c0_34, %c0_35, %c0_36] : memref<1x1x1024xf32, #tpu.memory_space<vmem>>, vector<1x1x1024xf32>
      %48 = vector.shape_cast %47 : vector<1x1x1024xf32> to vector<1x1024xf32>
      %49 = vector.shape_cast %46 : vector<1x1024xf32> to vector<1x1x1024xf32>
      tpu.vector_store %arg13[%c0_34, %c0_35, %c0_36], %49 {strides = array<i32>} : memref<1x1x1024xf32, #tpu.memory_space<vmem>>, vector<1x1x1024xf32>,
    } else {
    }
    %c0_27 = arith.constant 0 : index
    %c0_28 = arith.constant 0 : index
    %c0_29 = arith.constant 0 : index
    %40 = vector.load %arg13[%c0_27, %c0_28, %c0_29] : memref<1x1x1024xf32, #tpu.memory_space<vmem>>, vector<1x1x1024xf32>
    %41 = vector.shape_cast %40 : vector<1x1x1024xf32> to vector<1x1024xf32>
    %42 = arith.maximumf %41, %36 : vector<1x1024xf32>
    %c0_30 = arith.constant 0 : index
    %c0_31 = arith.constant 0 : index
    %c0_32 = arith.constant 0 : index
    %43 = vector.load %arg13[%c0_30, %c0_31, %c0_32] : memref<1x1x1024xf32, #tpu.memory_space<vmem>>, vector<1x1x1024xf32>
    %44 = vector.shape_cast %43 : vector<1x1x1024xf32> to vector<1x1024xf32>
    %45 = vector.shape_cast %42 : vector<1x1024xf32> to vector<1x1x1024xf32>
    tpu.vector_store %arg13[%c0_30, %c0_31, %c0_32], %45 {strides = array<i32>} : memref<1x1x1024xf32, #tpu.memory_space<vmem>>, vector<1x1x1024xf32>,
    return
  }
  func.func @transform_0(%arg0: i32, %arg1: i32, %arg2: i32) -> (i32, i32, i32) {
    %c1_i32 = arith.constant 1 : i32
    %0 = arith.muli %arg1, %c1_i32 : i32
    %1 = arith.addi %0, %arg2 : i32
    %c0_i32 = arith.constant 0 : i32
    %c0_i32_0 = arith.constant 0 : i32
    return %arg0, %1, %c0_i32 : i32, i32, i32
  }
  func.func @transform_1(%arg0: i32, %arg1: i32, %arg2: i32) -> (i32, i32) {
    %c0_i32 = arith.constant 0 : i32
    %c0_i32_0 = arith.constant 0 : i32
    %c0_i32_1 = arith.constant 0 : i32
    return %c0_i32, %c0_i32_0 : i32, i32
  }
  func.func @transform_2(%arg0: i32, %arg1: i32, %arg2: i32) -> (i32, i32) {
    %c0_i32 = arith.constant 0 : i32
    %c0_i32_0 = arith.constant 0 : i32
    %c0_i32_1 = arith.constant 0 : i32
    return %c0_i32, %c0_i32_0 : i32, i32
  }
  func.func @transform_3(%arg0: i32, %arg1: i32, %arg2: i32) -> (i32, i32) {
    %c0_i32 = arith.constant 0 : i32
    %c0_i32_0 = arith.constant 0 : i32
    %c0_i32_1 = arith.constant 0 : i32
    return %c0_i32, %c0_i32_0 : i32, i32
  }
  func.func @transform_4(%arg0: i32, %arg1: i32, %arg2: i32) -> (i32, i32) {
    %c0_i32 = arith.constant 0 : i32
    %c0_i32_0 = arith.constant 0 : i32
    %c0_i32_1 = arith.constant 0 : i32
    return %c0_i32, %c0_i32_0 : i32, i32
  }
  func.func @transform_5(%arg0: i32, %arg1: i32, %arg2: i32) -> (i32, i32) {
    %c0_i32 = arith.constant 0 : i32
    %c0_i32_0 = arith.constant 0 : i32
    %c0_i32_1 = arith.constant 0 : i32
    return %c0_i32, %c0_i32_0 : i32, i32
  }
  func.func @transform_6(%arg0: i32, %arg1: i32, %arg2: i32) -> (i32, i32) {
    %c0_i32 = arith.constant 0 : i32
    %c0_i32_0 = arith.constant 0 : i32
    %c0_i32_1 = arith.constant 0 : i32
    return %c0_i32, %c0_i32_0 : i32, i32
  }
  func.func @transform_7(%arg0: i32, %arg1: i32, %arg2: i32) -> (i32, i32) {
    %c0_i32 = arith.constant 0 : i32
    %c0_i32_0 = arith.constant 0 : i32
    %c0_i32_1 = arith.constant 0 : i32
    return %c0_i32, %c0_i32_0 : i32, i32
  }
  func.func @transform_8(%arg0: i32, %arg1: i32, %arg2: i32) -> (i32, i32) {
    %c0_i32 = arith.constant 0 : i32
    %c0_i32_0 = arith.constant 0 : i32
    %c0_i32_1 = arith.constant 0 : i32
    return %c0_i32, %c0_i32_0 : i32, i32
  }
  func.func @transform_9(%arg0: i32, %arg1: i32, %arg2: i32) -> (i32, i32) {
    %c0_i32 = arith.constant 0 : i32
    %c0_i32_0 = arith.constant 0 : i32
    %c0_i32_1 = arith.constant 0 : i32
    return %c0_i32, %c0_i32_0 : i32, i32
  }
  func.func @transform_10(%arg0: i32, %arg1: i32, %arg2: i32) -> (i32, i32, i32) {
    %c1_i32 = arith.constant 1 : i32
    %0 = arith.muli %arg0, %c1_i32 : i32
    %1 = arith.addi %0, %arg1 : i32
    %c0_i32 = arith.constant 0 : i32
    %c0_i32_0 = arith.constant 0 : i32
    %c0_i32_1 = arith.constant 0 : i32
    return %1, %c0_i32, %c0_i32_0 : i32, i32, i32
  }
}

module attributes {stable_mosaic.version = 11 : i64} {
  func.func @_conv1_fstn_kernel(%arg0: i32, %arg1: i32, %arg2: i32, %arg3: memref<1x16x9xf32, #tpu.memory_space<vmem>>, %arg4: memref<1x9x64xbf16, #tpu.memory_space<vmem>>, %arg5: memref<1x64xf32, #tpu.memory_space<vmem>>, %arg6: memref<1x64xf32, #tpu.memory_space<vmem>>, %arg7: memref<64x64xbf16, #tpu.memory_space<vmem>>, %arg8: memref<1x64xf32, #tpu.memory_space<vmem>>, %arg9: memref<1x64xf32, #tpu.memory_space<vmem>>, %arg10: memref<64x128xbf16, #tpu.memory_space<vmem>>, %arg11: memref<1x128xf32, #tpu.memory_space<vmem>>, %arg12: memref<1x128xf32, #tpu.memory_space<vmem>>, %arg13: memref<128x1024xbf16, #tpu.memory_space<vmem>>, %arg14: memref<1x1024xf32, #tpu.memory_space<vmem>>, %arg15: memref<1x1024xf32, #tpu.memory_space<vmem>>, %arg16: memref<1x16x64xbf16, #tpu.memory_space<vmem>>, %arg17: memref<1x1x1024xf32, #tpu.memory_space<vmem>>) attributes {dimension_semantics = [#tpu.dimension_semantics<parallel>, #tpu.dimension_semantics<parallel>, #tpu.dimension_semantics<arbitrary>], iteration_bounds = array<i64: 2, 1, 1>, scalar_prefetch = 0 : i64, scratch_operands = 0 : i64, tpu.core_type = #tpu.core_type<tc>, window_params = [{transform_indices = @transform_0, window_bounds = array<i64: 1, 16, 9>}, {transform_indices = @transform_1, window_bounds = array<i64: 1, 9, 64>}, {pipeline_mode = #tpu.pipeline_mode<synchronous>, transform_indices = @transform_2, window_bounds = array<i64: 1, 64>}, {pipeline_mode = #tpu.pipeline_mode<synchronous>, transform_indices = @transform_3, window_bounds = array<i64: 1, 64>}, {pipeline_mode = #tpu.pipeline_mode<synchronous>, transform_indices = @transform_4, window_bounds = array<i64: 64, 64>}, {pipeline_mode = #tpu.pipeline_mode<synchronous>, transform_indices = @transform_5, window_bounds = array<i64: 1, 64>}, {pipeline_mode = #tpu.pipeline_mode<synchronous>, transform_indices = @transform_6, window_bounds = array<i64: 1, 64>}, {pipeline_mode = #tpu.pipeline_mode<synchronous>, transform_indices = @transform_7, window_bounds = array<i64: 64, 128>}, {pipeline_mode = #tpu.pipeline_mode<synchronous>, transform_indices = @transform_8, window_bounds = array<i64: 1, 128>}, {pipeline_mode = #tpu.pipeline_mode<synchronous>, transform_indices = @transform_9, window_bounds = array<i64: 1, 128>}, {pipeline_mode = #tpu.pipeline_mode<synchronous>, transform_indices = @transform_10, window_bounds = array<i64: 128, 1024>}, {pipeline_mode = #tpu.pipeline_mode<synchronous>, transform_indices = @transform_11, window_bounds = array<i64: 1, 1024>}, {pipeline_mode = #tpu.pipeline_mode<synchronous>, transform_indices = @transform_12, window_bounds = array<i64: 1, 1024>}, {transform_indices = @transform_13, window_bounds = array<i64: 1, 16, 64>}, {transform_indices = @transform_14, window_bounds = array<i64: 1, 1, 1024>}]} {
    %c0 = arith.constant 0 : index
    %c0_0 = arith.constant 0 : index
    %c0_1 = arith.constant 0 : index
    %0 = vector.load %arg3[%c0, %c0_0, %c0_1] : memref<1x16x9xf32, #tpu.memory_space<vmem>>, vector<1x16x9xf32>
    %1 = vector.shape_cast %0 : vector<1x16x9xf32> to vector<16x9xf32>
    %2 = arith.truncf %1 : vector<16x9xf32> to vector<16x9xbf16>
    %c0_2 = arith.constant 0 : index
    %c0_3 = arith.constant 0 : index
    %c0_4 = arith.constant 0 : index
    %3 = vector.load %arg4[%c0_2, %c0_3, %c0_4] : memref<1x9x64xbf16, #tpu.memory_space<vmem>>, vector<1x9x64xbf16>
    %4 = vector.shape_cast %3 : vector<1x9x64xbf16> to vector<9x64xbf16>
    %cst = arith.constant dense<0.000000e+00> : vector<16x64xf32>
    %5 = tpu.matmul %2, %4, %cst {dimension_numbers = #tpu.dot_dimension_numbers<[1], [0], [0], [1], [0, 0, 1, 1], [], []>} : vector<16x9xbf16>, vector<9x64xbf16>, vector<16x64xf32> -> vector<16x64xf32>
    %c0_5 = arith.constant 0 : index
    %c0_6 = arith.constant 0 : index
    %6 = vector.load %arg5[%c0_5, %c0_6] : memref<1x64xf32, #tpu.memory_space<vmem>>, vector<1x64xf32>
    %7 = vector.broadcast %6 : vector<1x64xf32> to vector<16x64xf32>
    %8 = arith.mulf %5, %7 : vector<16x64xf32>
    %c0_7 = arith.constant 0 : index
    %c0_8 = arith.constant 0 : index
    %9 = vector.load %arg6[%c0_7, %c0_8] : memref<1x64xf32, #tpu.memory_space<vmem>>, vector<1x64xf32>
    %10 = vector.broadcast %9 : vector<1x64xf32> to vector<16x64xf32>
    %11 = arith.addf %8, %10 : vector<16x64xf32>
    %cst_9 = arith.constant 0.000000e+00 : f32
    %12 = vector.broadcast %cst_9 : f32 to vector<16x64xf32>
    %13 = arith.maximumf %11, %12 : vector<16x64xf32>
    %14 = arith.truncf %13 : vector<16x64xf32> to vector<16x64xbf16>
    %c0_10 = arith.constant 0 : index
    %c0_11 = arith.constant 0 : index
    %c0_12 = arith.constant 0 : index
    %15 = vector.load %arg16[%c0_10, %c0_11, %c0_12] : memref<1x16x64xbf16, #tpu.memory_space<vmem>>, vector<1x16x64xbf16>
    %16 = vector.shape_cast %15 : vector<1x16x64xbf16> to vector<16x64xbf16>
    %17 = vector.shape_cast %14 : vector<16x64xbf16> to vector<1x16x64xbf16>
    tpu.vector_store %arg16[%c0_10, %c0_11, %c0_12], %17 {strides = array<i32>} : memref<1x16x64xbf16, #tpu.memory_space<vmem>>, vector<1x16x64xbf16>,
    %c0_13 = arith.constant 0 : index
    %c0_14 = arith.constant 0 : index
    %18 = vector.load %arg7[%c0_13, %c0_14] : memref<64x64xbf16, #tpu.memory_space<vmem>>, vector<64x64xbf16>
    %cst_15 = arith.constant dense<0.000000e+00> : vector<16x64xf32>
    %19 = tpu.matmul %14, %18, %cst_15 {dimension_numbers = #tpu.dot_dimension_numbers<[1], [0], [0], [1], [0, 0, 1, 1], [], []>} : vector<16x64xbf16>, vector<64x64xbf16>, vector<16x64xf32> -> vector<16x64xf32>
    %c0_16 = arith.constant 0 : index
    %c0_17 = arith.constant 0 : index
    %20 = vector.load %arg8[%c0_16, %c0_17] : memref<1x64xf32, #tpu.memory_space<vmem>>, vector<1x64xf32>
    %21 = vector.broadcast %20 : vector<1x64xf32> to vector<16x64xf32>
    %22 = arith.mulf %19, %21 : vector<16x64xf32>
    %c0_18 = arith.constant 0 : index
    %c0_19 = arith.constant 0 : index
    %23 = vector.load %arg9[%c0_18, %c0_19] : memref<1x64xf32, #tpu.memory_space<vmem>>, vector<1x64xf32>
    %24 = vector.broadcast %23 : vector<1x64xf32> to vector<16x64xf32>
    %25 = arith.addf %22, %24 : vector<16x64xf32>
    %cst_20 = arith.constant 0.000000e+00 : f32
    %26 = vector.broadcast %cst_20 : f32 to vector<16x64xf32>
    %27 = arith.maximumf %25, %26 : vector<16x64xf32>
    %28 = arith.truncf %27 : vector<16x64xf32> to vector<16x64xbf16>
    %c0_21 = arith.constant 0 : index
    %c0_22 = arith.constant 0 : index
    %29 = vector.load %arg10[%c0_21, %c0_22] : memref<64x128xbf16, #tpu.memory_space<vmem>>, vector<64x128xbf16>
    %cst_23 = arith.constant dense<0.000000e+00> : vector<16x128xf32>
    %30 = tpu.matmul %28, %29, %cst_23 {dimension_numbers = #tpu.dot_dimension_numbers<[1], [0], [0], [1], [0, 0, 1, 1], [], []>} : vector<16x64xbf16>, vector<64x128xbf16>, vector<16x128xf32> -> vector<16x128xf32>
    %c0_24 = arith.constant 0 : index
    %c0_25 = arith.constant 0 : index
    %31 = vector.load %arg11[%c0_24, %c0_25] : memref<1x128xf32, #tpu.memory_space<vmem>>, vector<1x128xf32>
    %32 = vector.broadcast %31 : vector<1x128xf32> to vector<16x128xf32>
    %33 = arith.mulf %30, %32 : vector<16x128xf32>
    %c0_26 = arith.constant 0 : index
    %c0_27 = arith.constant 0 : index
    %34 = vector.load %arg12[%c0_26, %c0_27] : memref<1x128xf32, #tpu.memory_space<vmem>>, vector<1x128xf32>
    %35 = vector.broadcast %34 : vector<1x128xf32> to vector<16x128xf32>
    %36 = arith.addf %33, %35 : vector<16x128xf32>
    %cst_28 = arith.constant 0.000000e+00 : f32
    %37 = vector.broadcast %cst_28 : f32 to vector<16x128xf32>
    %38 = arith.maximumf %36, %37 : vector<16x128xf32>
    %39 = arith.truncf %38 : vector<16x128xf32> to vector<16x128xbf16>
    %c0_29 = arith.constant 0 : index
    %c0_30 = arith.constant 0 : index
    %40 = vector.load %arg13[%c0_29, %c0_30] : memref<128x1024xbf16, #tpu.memory_space<vmem>>, vector<128x1024xbf16>
    %cst_31 = arith.constant dense<0.000000e+00> : vector<16x1024xf32>
    %41 = tpu.matmul %39, %40, %cst_31 {dimension_numbers = #tpu.dot_dimension_numbers<[1], [0], [0], [1], [0, 0, 1, 1], [], []>} : vector<16x128xbf16>, vector<128x1024xbf16>, vector<16x1024xf32> -> vector<16x1024xf32>
    %c0_32 = arith.constant 0 : index
    %c0_33 = arith.constant 0 : index
    %42 = vector.load %arg14[%c0_32, %c0_33] : memref<1x1024xf32, #tpu.memory_space<vmem>>, vector<1x1024xf32>
    %43 = vector.broadcast %42 : vector<1x1024xf32> to vector<16x1024xf32>
    %44 = arith.mulf %41, %43 : vector<16x1024xf32>
    %c0_34 = arith.constant 0 : index
    %c0_35 = arith.constant 0 : index
    %45 = vector.load %arg15[%c0_34, %c0_35] : memref<1x1024xf32, #tpu.memory_space<vmem>>, vector<1x1024xf32>
    %46 = vector.broadcast %45 : vector<1x1024xf32> to vector<16x1024xf32>
    %47 = arith.addf %44, %46 : vector<16x1024xf32>
    %cst_36 = arith.constant 0.000000e+00 : f32
    %48 = vector.broadcast %cst_36 : f32 to vector<16x1024xf32>
    %49 = arith.maximumf %47, %48 : vector<16x1024xf32>
    %cst_37 = arith.constant dense<0xFF800000> : vector<1024xf32>
    %50 = vector.multi_reduction <maximumf>, %49, %cst_37 [0] : vector<16x1024xf32> to vector<1024xf32>
    %51 = vector.shape_cast %50 : vector<1024xf32> to vector<1x1024xf32>
    %c0_i32 = arith.constant 0 : i32
    %52 = arith.cmpi eq, %arg2, %c0_i32 : i32
    %53 = arith.extui %52 : i1 to i32
    %c0_i32_38 = arith.constant 0 : i32
    %54 = arith.cmpi ne, %53, %c0_i32_38 : i32
    scf.if %54 {
      %cst_45 = arith.constant 0xFF800000 : f32
      %61 = vector.broadcast %cst_45 : f32 to vector<1x1024xf32>
      %c0_46 = arith.constant 0 : index
      %c0_47 = arith.constant 0 : index
      %c0_48 = arith.constant 0 : index
      %62 = vector.load %arg17[%c0_46, %c0_47, %c0_48] : memref<1x1x1024xf32, #tpu.memory_space<vmem>>, vector<1x1x1024xf32>
      %63 = vector.shape_cast %62 : vector<1x1x1024xf32> to vector<1x1024xf32>
      %64 = vector.shape_cast %61 : vector<1x1024xf32> to vector<1x1x1024xf32>
      tpu.vector_store %arg17[%c0_46, %c0_47, %c0_48], %64 {strides = array<i32>} : memref<1x1x1024xf32, #tpu.memory_space<vmem>>, vector<1x1x1024xf32>,
    } else {
    }
    %c0_39 = arith.constant 0 : index
    %c0_40 = arith.constant 0 : index
    %c0_41 = arith.constant 0 : index
    %55 = vector.load %arg17[%c0_39, %c0_40, %c0_41] : memref<1x1x1024xf32, #tpu.memory_space<vmem>>, vector<1x1x1024xf32>
    %56 = vector.shape_cast %55 : vector<1x1x1024xf32> to vector<1x1024xf32>
    %57 = arith.maximumf %56, %51 : vector<1x1024xf32>
    %c0_42 = arith.constant 0 : index
    %c0_43 = arith.constant 0 : index
    %c0_44 = arith.constant 0 : index
    %58 = vector.load %arg17[%c0_42, %c0_43, %c0_44] : memref<1x1x1024xf32, #tpu.memory_space<vmem>>, vector<1x1x1024xf32>
    %59 = vector.shape_cast %58 : vector<1x1x1024xf32> to vector<1x1024xf32>
    %60 = vector.shape_cast %57 : vector<1x1024xf32> to vector<1x1x1024xf32>
    tpu.vector_store %arg17[%c0_42, %c0_43, %c0_44], %60 {strides = array<i32>} : memref<1x1x1024xf32, #tpu.memory_space<vmem>>, vector<1x1x1024xf32>,
    return
  }
  func.func @transform_0(%arg0: i32, %arg1: i32, %arg2: i32) -> (i32, i32, i32) {
    %c1_i32 = arith.constant 1 : i32
    %0 = arith.muli %arg1, %c1_i32 : i32
    %1 = arith.addi %0, %arg2 : i32
    %c0_i32 = arith.constant 0 : i32
    %c0_i32_0 = arith.constant 0 : i32
    return %arg0, %1, %c0_i32 : i32, i32, i32
  }
  func.func @transform_1(%arg0: i32, %arg1: i32, %arg2: i32) -> (i32, i32, i32) {
    %c0_i32 = arith.constant 0 : i32
    %c0_i32_0 = arith.constant 0 : i32
    %c0_i32_1 = arith.constant 0 : i32
    return %arg0, %c0_i32, %c0_i32_0 : i32, i32, i32
  }
  func.func @transform_2(%arg0: i32, %arg1: i32, %arg2: i32) -> (i32, i32) {
    %c0_i32 = arith.constant 0 : i32
    %c0_i32_0 = arith.constant 0 : i32
    %c0_i32_1 = arith.constant 0 : i32
    return %c0_i32, %c0_i32_0 : i32, i32
  }
  func.func @transform_3(%arg0: i32, %arg1: i32, %arg2: i32) -> (i32, i32) {
    %c0_i32 = arith.constant 0 : i32
    %c0_i32_0 = arith.constant 0 : i32
    %c0_i32_1 = arith.constant 0 : i32
    return %c0_i32, %c0_i32_0 : i32, i32
  }
  func.func @transform_4(%arg0: i32, %arg1: i32, %arg2: i32) -> (i32, i32) {
    %c0_i32 = arith.constant 0 : i32
    %c0_i32_0 = arith.constant 0 : i32
    %c0_i32_1 = arith.constant 0 : i32
    return %c0_i32, %c0_i32_0 : i32, i32
  }
  func.func @transform_5(%arg0: i32, %arg1: i32, %arg2: i32) -> (i32, i32) {
    %c0_i32 = arith.constant 0 : i32
    %c0_i32_0 = arith.constant 0 : i32
    %c0_i32_1 = arith.constant 0 : i32
    return %c0_i32, %c0_i32_0 : i32, i32
  }
  func.func @transform_6(%arg0: i32, %arg1: i32, %arg2: i32) -> (i32, i32) {
    %c0_i32 = arith.constant 0 : i32
    %c0_i32_0 = arith.constant 0 : i32
    %c0_i32_1 = arith.constant 0 : i32
    return %c0_i32, %c0_i32_0 : i32, i32
  }
  func.func @transform_7(%arg0: i32, %arg1: i32, %arg2: i32) -> (i32, i32) {
    %c0_i32 = arith.constant 0 : i32
    %c0_i32_0 = arith.constant 0 : i32
    %c0_i32_1 = arith.constant 0 : i32
    return %c0_i32, %c0_i32_0 : i32, i32
  }
  func.func @transform_8(%arg0: i32, %arg1: i32, %arg2: i32) -> (i32, i32) {
    %c0_i32 = arith.constant 0 : i32
    %c0_i32_0 = arith.constant 0 : i32
    %c0_i32_1 = arith.constant 0 : i32
    return %c0_i32, %c0_i32_0 : i32, i32
  }
  func.func @transform_9(%arg0: i32, %arg1: i32, %arg2: i32) -> (i32, i32) {
    %c0_i32 = arith.constant 0 : i32
    %c0_i32_0 = arith.constant 0 : i32
    %c0_i32_1 = arith.constant 0 : i32
    return %c0_i32, %c0_i32_0 : i32, i32
  }
  func.func @transform_10(%arg0: i32, %arg1: i32, %arg2: i32) -> (i32, i32) {
    %c0_i32 = arith.constant 0 : i32
    %c0_i32_0 = arith.constant 0 : i32
    %c0_i32_1 = arith.constant 0 : i32
    return %c0_i32, %c0_i32_0 : i32, i32
  }
  func.func @transform_11(%arg0: i32, %arg1: i32, %arg2: i32) -> (i32, i32) {
    %c0_i32 = arith.constant 0 : i32
    %c0_i32_0 = arith.constant 0 : i32
    %c0_i32_1 = arith.constant 0 : i32
    return %c0_i32, %c0_i32_0 : i32, i32
  }
  func.func @transform_12(%arg0: i32, %arg1: i32, %arg2: i32) -> (i32, i32) {
    %c0_i32 = arith.constant 0 : i32
    %c0_i32_0 = arith.constant 0 : i32
    %c0_i32_1 = arith.constant 0 : i32
    return %c0_i32, %c0_i32_0 : i32, i32
  }
  func.func @transform_13(%arg0: i32, %arg1: i32, %arg2: i32) -> (i32, i32, i32) {
    %c1_i32 = arith.constant 1 : i32
    %0 = arith.muli %arg1, %c1_i32 : i32
    %1 = arith.addi %0, %arg2 : i32
    %c0_i32 = arith.constant 0 : i32
    %c0_i32_0 = arith.constant 0 : i32
    return %arg0, %1, %c0_i32 : i32, i32, i32
  }
  func.func @transform_14(%arg0: i32, %arg1: i32, %arg2: i32) -> (i32, i32, i32) {
    %c1_i32 = arith.constant 1 : i32
    %0 = arith.muli %arg0, %c1_i32 : i32
    %1 = arith.addi %0, %arg1 : i32
    %c0_i32 = arith.constant 0 : i32
    %c0_i32_0 = arith.constant 0 : i32
    %c0_i32_1 = arith.constant 0 : i32
    return %1, %c0_i32, %c0_i32_0 : i32, i32, i32
  }
}

module attributes {stable_mosaic.version = 11 : i64} {
  func.func @_enc_tail_kernel(%arg0: i32, %arg1: i32, %arg2: i32, %arg3: memref<1x16x64xbf16, #tpu.memory_space<vmem>>, %arg4: memref<1x64x128xbf16, #tpu.memory_space<vmem>>, %arg5: memref<1x128xf32, #tpu.memory_space<vmem>>, %arg6: memref<1x128xf32, #tpu.memory_space<vmem>>, %arg7: memref<128x1024xbf16, #tpu.memory_space<vmem>>, %arg8: memref<1x1024xf32, #tpu.memory_space<vmem>>, %arg9: memref<1x1024xf32, #tpu.memory_space<vmem>>, %arg10: memref<1x1x1024xf32, #tpu.memory_space<vmem>>) attributes {dimension_semantics = [#tpu.dimension_semantics<parallel>, #tpu.dimension_semantics<parallel>, #tpu.dimension_semantics<arbitrary>], iteration_bounds = array<i64: 2, 1, 1>, scalar_prefetch = 0 : i64, scratch_operands = 0 : i64, tpu.core_type = #tpu.core_type<tc>, window_params = [{transform_indices = @transform_0, window_bounds = array<i64: 1, 16, 64>}, {transform_indices = @transform_1, window_bounds = array<i64: 1, 64, 128>}, {pipeline_mode = #tpu.pipeline_mode<synchronous>, transform_indices = @transform_2, window_bounds = array<i64: 1, 128>}, {pipeline_mode = #tpu.pipeline_mode<synchronous>, transform_indices = @transform_3, window_bounds = array<i64: 1, 128>}, {pipeline_mode = #tpu.pipeline_mode<synchronous>, transform_indices = @transform_4, window_bounds = array<i64: 128, 1024>}, {pipeline_mode = #tpu.pipeline_mode<synchronous>, transform_indices = @transform_5, window_bounds = array<i64: 1, 1024>}, {pipeline_mode = #tpu.pipeline_mode<synchronous>, transform_indices = @transform_6, window_bounds = array<i64: 1, 1024>}, {transform_indices = @transform_7, window_bounds = array<i64: 1, 1, 1024>}]} {
    %c0 = arith.constant 0 : index
    %c0_0 = arith.constant 0 : index
    %c0_1 = arith.constant 0 : index
    %0 = vector.load %arg3[%c0, %c0_0, %c0_1] : memref<1x16x64xbf16, #tpu.memory_space<vmem>>, vector<1x16x64xbf16>
    %1 = vector.shape_cast %0 : vector<1x16x64xbf16> to vector<16x64xbf16>
    %c0_2 = arith.constant 0 : index
    %c0_3 = arith.constant 0 : index
    %c0_4 = arith.constant 0 : index
    %2 = vector.load %arg4[%c0_2, %c0_3, %c0_4] : memref<1x64x128xbf16, #tpu.memory_space<vmem>>, vector<1x64x128xbf16>
    %3 = vector.shape_cast %2 : vector<1x64x128xbf16> to vector<64x128xbf16>
    %cst = arith.constant dense<0.000000e+00> : vector<16x128xf32>
    %4 = tpu.matmul %1, %3, %cst {dimension_numbers = #tpu.dot_dimension_numbers<[1], [0], [0], [1], [0, 0, 1, 1], [], []>} : vector<16x64xbf16>, vector<64x128xbf16>, vector<16x128xf32> -> vector<16x128xf32>
    %c0_5 = arith.constant 0 : index
    %c0_6 = arith.constant 0 : index
    %5 = vector.load %arg5[%c0_5, %c0_6] : memref<1x128xf32, #tpu.memory_space<vmem>>, vector<1x128xf32>
    %6 = vector.broadcast %5 : vector<1x128xf32> to vector<16x128xf32>
    %7 = arith.mulf %4, %6 : vector<16x128xf32>
    %c0_7 = arith.constant 0 : index
    %c0_8 = arith.constant 0 : index
    %8 = vector.load %arg6[%c0_7, %c0_8] : memref<1x128xf32, #tpu.memory_space<vmem>>, vector<1x128xf32>
    %9 = vector.broadcast %8 : vector<1x128xf32> to vector<16x128xf32>
    %10 = arith.addf %7, %9 : vector<16x128xf32>
    %cst_9 = arith.constant 0.000000e+00 : f32
    %11 = vector.broadcast %cst_9 : f32 to vector<16x128xf32>
    %12 = arith.maximumf %10, %11 : vector<16x128xf32>
    %13 = arith.truncf %12 : vector<16x128xf32> to vector<16x128xbf16>
    %c0_10 = arith.constant 0 : index
    %c0_11 = arith.constant 0 : index
    %14 = vector.load %arg7[%c0_10, %c0_11] : memref<128x1024xbf16, #tpu.memory_space<vmem>>, vector<128x1024xbf16>
    %cst_12 = arith.constant dense<0.000000e+00> : vector<16x1024xf32>
    %15 = tpu.matmul %13, %14, %cst_12 {dimension_numbers = #tpu.dot_dimension_numbers<[1], [0], [0], [1], [0, 0, 1, 1], [], []>} : vector<16x128xbf16>, vector<128x1024xbf16>, vector<16x1024xf32> -> vector<16x1024xf32>
    %c0_13 = arith.constant 0 : index
    %c0_14 = arith.constant 0 : index
    %16 = vector.load %arg8[%c0_13, %c0_14] : memref<1x1024xf32, #tpu.memory_space<vmem>>, vector<1x1024xf32>
    %17 = vector.broadcast %16 : vector<1x1024xf32> to vector<16x1024xf32>
    %18 = arith.mulf %15, %17 : vector<16x1024xf32>
    %c0_15 = arith.constant 0 : index
    %c0_16 = arith.constant 0 : index
    %19 = vector.load %arg9[%c0_15, %c0_16] : memref<1x1024xf32, #tpu.memory_space<vmem>>, vector<1x1024xf32>
    %20 = vector.broadcast %19 : vector<1x1024xf32> to vector<16x1024xf32>
    %21 = arith.addf %18, %20 : vector<16x1024xf32>
    %cst_17 = arith.constant dense<0xFF800000> : vector<1024xf32>
    %22 = vector.multi_reduction <maximumf>, %21, %cst_17 [0] : vector<16x1024xf32> to vector<1024xf32>
    %23 = vector.shape_cast %22 : vector<1024xf32> to vector<1x1024xf32>
    %c0_i32 = arith.constant 0 : i32
    %24 = arith.cmpi eq, %arg2, %c0_i32 : i32
    %25 = arith.extui %24 : i1 to i32
    %c0_i32_18 = arith.constant 0 : i32
    %26 = arith.cmpi ne, %25, %c0_i32_18 : i32
    scf.if %26 {
      %cst_25 = arith.constant 0xFF800000 : f32
      %33 = vector.broadcast %cst_25 : f32 to vector<1x1024xf32>
      %c0_26 = arith.constant 0 : index
      %c0_27 = arith.constant 0 : index
      %c0_28 = arith.constant 0 : index
      %34 = vector.load %arg10[%c0_26, %c0_27, %c0_28] : memref<1x1x1024xf32, #tpu.memory_space<vmem>>, vector<1x1x1024xf32>
      %35 = vector.shape_cast %34 : vector<1x1x1024xf32> to vector<1x1024xf32>
      %36 = vector.shape_cast %33 : vector<1x1024xf32> to vector<1x1x1024xf32>
      tpu.vector_store %arg10[%c0_26, %c0_27, %c0_28], %36 {strides = array<i32>} : memref<1x1x1024xf32, #tpu.memory_space<vmem>>, vector<1x1x1024xf32>,
    } else {
    }
    %c0_19 = arith.constant 0 : index
    %c0_20 = arith.constant 0 : index
    %c0_21 = arith.constant 0 : index
    %27 = vector.load %arg10[%c0_19, %c0_20, %c0_21] : memref<1x1x1024xf32, #tpu.memory_space<vmem>>, vector<1x1x1024xf32>
    %28 = vector.shape_cast %27 : vector<1x1x1024xf32> to vector<1x1024xf32>
    %29 = arith.maximumf %28, %23 : vector<1x1024xf32>
    %c0_22 = arith.constant 0 : index
    %c0_23 = arith.constant 0 : index
    %c0_24 = arith.constant 0 : index
    %30 = vector.load %arg10[%c0_22, %c0_23, %c0_24] : memref<1x1x1024xf32, #tpu.memory_space<vmem>>, vector<1x1x1024xf32>
    %31 = vector.shape_cast %30 : vector<1x1x1024xf32> to vector<1x1024xf32>
    %32 = vector.shape_cast %29 : vector<1x1024xf32> to vector<1x1x1024xf32>
    tpu.vector_store %arg10[%c0_22, %c0_23, %c0_24], %32 {strides = array<i32>} : memref<1x1x1024xf32, #tpu.memory_space<vmem>>, vector<1x1x1024xf32>,
    return
  }
  func.func @transform_0(%arg0: i32, %arg1: i32, %arg2: i32) -> (i32, i32, i32) {
    %c1_i32 = arith.constant 1 : i32
    %0 = arith.muli %arg1, %c1_i32 : i32
    %1 = arith.addi %0, %arg2 : i32
    %c0_i32 = arith.constant 0 : i32
    %c0_i32_0 = arith.constant 0 : i32
    return %arg0, %1, %c0_i32 : i32, i32, i32
  }
  func.func @transform_1(%arg0: i32, %arg1: i32, %arg2: i32) -> (i32, i32, i32) {
    %c0_i32 = arith.constant 0 : i32
    %c0_i32_0 = arith.constant 0 : i32
    %c0_i32_1 = arith.constant 0 : i32
    return %arg0, %c0_i32, %c0_i32_0 : i32, i32, i32
  }
  func.func @transform_2(%arg0: i32, %arg1: i32, %arg2: i32) -> (i32, i32) {
    %c0_i32 = arith.constant 0 : i32
    %c0_i32_0 = arith.constant 0 : i32
    %c0_i32_1 = arith.constant 0 : i32
    return %c0_i32, %c0_i32_0 : i32, i32
  }
  func.func @transform_3(%arg0: i32, %arg1: i32, %arg2: i32) -> (i32, i32) {
    %c0_i32 = arith.constant 0 : i32
    %c0_i32_0 = arith.constant 0 : i32
    %c0_i32_1 = arith.constant 0 : i32
    return %c0_i32, %c0_i32_0 : i32, i32
  }
  func.func @transform_4(%arg0: i32, %arg1: i32, %arg2: i32) -> (i32, i32) {
    %c0_i32 = arith.constant 0 : i32
    %c0_i32_0 = arith.constant 0 : i32
    %c0_i32_1 = arith.constant 0 : i32
    return %c0_i32, %c0_i32_0 : i32, i32
  }
  func.func @transform_5(%arg0: i32, %arg1: i32, %arg2: i32) -> (i32, i32) {
    %c0_i32 = arith.constant 0 : i32
    %c0_i32_0 = arith.constant 0 : i32
    %c0_i32_1 = arith.constant 0 : i32
    return %c0_i32, %c0_i32_0 : i32, i32
  }
  func.func @transform_6(%arg0: i32, %arg1: i32, %arg2: i32) -> (i32, i32) {
    %c0_i32 = arith.constant 0 : i32
    %c0_i32_0 = arith.constant 0 : i32
    %c0_i32_1 = arith.constant 0 : i32
    return %c0_i32, %c0_i32_0 : i32, i32
  }
  func.func @transform_7(%arg0: i32, %arg1: i32, %arg2: i32) -> (i32, i32, i32) {
    %c1_i32 = arith.constant 1 : i32
    %0 = arith.muli %arg0, %c1_i32 : i32
    %1 = arith.addi %0, %arg1 : i32
    %c0_i32 = arith.constant 0 : i32
    %c0_i32_0 = arith.constant 0 : i32
    %c0_i32_1 = arith.constant 0 : i32
    return %1, %c0_i32, %c0_i32_0 : i32, i32, i32
  }
}

module attributes {stable_mosaic.version = 11 : i64} {
  func.func @_seg_head_kernel(%arg0: i32, %arg1: i32, %arg2: memref<1x16x64xbf16, #tpu.memory_space<vmem>>, %arg3: memref<1x64x512xbf16, #tpu.memory_space<vmem>>, %arg4: memref<1x512xf32, #tpu.memory_space<vmem>>, %arg5: memref<1x1x512xf32, #tpu.memory_space<vmem>>, %arg6: memref<512x256xbf16, #tpu.memory_space<vmem>>, %arg7: memref<1x256xf32, #tpu.memory_space<vmem>>, %arg8: memref<1x256xf32, #tpu.memory_space<vmem>>, %arg9: memref<256x128xbf16, #tpu.memory_space<vmem>>, %arg10: memref<1x128xf32, #tpu.memory_space<vmem>>, %arg11: memref<1x128xf32, #tpu.memory_space<vmem>>, %arg12: memref<128x128xbf16, #tpu.memory_space<vmem>>, %arg13: memref<1x128xf32, #tpu.memory_space<vmem>>, %arg14: memref<1x16x128xf32, #tpu.memory_space<vmem>>) attributes {dimension_semantics = [#tpu.dimension_semantics<parallel>, #tpu.dimension_semantics<parallel>], iteration_bounds = array<i64: 2, 1>, scalar_prefetch = 0 : i64, scratch_operands = 0 : i64, tpu.core_type = #tpu.core_type<tc>, window_params = [{transform_indices = @transform_0, window_bounds = array<i64: 1, 16, 64>}, {transform_indices = @transform_1, window_bounds = array<i64: 1, 64, 512>}, {pipeline_mode = #tpu.pipeline_mode<synchronous>, transform_indices = @transform_2, window_bounds = array<i64: 1, 512>}, {transform_indices = @transform_3, window_bounds = array<i64: 1, 1, 512>}, {pipeline_mode = #tpu.pipeline_mode<synchronous>, transform_indices = @transform_4, window_bounds = array<i64: 512, 256>}, {pipeline_mode = #tpu.pipeline_mode<synchronous>, transform_indices = @transform_5, window_bounds = array<i64: 1, 256>}, {pipeline_mode = #tpu.pipeline_mode<synchronous>, transform_indices = @transform_6, window_bounds = array<i64: 1, 256>}, {pipeline_mode = #tpu.pipeline_mode<synchronous>, transform_indices = @transform_7, window_bounds = array<i64: 256, 128>}, {pipeline_mode = #tpu.pipeline_mode<synchronous>, transform_indices = @transform_8, window_bounds = array<i64: 1, 128>}, {pipeline_mode = #tpu.pipeline_mode<synchronous>, transform_indices = @transform_9, window_bounds = array<i64: 1, 128>}, {pipeline_mode = #tpu.pipeline_mode<synchronous>, transform_indices = @transform_10, window_bounds = array<i64: 128, 128>}, {pipeline_mode = #tpu.pipeline_mode<synchronous>, transform_indices = @transform_11, window_bounds = array<i64: 1, 128>}, {transform_indices = @transform_12, window_bounds = array<i64: 1, 16, 128>}]} {
    %c0 = arith.constant 0 : index
    %c0_0 = arith.constant 0 : index
    %c0_1 = arith.constant 0 : index
    %0 = vector.load %arg2[%c0, %c0_0, %c0_1] : memref<1x16x64xbf16, #tpu.memory_space<vmem>>, vector<1x16x64xbf16>
    %1 = vector.shape_cast %0 : vector<1x16x64xbf16> to vector<16x64xbf16>
    %c0_2 = arith.constant 0 : index
    %c0_3 = arith.constant 0 : index
    %c0_4 = arith.constant 0 : index
    %2 = vector.load %arg3[%c0_2, %c0_3, %c0_4] : memref<1x64x512xbf16, #tpu.memory_space<vmem>>, vector<1x64x512xbf16>
    %3 = vector.shape_cast %2 : vector<1x64x512xbf16> to vector<64x512xbf16>
    %cst = arith.constant dense<0.000000e+00> : vector<16x512xf32>
    %4 = tpu.matmul %1, %3, %cst {dimension_numbers = #tpu.dot_dimension_numbers<[1], [0], [0], [1], [0, 0, 1, 1], [], []>} : vector<16x64xbf16>, vector<64x512xbf16>, vector<16x512xf32> -> vector<16x512xf32>
    %c0_5 = arith.constant 0 : index
    %c0_6 = arith.constant 0 : index
    %5 = vector.load %arg4[%c0_5, %c0_6] : memref<1x512xf32, #tpu.memory_space<vmem>>, vector<1x512xf32>
    %6 = vector.broadcast %5 : vector<1x512xf32> to vector<16x512xf32>
    %7 = arith.mulf %4, %6 : vector<16x512xf32>
    %c0_7 = arith.constant 0 : index
    %c0_8 = arith.constant 0 : index
    %c0_9 = arith.constant 0 : index
    %8 = vector.load %arg5[%c0_7, %c0_8, %c0_9] : memref<1x1x512xf32, #tpu.memory_space<vmem>>, vector<1x1x512xf32>
    %9 = vector.shape_cast %8 : vector<1x1x512xf32> to vector<1x512xf32>
    %10 = vector.broadcast %9 : vector<1x512xf32> to vector<16x512xf32>
    %11 = arith.addf %7, %10 : vector<16x512xf32>
    %cst_10 = arith.constant 0.000000e+00 : f32
    %12 = vector.broadcast %cst_10 : f32 to vector<16x512xf32>
    %13 = arith.maximumf %11, %12 : vector<16x512xf32>
    %14 = arith.truncf %13 : vector<16x512xf32> to vector<16x512xbf16>
    %c0_11 = arith.constant 0 : index
    %c0_12 = arith.constant 0 : index
    %15 = vector.load %arg6[%c0_11, %c0_12] : memref<512x256xbf16, #tpu.memory_space<vmem>>, vector<512x256xbf16>
    %cst_13 = arith.constant dense<0.000000e+00> : vector<16x256xf32>
    %16 = tpu.matmul %14, %15, %cst_13 {dimension_numbers = #tpu.dot_dimension_numbers<[1], [0], [0], [1], [0, 0, 1, 1], [], []>} : vector<16x512xbf16>, vector<512x256xbf16>, vector<16x256xf32> -> vector<16x256xf32>
    %c0_14 = arith.constant 0 : index
    %c0_15 = arith.constant 0 : index
    %17 = vector.load %arg7[%c0_14, %c0_15] : memref<1x256xf32, #tpu.memory_space<vmem>>, vector<1x256xf32>
    %18 = vector.broadcast %17 : vector<1x256xf32> to vector<16x256xf32>
    %19 = arith.mulf %16, %18 : vector<16x256xf32>
    %c0_16 = arith.constant 0 : index
    %c0_17 = arith.constant 0 : index
    %20 = vector.load %arg8[%c0_16, %c0_17] : memref<1x256xf32, #tpu.memory_space<vmem>>, vector<1x256xf32>
    %21 = vector.broadcast %20 : vector<1x256xf32> to vector<16x256xf32>
    %22 = arith.addf %19, %21 : vector<16x256xf32>
    %cst_18 = arith.constant 0.000000e+00 : f32
    %23 = vector.broadcast %cst_18 : f32 to vector<16x256xf32>
    %24 = arith.maximumf %22, %23 : vector<16x256xf32>
    %25 = arith.truncf %24 : vector<16x256xf32> to vector<16x256xbf16>
    %c0_19 = arith.constant 0 : index
    %c0_20 = arith.constant 0 : index
    %26 = vector.load %arg9[%c0_19, %c0_20] : memref<256x128xbf16, #tpu.memory_space<vmem>>, vector<256x128xbf16>
    %cst_21 = arith.constant dense<0.000000e+00> : vector<16x128xf32>
    %27 = tpu.matmul %25, %26, %cst_21 {dimension_numbers = #tpu.dot_dimension_numbers<[1], [0], [0], [1], [0, 0, 1, 1], [], []>} : vector<16x256xbf16>, vector<256x128xbf16>, vector<16x128xf32> -> vector<16x128xf32>
    %c0_22 = arith.constant 0 : index
    %c0_23 = arith.constant 0 : index
    %28 = vector.load %arg10[%c0_22, %c0_23] : memref<1x128xf32, #tpu.memory_space<vmem>>, vector<1x128xf32>
    %29 = vector.broadcast %28 : vector<1x128xf32> to vector<16x128xf32>
    %30 = arith.mulf %27, %29 : vector<16x128xf32>
    %c0_24 = arith.constant 0 : index
    %c0_25 = arith.constant 0 : index
    %31 = vector.load %arg11[%c0_24, %c0_25] : memref<1x128xf32, #tpu.memory_space<vmem>>, vector<1x128xf32>
    %32 = vector.broadcast %31 : vector<1x128xf32> to vector<16x128xf32>
    %33 = arith.addf %30, %32 : vector<16x128xf32>
    %cst_26 = arith.constant 0.000000e+00 : f32
    %34 = vector.broadcast %cst_26 : f32 to vector<16x128xf32>
    %35 = arith.maximumf %33, %34 : vector<16x128xf32>
    %36 = arith.truncf %35 : vector<16x128xf32> to vector<16x128xbf16>
    %c0_27 = arith.constant 0 : index
    %c0_28 = arith.constant 0 : index
    %37 = vector.load %arg12[%c0_27, %c0_28] : memref<128x128xbf16, #tpu.memory_space<vmem>>, vector<128x128xbf16>
    %cst_29 = arith.constant dense<0.000000e+00> : vector<16x128xf32>
    %38 = tpu.matmul %36, %37, %cst_29 {dimension_numbers = #tpu.dot_dimension_numbers<[1], [0], [0], [1], [0, 0, 1, 1], [], []>} : vector<16x128xbf16>, vector<128x128xbf16>, vector<16x128xf32> -> vector<16x128xf32>
    %c0_30 = arith.constant 0 : index
    %c0_31 = arith.constant 0 : index
    %39 = vector.load %arg13[%c0_30, %c0_31] : memref<1x128xf32, #tpu.memory_space<vmem>>, vector<1x128xf32>
    %40 = vector.broadcast %39 : vector<1x128xf32> to vector<16x128xf32>
    %41 = arith.addf %38, %40 : vector<16x128xf32>
    %cst_32 = arith.constant dense<0xFF800000> : vector<16xf32>
    %42 = vector.multi_reduction <maximumf>, %41, %cst_32 [1] : vector<16x128xf32> to vector<16xf32>
    %43 = vector.shape_cast %42 : vector<16xf32> to vector<16x1xf32>
    %44 = vector.broadcast %43 : vector<16x1xf32> to vector<16x128xf32>
    %45 = arith.subf %41, %44 : vector<16x128xf32>
    %46 = math.exp %45 : vector<16x128xf32>
    %cst_33 = arith.constant dense<0.000000e+00> : vector<16xf32>
    %47 = vector.multi_reduction <add>, %46, %cst_33 [1] : vector<16x128xf32> to vector<16xf32>
    %48 = vector.shape_cast %47 : vector<16xf32> to vector<16x1xf32>
    %49 = math.log %48 : vector<16x1xf32>
    %50 = vector.broadcast %49 : vector<16x1xf32> to vector<16x128xf32>
    %51 = arith.subf %45, %50 : vector<16x128xf32>
    %c0_34 = arith.constant 0 : index
    %c0_35 = arith.constant 0 : index
    %c0_36 = arith.constant 0 : index
    %52 = vector.load %arg14[%c0_34, %c0_35, %c0_36] : memref<1x16x128xf32, #tpu.memory_space<vmem>>, vector<1x16x128xf32>
    %53 = vector.shape_cast %52 : vector<1x16x128xf32> to vector<16x128xf32>
    %54 = vector.shape_cast %51 : vector<16x128xf32> to vector<1x16x128xf32>
    tpu.vector_store %arg14[%c0_34, %c0_35, %c0_36], %54 {strides = array<i32>} : memref<1x16x128xf32, #tpu.memory_space<vmem>>, vector<1x16x128xf32>,
    return
  }
  func.func @transform_0(%arg0: i32, %arg1: i32) -> (i32, i32, i32) {
    %c0_i32 = arith.constant 0 : i32
    %c0_i32_0 = arith.constant 0 : i32
    return %arg0, %arg1, %c0_i32 : i32, i32, i32
  }
  func.func @transform_1(%arg0: i32, %arg1: i32) -> (i32, i32, i32) {
    %c0_i32 = arith.constant 0 : i32
    %c0_i32_0 = arith.constant 0 : i32
    %c0_i32_1 = arith.constant 0 : i32
    return %arg0, %c0_i32, %c0_i32_0 : i32, i32, i32
  }
  func.func @transform_2(%arg0: i32, %arg1: i32) -> (i32, i32) {
    %c0_i32 = arith.constant 0 : i32
    %c0_i32_0 = arith.constant 0 : i32
    %c0_i32_1 = arith.constant 0 : i32
    return %c0_i32, %c0_i32_0 : i32, i32
  }
  func.func @transform_3(%arg0: i32, %arg1: i32) -> (i32, i32, i32) {
    %c0_i32 = arith.constant 0 : i32
    %c0_i32_0 = arith.constant 0 : i32
    %c0_i32_1 = arith.constant 0 : i32
    return %arg0, %c0_i32, %c0_i32_0 : i32, i32, i32
  }
  func.func @transform_4(%arg0: i32, %arg1: i32) -> (i32, i32) {
    %c0_i32 = arith.constant 0 : i32
    %c0_i32_0 = arith.constant 0 : i32
    %c0_i32_1 = arith.constant 0 : i32
    return %c0_i32, %c0_i32_0 : i32, i32
  }
  func.func @transform_5(%arg0: i32, %arg1: i32) -> (i32, i32) {
    %c0_i32 = arith.constant 0 : i32
    %c0_i32_0 = arith.constant 0 : i32
    %c0_i32_1 = arith.constant 0 : i32
    return %c0_i32, %c0_i32_0 : i32, i32
  }
  func.func @transform_6(%arg0: i32, %arg1: i32) -> (i32, i32) {
    %c0_i32 = arith.constant 0 : i32
    %c0_i32_0 = arith.constant 0 : i32
    %c0_i32_1 = arith.constant 0 : i32
    return %c0_i32, %c0_i32_0 : i32, i32
  }
  func.func @transform_7(%arg0: i32, %arg1: i32) -> (i32, i32) {
    %c0_i32 = arith.constant 0 : i32
    %c0_i32_0 = arith.constant 0 : i32
    %c0_i32_1 = arith.constant 0 : i32
    return %c0_i32, %c0_i32_0 : i32, i32
  }
  func.func @transform_8(%arg0: i32, %arg1: i32) -> (i32, i32) {
    %c0_i32 = arith.constant 0 : i32
    %c0_i32_0 = arith.constant 0 : i32
    %c0_i32_1 = arith.constant 0 : i32
    return %c0_i32, %c0_i32_0 : i32, i32
  }
  func.func @transform_9(%arg0: i32, %arg1: i32) -> (i32, i32) {
    %c0_i32 = arith.constant 0 : i32
    %c0_i32_0 = arith.constant 0 : i32
    %c0_i32_1 = arith.constant 0 : i32
    return %c0_i32, %c0_i32_0 : i32, i32
  }
  func.func @transform_10(%arg0: i32, %arg1: i32) -> (i32, i32) {
    %c0_i32 = arith.constant 0 : i32
    %c0_i32_0 = arith.constant 0 : i32
    %c0_i32_1 = arith.constant 0 : i32
    return %c0_i32, %c0_i32_0 : i32, i32
  }
  func.func @transform_11(%arg0: i32, %arg1: i32) -> (i32, i32) {
    %c0_i32 = arith.constant 0 : i32
    %c0_i32_0 = arith.constant 0 : i32
    %c0_i32_1 = arith.constant 0 : i32
    return %c0_i32, %c0_i32_0 : i32, i32
  }
  func.func @transform_12(%arg0: i32, %arg1: i32) -> (i32, i32, i32) {
    %c0_i32 = arith.constant 0 : i32
    %c0_i32_0 = arith.constant 0 : i32
    return %arg0, %arg1, %c0_i32 : i32, i32, i32
  }
}

</mosaic_0001>

<bundles_post_ra>
// kernel: pointnet_semseg_forward.4
= control target key start
LH: loop header
LB: loop body
LE: loop exit
PB: predicated region body
PF: predicated region fallthrough
CT: control target
= control target key end

     0   :  { %15 = vsyncpa [#allocation3], 0  ;;  %s2229_s0 = inlined_call_operand.vmem [shape: f32[2,16,9], index: 0, kind: input, shape index: {}]   ;;  %s2230_s1 = inlined_call_operand.vmem [shape: bf16[9,64], index: 1, kind: input, shape index: {}]   ;;  %s2231_s2 = inlined_call_operand.hbm [shape: f32[1,64], index: 2, kind: input, shape index: {}]   ;;  %s2232_s3 = inlined_call_operand.vmem [shape: f32[1,64], index: 3, kind: input, shape index: {}]   ;;  %s2233_s4 = inlined_call_operand.vmem [shape: bf16[64,128], index: 4, kind: input, shape index: {}]   ;;  %s2234_s5 = inlined_call_operand.hbm [shape: f32[1,128], index: 5, kind: input, shape index: {}]   ;;  %s2235_s6 = inlined_call_operand.vmem [shape: f32[1,128], index: 6, kind: input, shape index: {}]   ;;  %s2236_s7 = inlined_call_operand.vmem [shape: bf16[128,1024], index: 7, kind: input, shape index: {}]   ;;  %s2237_s8 = inlined_call_operand.hbm [shape: f32[1,1024], index: 8, kind: input, shape index: {}]   ;;  %s2238_s9 = inlined_call_operand.vmem [shape: f32[1,1024], index: 9, kind: input, shape index: {}]   ;;  %s2239_s10 = inlined_call_operand.vmem [shape: f32[2,1,1024], index: 10, kind: output, shape index: {}]  }
   0x1   :  { %16 = vsyncpa [#allocation5], 0  ;;  %s1896_s13 = smov 0   ;;  %s1898_s14 = smov 0  }
   0x2   :  { %s1900_s15 = smov 0  }
   0x3 LB: > { %s1833_s16 = smov [#allocation4]   ;;  %s1540_s18 = sadd.s32 4294967295, %s1831_s15   ;;  %s1831_s15 = sphi %s1900_s15, %s22_s15   ;;  %s1827_s14 = sphi %s1898_s14, %s2245_s14   ;;  %s1823_s13 = sphi %s1896_s13, %s2244_s13  }
   0x4   : > { %s326_s17 = sshll.u32 %s1833_s16, 4  ;;  %p1542_p0 = scmp.ge.s32.totalorder %s1831_s15, 1  ;;  %s327_s17 = int_to_ptr.vmem [resolvable:$true] %s326_s17 }
   0x5   : > { %p293_p1 = scmp.lt.s32.totalorder %s1831_s15, 3  ;;  %p1914_p2 = scmp.eq.s32.totalorder %s1540_s18, 0 }
   0x6   : > { %s41_s21 = sadd.s32 1, %s1827_s14  ;;  %s1834_s24 = smov [#allocation2]  }
   0x7   : > { %p1918_p3 = pnand %p1542_p0, %p293_p1  ;;  %p1931_p6 = scmp.ge.s32.totalorder %s41_s21, 2 }
   0x8   : > { %s309_s25 = sshll.u32 %s1834_s24, 4  ;;  %s1734_s26 = scalar_lea.vmem %s327_s17, 16  ;;  %s310_s25 = int_to_ptr.vmem [resolvable:$true] %s309_s25 }
   0x9   : > { %p1669_p4 = pneg %p1918_p3  ;;  %p1735_p8 = scmp.ne.s32.totalorder %s327_s17, %s1734_s26 }
   0xa   : > { %s1741_s27 = scalar_lea.vmem %s327_s17, 32  ;;  %p1742_p11 = scmp.lt.s32.totalorder %s327_s17, %s327_s17 }
   0xb   : > { %p1927_p5 = pnand %p1914_p2, %p1669_p4  ;;  %p1743_p12 = scmp.lt.s32.totalorder %s1741_s27, %s1734_s26 }
   0xd   : > { %p1725_p7 = pneg %p1927_p5  ;;  %p1744_p13 = por %p1743_p12, %p1742_p11 }
   0xf   : > { %p1737_p9 = pnand %p1735_p8, %p1725_p7 }
  0x11   : > { %p1738_p10 = pneg %p1737_p9 }
  0x13   : > { %p1745_p0 = pnand %p1744_p13, %p1738_p10 }
  0x15   : > { %1748 = shalt.err (!%p1745_p0)
}
  0x16   : > { %1675 = dma.hbm_to_vmem [thread:$0]  (!%p1927_p5), %s2234_s5, 16, %s327_s17, [#allocation5]  }
  0x17   : > { %s2247_s21 = smov (%p1931_p6, %s41_s21), 0  ;;  %s1760_s30 = scalar_lea.vmem %s310_s25, 16 }
  0x18   : > { %p1761_p1 = scmp.ne.s32.totalorder %s310_s25, %s1760_s30  ;;  %s1767_s11 = scalar_lea.vmem %s310_s25, 32 }
  0x19   : > { %p1768_p9 = scmp.lt.s32.totalorder %s310_s25, %s310_s25  ;;  %p1769_p10 = scmp.lt.s32.totalorder %s1767_s11, %s1760_s30 }
  0x1a   : > { %p1763_p4 = pnand %p1761_p1, %p1725_p7 }
  0x1b   : > { %p1770_p11 = por %p1769_p10, %p1768_p9 }
  0x1c   : > { %p1764_p8 = pneg %p1763_p4 }
  0x1e   : > { %p1771_p12 = pnand %p1770_p11, %p1764_p8 }
  0x20   : > { %1774 = shalt.err (!%p1771_p12)
}
  0x21   : > { %1672 = dma.hbm_to_vmem [thread:$0]  (!%p1927_p5), %s2231_s2, 16, %s310_s25, [#allocation3]  }
  0x22   : > { %s1835_s17 = smov [#allocation6]  }
  0x23   : > { %s343_s18 = sshll.u32 %s1835_s17, 4  ;;  %s344_s18 = int_to_ptr.vmem [resolvable:$true] %s343_s18 }
  0x24   : > { %s1786_s23 = scalar_lea.vmem %s344_s18, 128  ;;  %p1794_p1 = scmp.lt.s32.totalorder %s344_s18, %s344_s18 }
  0x25   : > { %p1787_p6 = scmp.ne.s32.totalorder %s344_s18, %s1786_s23  ;;  %p1795_p4 = scmp.lt.s32.totalorder %s1786_s23, %s1786_s23 }
  0x27   : > { %p1789_p13 = pnand %p1787_p6, %p1725_p7  ;;  %p1796_p8 = por %p1795_p4, %p1794_p1 }
  0x29   : > { %p1790_p0 = pneg %p1789_p13 }
  0x2b   : > { %p1797_p9 = pnand %p1796_p8, %p1790_p0 }
  0x2d   : > { %1800 = shalt.err (!%p1797_p9)
}
  0x2e   : > { %1678 = dma.hbm_to_vmem [thread:$0]  (!%p1927_p5), %s2237_s8, 128, %s344_s18, [#allocation5]  }
  0x2f   : > { %374 = sbr.rel (%p1918_p3) target bundleno = 736 (0x2e0), region = 60 }
  0x34   : > { %1814 = dma.done.wait (%p1914_p2), [#allocation3], 16  }
  0x35   : > { %1816 = vsyncadd (%p1914_p2), [#allocation3], 4294967280 }
  0x36   : > { %1818 = dma.done.wait (%p1914_p2), [#allocation5], 144  }
  0x37   : > { %1820 = vsyncadd (%p1914_p2), [#allocation5], 4294967152  ;;  %vm458_vm0 = vcmask 1043456   ;;  %v1836_v0 = vmov 0.0   ;;  %p427_p5 = scmp.lt.s32.totalorder %s1823_s13, 1  ;;  %vm1837_vm1 = vmmov 0  }
  0x38   : > { %1639 = vmatprep.subr.bf16.mxu0 %v1836_v0  ;;  %1645 = vmatprep.subr.bf16.mxu1 %v1836_v0  ;;  %vm459_vm2 = vcmask 1044480   ;;  %v1838_v1 = vmov 65535   ;;  %v1718_v4 = vld [vmem:[%s2230_s1] sm:$0x1f]   ;;  %v1719_v8 = vld [vmem:[%s2233_s4 + $0x18] sm:$0xff]   ;;  %vm454_vm3 = vcmask 72704  }
  0x39   : > { %1641 = vmatprep.mubr.msk.bf16.mxu0 %vm1837_vm1, %v1836_v0  ;;  %1653 = vmatprep.mubr.msk.bf16.mxu1 %vm1837_vm1, %v1836_v0  ;;  %v460_v2 = vsel %vm458_vm0, 4294967295, %v1838_v1  ;;  %s2249_s13 = smov (!%p427_p5, %s1823_s13), 1  ;;  %v1720_v10 = vld [vmem:[%s2233_s4 + $0x10] sm:$0xff]   ;;  %v1721_v11 = vld [vmem:[%s2233_s4 + $0x8] sm:$0xff]   ;;  %v1722_v12 = vld [vmem:[%s2233_s4] sm:$0xff]   ;;  %vm559_vm4 = vcmask 523264  }
  0x3a   : > { %s1631_s20 = sshll.u32 %s2249_s13, 4  ;;  %v461_v3 = vsel %vm459_vm2, %v460_v2, 0  ;;  %1646 = vmatpush3.bf16.msra.mxu1 %v1719_v8  ;;  %v681_v13 = vld [vmem:[%s2236_s7 + $0x1c0] sm:$0xff]  ;;  %v682_v15 = vld [vmem:[%s2236_s7 + $0x1c8] sm:$0xff]  ;;  %s1553_s27 = sshll.u32 %s2249_s13, 3 }
  0x3b   : > { %s434_s25 = scalar_lea.vmem %s2229_s0, %s1631_s20  ;;  %v463_v7 = vand.u32 %v1718_v4, %v461_v3  ;;  %1647 = vmatprep.subr.bf16.mxu1 %v1836_v0  ;;  %v685_v14 = vld [vmem:[%s2236_s7 + $0x1e0] sm:$0xff]  ;;  %v686_v18 = vld [vmem:[%s2236_s7 + $0x1e8] sm:$0xff]  ;;  %s441_s30 = scalar_lea.vmem %s2239_s10, %s1553_s27 }
  0x3c   : > { %v444_v5 = vld [vmem:[%s434_s25] sm:$0xff]  ;;  %v445_v6 = vld [vmem:[%s434_s25 + $0x8] sm:$0xff]  ;;  %v1621_v16 = vcombine.low %v681_v13, %v685_v14  ;;  %v1622_v17 = vcombine.high %v681_v13, %v685_v14  ;;  %v1623_v21 = vcombine.low %v682_v15, %v686_v18  ;;  %v1624_v22 = vcombine.high %v682_v15, %v686_v18 }
  0x3d   : > { %v446_v9 = vpack.c.bf16 %v445_v6, %v444_v5  ;;  %1640 = vmatpush3.bf16.msra.mxu0 %v463_v7  ;;  %v673_v19 = vld [vmem:[%s2236_s7 + $0x180] sm:$0xff]  ;;  %v674_v47 = vld [vmem:[%s2236_s7 + $0x188] sm:$0xff] }
  0x3e   : > { %1648 = vmatpush3.bf16.msra.mxu1 %v1720_v10  ;;  %v677_v20 = vld [vmem:[%s2236_s7 + $0x1a0] sm:$0xff]  ;;  %1009 = vmatprep.subr.bf16.mxu0 %v1622_v17  ;;  %v678_v48 = vld [vmem:[%s2236_s7 + $0x1a8] sm:$0xff] }
  0x3f   : > { %1649 = vmatprep.subr.bf16.mxu1 %v1836_v0  ;;  %v1614_v23 = vcombine.high %v673_v19, %v677_v20  ;;  %v1613_v24 = vcombine.low %v673_v19, %v677_v20  ;;  %v665_v25 = vld [vmem:[%s2236_s7 + $0x140] sm:$0xff]  ;;  %v1616_v52 = vcombine.high %v674_v47, %v678_v48  ;;  %v666_v53 = vld [vmem:[%s2236_s7 + $0x148] sm:$0xff]  ;;  %v1615_v55 = vcombine.low %v674_v47, %v678_v48  ;;  %v676_v47 = vld [vmem:[%s2236_s7 + $0x198] sm:$0xff] }
  0x40   : > { %1642 = vmatmul.mubr.msk.bf16.vlgmr.msra.gmra.mxu0 %vm454_vm3, %v446_v9  ;;  %v669_v26 = vld [vmem:[%s2236_s7 + $0x160] sm:$0xff]  ;;  %v670_v54 = vld [vmem:[%s2236_s7 + $0x168] sm:$0xff]  ;;  %v680_v48 = vld [vmem:[%s2236_s7 + $0x1b8] sm:$0xff] }
  0x41   : > { %1010 = vmatpush1.bf16.msra.mxu0 %v1621_v16  ;;  %v1606_v27 = vcombine.high %v665_v25, %v669_v26  ;;  %v1605_v28 = vcombine.low %v665_v25, %v669_v26  ;;  %v657_v29 = vld [vmem:[%s2236_s7 + $0x100] sm:$0xff]  ;;  %v1608_v56 = vcombine.high %v666_v53, %v670_v54  ;;  %v658_v57 = vld [vmem:[%s2236_s7 + $0x108] sm:$0xff]  ;;  %v1607_v59 = vcombine.low %v666_v53, %v670_v54  ;;  %v683_v26 = vld [vmem:[%s2236_s7 + $0x1d0] sm:$0xff] }
  0x42   : > { %1650 = vmatpush3.bf16.msra.mxu1 %v1721_v11  ;;  %1011 = vmatprep.subr.bf16.mxu0 %v1614_v23  ;;  %v661_v30 = vld [vmem:[%s2236_s7 + $0x120] sm:$0xff]  ;;  %v662_v58 = vld [vmem:[%s2236_s7 + $0x128] sm:$0xff]  ;;  %v1620_v53 = vcombine.high %v676_v47, %v680_v48  ;;  %v667_v54 = vld [vmem:[%s2236_s7 + $0x150] sm:$0xff] }
  0x43   : > { %1651 = vmatprep.subr.bf16.mxu1 %v1836_v0  ;;  %v1598_v31 = vcombine.high %v657_v29, %v661_v30  ;;  %v1597_v32 = vcombine.low %v657_v29, %v661_v30  ;;  %v649_v33 = vld [vmem:[%s2236_s7 + $0xc0] sm:$0xff]  ;;  %v1600_v60 = vcombine.high %v658_v57, %v662_v58  ;;  %v650_v61 = vld [vmem:[%s2236_s7 + $0xc8] sm:$0xff]  ;;  %v1599_v63 = vcombine.low %v658_v57, %v662_v58  ;;  %v688_v30 = vld [vmem:[%s2236_s7 + $0x1f8] sm:$0xff] }
  0x44   : > { %v653_v34 = vld [vmem:[%s2236_s7 + $0xe0] sm:$0xff]  ;;  %v654_v62 = vld [vmem:[%s2236_s7 + $0xe8] sm:$0xff]  ;;  %v672_v57 = vld [vmem:[%s2236_s7 + $0x178] sm:$0xff] }
  0x45   : > { %1012 = vmatpush1.bf16.msra.mxu0 %v1613_v24  ;;  %v1590_v35 = vcombine.high %v649_v33, %v653_v34  ;;  %v1589_v36 = vcombine.low %v649_v33, %v653_v34  ;;  %v1556_v37 = vld [vmem:[#allocation2] ss:$0 sm:$0xff]  ;;  %v1592_v0 = vcombine.high %v650_v61, %v654_v62  ;;  %v1591_v1 = vcombine.low %v650_v61, %v654_v62  ;;  %v642_v4 = vld [vmem:[%s2236_s7 + $0x88] sm:$0xff]  ;;  %v659_v62 = vld [vmem:[%s2236_s7 + $0x110] sm:$0xff] }
  0x46   : > { %1652 = vmatpush3.bf16.msra.mxu1 %v1722_v12  ;;  %1013 = vmatprep.subr.bf16.mxu0 %v1606_v27  ;;  %v1557_v40 = vld [vmem:[%s2232_s3] ss:$0 sm:$0xff]  ;;  %v646_v6 = vld [vmem:[%s2236_s7 + $0xa8] sm:$0xff]  ;;  %v687_v27 = vld [vmem:[%s2236_s7 + $0x1f0] sm:$0xff]  ;;  %v1839_v34 = vmov 0  }
  0x47   : > { %1052 = vmatprep.subr.bf16.mxu1 %v1624_v22  ;;  %v641_v2 = vld [vmem:[%s2236_s7 + $0x80] sm:$0xff]  ;;  %v1583_v8 = vcombine.low %v642_v4, %v646_v6  ;;  %v1584_v9 = vcombine.high %v642_v4, %v646_v6  ;;  %v634_v13 = vld [vmem:[%s2236_s7 + $0x48] sm:$0xff]  ;;  %v1626_v29 = vcombine.high %v683_v26, %v687_v27  ;;  %1041 = vmatprep.mubr.bf16.mxu0 %v1839_v34  ;;  %v651_v6 = vld [vmem:[%s2236_s7 + $0xd0] sm:$0xff] }
  0x48   : > { %v645_v3 = vld [vmem:[%s2236_s7 + $0xa0] sm:$0xff]  ;;  %v638_v14 = vld [vmem:[%s2236_s7 + $0x68] sm:$0xff] }
  0x49   : > { %1014 = vmatpush1.bf16.msra.mxu0 %v1605_v28  ;;  %v1582_v5 = vcombine.high %v641_v2, %v645_v3  ;;  %v1581_v7 = vcombine.low %v641_v2, %v645_v3  ;;  %v633_v10 = vld [vmem:[%s2236_s7 + $0x40] sm:$0xff]  ;;  %v1575_v16 = vcombine.low %v634_v13, %v638_v14  ;;  %v1576_v17 = vcombine.high %v634_v13, %v638_v14  ;;  %v626_v20 = vld [vmem:[%s2236_s7 + $0x8] sm:$0xff]  ;;  %v684_v28 = vld [vmem:[%s2236_s7 + $0x1d8] sm:$0xff] }
  0x4a   : > { %1015 = vmatprep.subr.bf16.mxu0 %v1598_v31  ;;  %v637_v11 = vld [vmem:[%s2236_s7 + $0x60] sm:$0xff]  ;;  %v630_v22 = vld [vmem:[%s2236_s7 + $0x28] sm:$0xff]  ;;  %v1625_v31 = vcombine.low %v683_v26, %v687_v27  ;;  %v1628_v33 = vcombine.high %v684_v28, %v688_v30  ;;  %v643_v14 = vld [vmem:[%s2236_s7 + $0x90] sm:$0xff] }
  0x4b   : > { %v1574_v12 = vcombine.high %v633_v10, %v637_v11  ;;  %v1573_v15 = vcombine.low %v633_v10, %v637_v11  ;;  %v625_v18 = vld [vmem:[%s2236_s7] sm:$0xff]  ;;  %v1567_v24 = vcombine.low %v626_v20, %v630_v22  ;;  %v1568_v25 = vcombine.high %v626_v20, %v630_v22  ;;  %v635_v22 = vld [vmem:[%s2236_s7 + $0x50] sm:$0xff] }
  0x4c   : > { %v629_v19 = vld [vmem:[%s2236_s7 + $0x20] sm:$0xff] }
  0x4d   : > { %1016 = vmatpush1.bf16.msra.mxu0 %v1597_v32  ;;  %v1565_v23 = vcombine.low %v625_v18, %v629_v19  ;;  %v1627_v32 = vcombine.low %v684_v28, %v688_v30  ;;  %v627_v30 = vld [vmem:[%s2236_s7 + $0x10] sm:$0xff] }
  0x4e   : > { %1017 = vmatprep.subr.bf16.mxu0 %v1590_v35  ;;  %v1563_v35 = vld [vmem:[#allocation4] ss:$0 sm:$0xff] }
  0x51   : > { %1018 = vmatpush1.bf16.msra.mxu0 %v1589_v36 }
  0x52   : > { %1019 = vmatprep.subr.bf16.mxu0 %v1582_v5 }
  0x55   : > { %1020 = vmatpush1.bf16.msra.mxu0 %v1581_v7  ;;  %v655_v7 = vld [vmem:[%s2236_s7 + $0xf0] sm:$0xff] }
  0x56   : > { %1021 = vmatprep.subr.bf16.mxu0 %v1574_v12  ;;  %v1594_v12 = vcombine.high %v651_v6, %v655_v7 }
  0x59   : > { %1022 = vmatpush1.bf16.msra.mxu0 %v1573_v15  ;;  %v647_v15 = vld [vmem:[%s2236_s7 + $0xb0] sm:$0xff] }
  0x5a   : > { %v1586_v20 = vcombine.high %v643_v14, %v647_v15  ;;  %v1585_v26 = vcombine.low %v643_v14, %v647_v15 }
 0x100   : > { %v499_v38 = vpop.f32.mrf.mxu0 }
 0x101   : > { %v513_v39 = vmul.f32 %v1556_v37, %v499_v38  ;;  %v1564_v38 = vld [vmem:[%s2235_s6] ss:$0 sm:$0xff] }
 0x102   : > { %v1643_v41 = vpop.f32.mrf.mxu0 }
 0x103   : > { %v522_v43 = vadd.f32 %v1557_v40, %v513_v39 }
 0x104   : > { %v502_v42 = vpop.f32.mrf.mxu0 }
 0x105   : > { %v514_v44 = vmul.f32 %v1556_v37, %v502_v42  ;;  %v524_v49 = vmax.f32 %v522_v43, 0.0 }
 0x106   : > { %v1644_v45 = vpop.f32.mrf.mxu0 }
 0x107   : > { %v523_v46 = vadd.f32 %v1557_v40, %v514_v44  ;;  %v675_v45 = vld [vmem:[%s2236_s7 + $0x190] sm:$0xff] }
 0x109   : > { %v525_v50 = vmax.f32 %v523_v46, 0.0  ;;  %v679_v46 = vld [vmem:[%s2236_s7 + $0x1b0] sm:$0xff] }
 0x10a   : > { %v1617_v58 = vcombine.low %v675_v45, %v679_v46 }
 0x10b   : > { %v526_v51 = vpack.c.bf16 %v525_v50, %v524_v49 }
 0x10d   : > { %1654 = vmatmul.mubr.msk.bf16.vlgmr.msra.gmra.mxu1 %vm559_vm4, %v526_v51 }
 0x10e   : > { %1053 = vmatpush1.bf16.msra.mxu1 %v1623_v21  ;;  %v1566_v21 = vcombine.high %v625_v18, %v629_v19  ;;  %1084 = vmatprep.mubr.bf16.mxu1 %v1839_v34  ;;  %v1593_v18 = vcombine.low %v651_v6, %v655_v7 }
 0x10f   : > { %1054 = vmatprep.subr.bf16.mxu1 %v1616_v52  ;;  %v1618_v52 = vcombine.high %v675_v45, %v679_v46 }
 0x110   : > { %1023 = vmatprep.subr.bf16.mxu0 %v1566_v21 }
 0x111   : > { %1024 = vmatpush1.bf16.msra.mxu0 %v1565_v23  ;;  %v639_v23 = vld [vmem:[%s2236_s7 + $0x70] sm:$0xff] }
 0x112   : > { %1055 = vmatpush1.bf16.msra.mxu1 %v1615_v55  ;;  %1095 = vmatprep.subr.bf16.mxu0 %v1626_v29  ;;  %v671_v55 = vld [vmem:[%s2236_s7 + $0x170] sm:$0xff]  ;;  %v1578_v28 = vcombine.high %v635_v22, %v639_v23 }
 0x113   : > { %1056 = vmatprep.subr.bf16.mxu1 %v1608_v56  ;;  %v668_v56 = vld [vmem:[%s2236_s7 + $0x158] sm:$0xff]  ;;  %v1609_v2 = vcombine.low %v667_v54, %v671_v55 }
 0x114   : > { %v1612_v61 = vcombine.high %v668_v56, %v672_v57  ;;  %v1611_v3 = vcombine.low %v668_v56, %v672_v57 }
 0x116   : > { %1057 = vmatpush1.bf16.msra.mxu1 %v1607_v59  ;;  %v1619_v59 = vcombine.low %v676_v47, %v680_v48 }
 0x117   : > { %1058 = vmatprep.subr.bf16.mxu1 %v1600_v60  ;;  %v1610_v60 = vcombine.high %v667_v54, %v671_v55 }
 0x11a   : > { %1059 = vmatpush1.bf16.msra.mxu1 %v1599_v63  ;;  %v663_v63 = vld [vmem:[%s2236_s7 + $0x130] sm:$0xff] }
 0x11b   : > { %1060 = vmatprep.subr.bf16.mxu1 %v1592_v0  ;;  %v660_v0 = vld [vmem:[%s2236_s7 + $0x118] sm:$0xff]  ;;  %v1602_v4 = vcombine.high %v659_v62, %v663_v63  ;;  %v1601_v10 = vcombine.low %v659_v62, %v663_v63 }
 0x11e   : > { %1061 = vmatpush1.bf16.msra.mxu1 %v1591_v1  ;;  %v664_v1 = vld [vmem:[%s2236_s7 + $0x138] sm:$0xff] }
 0x11f   : > { %1062 = vmatprep.subr.bf16.mxu1 %v1584_v9  ;;  %v1604_v5 = vcombine.high %v660_v0, %v664_v1  ;;  %v656_v9 = vld [vmem:[%s2236_s7 + $0xf8] sm:$0xff]  ;;  %v1603_v11 = vcombine.low %v660_v0, %v664_v1 }
 0x122   : > { %1063 = vmatpush1.bf16.msra.mxu1 %v1583_v8  ;;  %v652_v8 = vld [vmem:[%s2236_s7 + $0xd8] sm:$0xff] }
 0x123   : > { %1064 = vmatprep.subr.bf16.mxu1 %v1576_v17  ;;  %v1596_v13 = vcombine.high %v652_v8, %v656_v9  ;;  %v648_v17 = vld [vmem:[%s2236_s7 + $0xb8] sm:$0xff]  ;;  %v1595_v19 = vcombine.low %v652_v8, %v656_v9 }
 0x126   : > { %1065 = vmatpush1.bf16.msra.mxu1 %v1575_v16  ;;  %v644_v16 = vld [vmem:[%s2236_s7 + $0x98] sm:$0xff] }
 0x127   : > { %1066 = vmatprep.subr.bf16.mxu1 %v1568_v25  ;;  %v1588_v21 = vcombine.high %v644_v16, %v648_v17  ;;  %v640_v25 = vld [vmem:[%s2236_s7 + $0x78] sm:$0xff]  ;;  %v1587_v27 = vcombine.low %v644_v16, %v648_v17 }
 0x12a   : > { %1067 = vmatpush1.bf16.msra.mxu1 %v1567_v24  ;;  %v636_v24 = vld [vmem:[%s2236_s7 + $0x58] sm:$0xff] }
 0x12b   : > { %1138 = vmatprep.subr.bf16.mxu1 %v1628_v33  ;;  %v1580_v29 = vcombine.high %v636_v24, %v640_v25  ;;  %v632_v33 = vld [vmem:[%s2236_s7 + $0x38] sm:$0xff] }
 0x1cd   : > { %v597_v36 = vpop.f32.mrf.mxu1 }
 0x1ce   : > { %v611_v37 = vmul.f32 %v1563_v35, %v597_v36 }
 0x1cf   : > { %v1655_v39 = vpop.f32.mrf.mxu1 }
 0x1d0   : > { %v620_v41 = vadd.f32 %v1564_v38, %v611_v37 }
 0x1d1   : > { %v600_v40 = vpop.f32.mrf.mxu1 }
 0x1d2   : > { %v612_v42 = vmul.f32 %v1563_v35, %v600_v40  ;;  %v622_v49 = vmax.f32 %v620_v41, 0.0  ;;  %v1579_v35 = vcombine.low %v636_v24, %v640_v25  ;;  %v1183_v40 = vlaneseq }
 0x1d3   : > { %v1656_v43 = vpop.f32.mrf.mxu1 }
 0x1d4   : > { %v621_v44 = vadd.f32 %v1564_v38, %v612_v42  ;;  %v2202_v45 = vshrl.u32 %v1183_v40, 7 }
 0x1d6   : > { %v623_v50 = vmax.f32 %v621_v44, 0.0  ;;  %v1189_v48 = vsub.s32 1, %v2202_v45 }
 0x1d8   : > { %v2124_v51 = vpack.c.bf16 %v623_v50, %v622_v49  ;;  %v1197_v49 = vsub.s32 3, %v2202_v45  ;;  %v1185_v50 = vsub.s32 0, %v2202_v45 }
 0x1da   : > { %1042 = vmatmul.mubr.bf16.vlgmr.msra.gmra.mxu0 %v2124_v51  ;;  %1085 = vmatmul.mubr.bf16.vlgmr.msra.gmra.mxu1 %v2124_v51 }
 0x1db   : > { %1096 = vmatpush1.bf16.msra.mxu0 %v1625_v31  ;;  %1139 = vmatpush1.bf16.msra.mxu1 %v1627_v32  ;;  %v631_v31 = vld [vmem:[%s2236_s7 + $0x30] sm:$0xff]  ;;  %v628_v32 = vld [vmem:[%s2236_s7 + $0x18] sm:$0xff] }
 0x1dc   : > { %1097 = vmatprep.subr.bf16.mxu0 %v1618_v52  ;;  %1140 = vmatprep.subr.bf16.mxu1 %v1620_v53  ;;  %v1570_v36 = vcombine.high %v627_v30, %v631_v31  ;;  %v1572_v37 = vcombine.high %v628_v32, %v632_v33  ;;  %v1569_v38 = vcombine.low %v627_v30, %v631_v31  ;;  %v1193_v52 = vsub.s32 2, %v2202_v45  ;;  %v1181_v53 = vld [vmem:[#allocation6] sm:$0xff] }
 0x1dd   : > { %1127 = vmatprep.mubr.bf16.mxu0 %v1839_v34  ;;  %1170 = vmatprep.mubr.bf16.mxu1 %v1839_v34  ;;  %v1577_v34 = vcombine.low %v635_v22, %v639_v23  ;;  %v1571_v39 = vcombine.low %v628_v32, %v632_v33  ;;  %v1190_v55 = vrot.slane %v1181_v53, %v1189_v48  ;;  %v1205_v30 = vsub.s32 5, %v2202_v45 }
 0x1de   : > { %v1198_v56 = vrot.slane %v1181_v53, %v1197_v49  ;;  %v1186_v57 = vrot.slane %v1181_v53, %v1185_v50  ;;  %v1213_v31 = vsub.s32 7, %v2202_v45 }
 0x1df   : > { %1098 = vmatpush1.bf16.msra.mxu0 %v1617_v58  ;;  %1141 = vmatpush1.bf16.msra.mxu1 %v1619_v59  ;;  %v1194_v58 = vrot.slane %v1181_v53, %v1193_v52  ;;  %v1239_v59 = vld [vmem:[%s2238_s9] sm:$0xff] }
 0x1e0   : > { %1099 = vmatprep.subr.bf16.mxu0 %v1610_v60  ;;  %1142 = vmatprep.subr.bf16.mxu1 %v1612_v61  ;;  %v1248_v1 = vrot.slane %v1239_v59, %v1189_v48  ;;  %v1252_v7 = vrot.slane %v1239_v59, %v1193_v52 }
 0x1e3   : > { %1100 = vmatpush1.bf16.msra.mxu0 %v1609_v2  ;;  %1143 = vmatpush1.bf16.msra.mxu1 %v1611_v3  ;;  %v1256_v3 = vrot.slane %v1239_v59, %v1197_v49 }
 0x1e4   : > { %1101 = vmatprep.subr.bf16.mxu0 %v1602_v4  ;;  %1144 = vmatprep.subr.bf16.mxu1 %v1604_v5  ;;  %v1244_v5 = vrot.slane %v1239_v59, %v1185_v50 }
 0x1e7   : > { %1102 = vmatpush1.bf16.msra.mxu0 %v1601_v10  ;;  %1145 = vmatpush1.bf16.msra.mxu1 %v1603_v11 }
 0x1e8   : > { %1103 = vmatprep.subr.bf16.mxu0 %v1594_v12  ;;  %1146 = vmatprep.subr.bf16.mxu1 %v1596_v13 }
 0x1eb   : > { %1104 = vmatpush1.bf16.msra.mxu0 %v1593_v18  ;;  %1147 = vmatpush1.bf16.msra.mxu1 %v1595_v19 }
 0x1ec   : > { %1105 = vmatprep.subr.bf16.mxu0 %v1586_v20  ;;  %1148 = vmatprep.subr.bf16.mxu1 %v1588_v21 }
 0x1ef   : > { %1106 = vmatpush1.bf16.msra.mxu0 %v1585_v26  ;;  %1149 = vmatpush1.bf16.msra.mxu1 %v1587_v27 }
 0x1f0   : > { %1107 = vmatprep.subr.bf16.mxu0 %v1578_v28  ;;  %1150 = vmatprep.subr.bf16.mxu1 %v1580_v29  ;;  %v1201_v28 = vsub.s32 4, %v2202_v45  ;;  %v1209_v29 = vsub.s32 6, %v2202_v45 }
 0x1f2   : > { %v1260_v48 = vrot.slane %v1239_v59, %v1201_v28  ;;  %v1268_v50 = vrot.slane %v1239_v59, %v1209_v29 }
 0x1f3   : > { %1108 = vmatpush1.bf16.msra.mxu0 %v1577_v34  ;;  %1151 = vmatpush1.bf16.msra.mxu1 %v1579_v35 }
 0x1f4   : > { %1109 = vmatprep.subr.bf16.mxu0 %v1570_v36  ;;  %1152 = vmatprep.subr.bf16.mxu1 %v1572_v37  ;;  %v1202_v36 = vrot.slane %v1181_v53, %v1201_v28  ;;  %v1210_v37 = vrot.slane %v1181_v53, %v1209_v29 }
 0x1f7   : > { %1110 = vmatpush1.bf16.msra.mxu0 %v1569_v38  ;;  %1153 = vmatpush1.bf16.msra.mxu1 %v1571_v39  ;;  %v1206_v38 = vrot.slane %v1181_v53, %v1205_v30  ;;  %v1214_v39 = vrot.slane %v1181_v53, %v1213_v31 }
 0x1fa   : > { %1128 = vmatmul.mubr.bf16.vlgmr.msra.gmra.mxu0 %v2124_v51  ;;  %1171 = vmatmul.mubr.bf16.vlgmr.msra.gmra.mxu1 %v2124_v51 }
 0x29a   : > { %v1043_v41 = vpop.f32.mrf.mxu0  ;;  %v1086_v42 = vpop.f32.mrf.mxu1 }
 0x29b   : > { %v1223_v4 = vmul.f32 %v1186_v57, %v1043_v41  ;;  %v1225_v6 = vmul.f32 %v1194_v58, %v1086_v42 }
 0x29c   : > { %v1045_v43 = vpop.f32.mrf.mxu0  ;;  %v1088_v44 = vpop.f32.mrf.mxu1 }
 0x29d   : > { %v1224_v0 = vmul.f32 %v1190_v55, %v1045_v43  ;;  %v1226_v2 = vmul.f32 %v1198_v56, %v1088_v44  ;;  %v1281_v14 = vadd.f32 %v1244_v5, %v1223_v4  ;;  %v1283_v15 = vadd.f32 %v1252_v7, %v1225_v6 }
 0x29e   : > { %v1047_v46 = vpop.f32.mrf.mxu0  ;;  %v1090_v47 = vpop.f32.mrf.mxu1 }
 0x29f   : > { %v1231_v62 = vmul.f32 %v1186_v57, %v1047_v46  ;;  %v1233_v63 = vmul.f32 %v1194_v58, %v1090_v47  ;;  %v1282_v12 = vadd.f32 %v1248_v1, %v1224_v0  ;;  %v1284_v13 = vadd.f32 %v1256_v3, %v1226_v2 }
 0x2a0   : > { %v1049_v54 = vpop.f32.mrf.mxu0  ;;  %v1092_v51 = vpop.f32.mrf.mxu1  ;;  %v1297_v22 = vmax.f32 %v1281_v14, 0.0  ;;  %v1299_v23 = vmax.f32 %v1283_v15, 0.0  ;;  %v1272_v57 = vrot.slane %v1239_v59, %v1213_v31  ;;  %v1840_v0 = vmov 1966171168  }
 0x2a1   : > { %v1232_v60 = vmul.f32 %v1190_v55, %v1049_v54  ;;  %v1234_v61 = vmul.f32 %v1198_v56, %v1092_v51  ;;  %v1289_v10 = vadd.f32 %v1244_v5, %v1231_v62  ;;  %v1291_v11 = vadd.f32 %v1252_v7, %v1233_v63 }
 0x2a2   : > { %v1298_v20 = vmax.f32 %v1282_v12, 0.0  ;;  %v1300_v21 = vmax.f32 %v1284_v13, 0.0  ;;  %v1264_v55 = vrot.slane %v1239_v59, %v1205_v30 }
 0x2a3   : > { %v1290_v8 = vadd.f32 %v1248_v1, %v1232_v60  ;;  %v1292_v9 = vadd.f32 %v1256_v3, %v1234_v61  ;;  %v1305_v18 = vmax.f32 %v1289_v10, 0.0  ;;  %v1307_v19 = vmax.f32 %v1291_v11, 0.0 }
 0x2a4   : > { %v1388_v1 = vunpack.c.l.s4 %v1840_v0 }
 0x2a5   : > { %v1306_v16 = vmax.f32 %v1290_v8, 0.0  ;;  %v1308_v17 = vmax.f32 %v1292_v9, 0.0  ;;  %v1313_v26 = vmax.f32 %v1297_v22, %v1305_v18  ;;  %v1327_v27 = vmax.f32 %v1299_v23, %v1307_v19 }
 0x2a7   : > { %v1320_v24 = vmax.f32 %v1298_v20, %v1306_v16  ;;  %v1334_v25 = vmax.f32 %v1300_v21, %v1308_v17  ;;  %v1314_v34 = vrot.slane %v1313_v26, 4  ;;  %v1328_v35 = vrot.slane %v1327_v27, 4 }
 0x2a9   : > { %v1321_v32 = vrot.slane %v1320_v24, 4  ;;  %v1335_v33 = vrot.slane %v1334_v25, 4  ;;  %v1315_v44 = vmax.f32 %v1313_v26, %v1314_v34  ;;  %v1329_v46 = vmax.f32 %v1327_v27, %v1328_v35 }
 0x2ab   : > { %v1322_v40 = vmax.f32 %v1320_v24, %v1321_v32  ;;  %v1336_v41 = vmax.f32 %v1334_v25, %v1335_v33  ;;  %v1316_v62 = vrot.slane %v1315_v44, 2  ;;  %v1330_v63 = vrot.slane %v1329_v46, 2 }
 0x2ad   : > { %v1323_v58 = vrot.slane %v1322_v40, 2  ;;  %v1337_v60 = vrot.slane %v1336_v41, 2  ;;  %v1317_v15 = vmax.f32 %v1315_v44, %v1316_v62  ;;  %v1331_v16 = vmax.f32 %v1329_v46, %v1330_v63 }
 0x2af   : > { %v1324_v12 = vmax.f32 %v1322_v40, %v1323_v58  ;;  %v1338_v59 = vmax.f32 %v1336_v41, %v1337_v60  ;;  %v1318_v33 = vrot.slane %v1317_v15, 1  ;;  %v1332_v34 = vrot.slane %v1331_v16, 1 }
 0x2b1   : > { %v1325_v27 = vrot.slane %v1324_v12, 1  ;;  %v1339_v28 = vrot.slane %v1338_v59, 1 }
 0x2b3   : > { %v1326_v40 = vmax.f32 %v1324_v12, %v1325_v27  ;;  %v1340_v41 = vmax.f32 %v1338_v59, %v1339_v28 }
 0x2ba   : > { %v1129_v42 = vpop.f32.mrf.mxu0  ;;  %v1172_v43 = vpop.f32.mrf.mxu1 }
 0x2bb   : > { %v1227_v47 = vmul.f32 %v1202_v36, %v1129_v42  ;;  %v1229_v49 = vmul.f32 %v1210_v37, %v1172_v43 }
 0x2bc   : > { %v1131_v52 = vpop.f32.mrf.mxu0  ;;  %v1174_v54 = vpop.f32.mrf.mxu1 }
 0x2bd   : > { %v1228_v51 = vmul.f32 %v1206_v38, %v1131_v52  ;;  %v1230_v56 = vmul.f32 %v1214_v39, %v1174_v54  ;;  %v1285_v2 = vadd.f32 %v1260_v48, %v1227_v47  ;;  %v1287_v3 = vadd.f32 %v1268_v50, %v1229_v49 }
 0x2be   : > { %v1133_v61 = vpop.f32.mrf.mxu0  ;;  %v1176_v53 = vpop.f32.mrf.mxu1  ;;  %v1319_v47 = vmax.f32 %v1317_v15, %v1318_v33 }
 0x2bf   : > { %v1235_v4 = vmul.f32 %v1202_v36, %v1133_v61  ;;  %v1237_v5 = vmul.f32 %v1210_v37, %v1176_v53  ;;  %v1286_v8 = vadd.f32 %v1264_v55, %v1228_v51  ;;  %v1288_v9 = vadd.f32 %v1272_v57, %v1230_v56 }
 0x2c0   : > { %v1135_v6 = vpop.f32.mrf.mxu0  ;;  %v1178_v7 = vpop.f32.mrf.mxu1  ;;  %v1301_v19 = vmax.f32 %v1285_v2, 0.0  ;;  %v1303_v20 = vmax.f32 %v1287_v3, 0.0  ;;  %v1389_v37 = vunpack.c.0.s8 %v1388_v1 }
 0x2c1   : > { %v1236_v10 = vmul.f32 %v1206_v38, %v1135_v6  ;;  %v1238_v11 = vmul.f32 %v1214_v39, %v1178_v7  ;;  %v1293_v13 = vadd.f32 %v1260_v48, %v1235_v4  ;;  %v1295_v14 = vadd.f32 %v1268_v50, %v1237_v5 }
 0x2c2   : > { %v1302_v23 = vmax.f32 %v1286_v8, 0.0  ;;  %v1304_v24 = vmax.f32 %v1288_v9, 0.0  ;;  %v1333_v48 = vmax.f32 %v1331_v16, %v1332_v34  ;;  %v1392_v52 = vsub.s32 %v1389_v37, %v2202_v45 }
 0x2c3   : > { %v1294_v17 = vadd.f32 %v1264_v55, %v1236_v10  ;;  %v1296_v18 = vadd.f32 %v1272_v57, %v1238_v11  ;;  %v1309_v21 = vmax.f32 %v1293_v13, 0.0  ;;  %v1311_v22 = vmax.f32 %v1295_v14, 0.0 }
 0x2c4   : > { %v1383_v55 = vcombine.low %v1319_v47, %v1326_v40  ;;  %v1384_v56 = vcombine.low %v1333_v48, %v1340_v41 }
 0x2c5   : > { %v1310_v25 = vmax.f32 %v1294_v17, 0.0  ;;  %v1312_v26 = vmax.f32 %v1296_v18, 0.0  ;;  %v1341_v29 = vmax.f32 %v1301_v19, %v1309_v21  ;;  %v1355_v30 = vmax.f32 %v1303_v20, %v1311_v22 }
 0x2c6   : > { %v1393_v1 = vrot.slane %v1383_v55, %v1392_v52  ;;  %v1400_v2 = vrot.slane %v1384_v56, %v1392_v52 }
 0x2c7   : > { %v1348_v31 = vmax.f32 %v1302_v23, %v1310_v25  ;;  %v1362_v32 = vmax.f32 %v1304_v24, %v1312_v26  ;;  %v1342_v35 = vrot.slane %v1341_v29, 4  ;;  %v1356_v36 = vrot.slane %v1355_v30, 4 }
 0x2c8   : > { %v1415_v8 = vcombine.low %v1393_v1, %v1400_v2 }
 0x2c9   : > { %v1349_v38 = vrot.slane %v1348_v31, 4  ;;  %v1363_v39 = vrot.slane %v1362_v32, 4  ;;  %v1343_v42 = vmax.f32 %v1341_v29, %v1342_v35  ;;  %v1357_v43 = vmax.f32 %v1355_v30, %v1356_v36 }
 0x2ca   : > { %v1423_v12 = vrot.slane %v1415_v8, %v1392_v52 }
 0x2cb   : > { %v1350_v44 = vmax.f32 %v1348_v31, %v1349_v38  ;;  %v1364_v46 = vmax.f32 %v1362_v32, %v1363_v39  ;;  %v1344_v49 = vrot.slane %v1343_v42, 2  ;;  %v1358_v50 = vrot.slane %v1357_v43, 2 }
 0x2cd   : > { %v1351_v54 = vrot.slane %v1350_v44, 2  ;;  %v1365_v51 = vrot.slane %v1364_v46, 2  ;;  %v1345_v57 = vmax.f32 %v1343_v42, %v1344_v49  ;;  %v1359_v58 = vmax.f32 %v1357_v43, %v1358_v50 }
 0x2cf   : > { %v1352_v60 = vmax.f32 %v1350_v44, %v1351_v54  ;;  %v1366_v61 = vmax.f32 %v1364_v46, %v1365_v51  ;;  %v1346_v53 = vrot.slane %v1345_v57, 1  ;;  %v1360_v62 = vrot.slane %v1359_v58, 1 }
 0x2d1   : > { %v1353_v63 = vrot.slane %v1352_v60, 1  ;;  %v1367_v0 = vrot.slane %v1366_v61, 1  ;;  %v1347_v3 = vmax.f32 %v1345_v57, %v1346_v53  ;;  %v1361_v4 = vmax.f32 %v1359_v58, %v1360_v62 }
 0x2d3   : > { %v1354_v5 = vmax.f32 %v1352_v60, %v1353_v63  ;;  %v1368_v6 = vmax.f32 %v1366_v61, %v1367_v0 }
 0x2d5   : > { %v1385_v45 = vcombine.low %v1347_v3, %v1354_v5  ;;  %v1386_v7 = vcombine.low %v1361_v4, %v1368_v6 }
 0x2d7   : > { %v1407_v9 = vrot.slane %v1385_v45, %v1392_v52  ;;  %v1414_v10 = vrot.slane %v1386_v7, %v1392_v52 }
 0x2d9   : > { %v1416_v11 = vcombine.low %v1407_v9, %v1414_v10 }
 0x2db   : > { %v1430_v59 = vrot.slane %v1416_v11, %v1392_v52 }
 0x2dd   : > { %v1431_v13 = vcombine.low %v1423_v12, %v1430_v59 }
 0x2df   : > { %1434 = vst [vmem:[%s441_s30] sm:$0xff] %v1431_v13 }
 0x2e0 PF: > { %s22_s15 = sadd.s32 1, %s1831_s15   ;;  %s2244_s13 = smov %s1827_s14 }
 0x2e1   : > { %p19_p2 = scmp.ge.s32.totalorder %s22_s15, 4   ;;  %s2245_s14 = smov %s2247_s21 }
 0x2e3   :  { %21 = sbr.rel (!%p19_p2) target bundleno = 3 (0x3), region = 107 }
 0x2e8   :  { %1457 = vsyncpa [#allocation3], 1 }
 0x2e9   :  { %1459 = vsyncpa [#allocation3 + $0x1], 1 }
 0x2ea   :  { %1460 = vsyncpa [#allocation5], 1 }

// kernel: pointnet_semseg_forward.5
= control target key start
LH: loop header
LB: loop body
LE: loop exit
PB: predicated region body
PF: predicated region fallthrough
CT: control target
= control target key end

     0   :  { %s2088_s29 = smov 0   ;;  %s2090_s30 = smov 0   ;;  %s2394_s0 = inlined_call_operand.vmem [shape: f32[2,16,9], index: 0, kind: input, shape index: {}]   ;;  %s2395_s1 = inlined_call_operand.vmem [shape: bf16[2,9,64], index: 1, kind: input, shape index: {}]   ;;  %s2396_s2 = inlined_call_operand.vmem [shape: f32[1,64], index: 2, kind: input, shape index: {}]   ;;  %s2397_s3 = inlined_call_operand.vmem [shape: f32[1,64], index: 3, kind: input, shape index: {}]   ;;  %s2398_s4 = inlined_call_operand.vmem [shape: bf16[64,64], index: 4, kind: input, shape index: {}]   ;;  %s2399_s5 = inlined_call_operand.vmem [shape: f32[1,64], index: 5, kind: input, shape index: {}]   ;;  %s2400_s6 = inlined_call_operand.vmem [shape: f32[1,64], index: 6, kind: input, shape index: {}]   ;;  %s2401_s7 = inlined_call_operand.vmem [shape: bf16[64,128], index: 7, kind: input, shape index: {}]   ;;  %s2402_s8 = inlined_call_operand.vmem [shape: f32[1,128], index: 8, kind: input, shape index: {}]   ;;  %s2403_s9 = inlined_call_operand.vmem [shape: f32[1,128], index: 9, kind: input, shape index: {}]   ;;  %s2404_s10 = inlined_call_operand.vmem [shape: bf16[128,1024], index: 10, kind: input, shape index: {}]   ;;  %s2405_s11 = inlined_call_operand.vmem [shape: f32[1,1024], index: 11, kind: input, shape index: {}]   ;;  %s2406_s12 = inlined_call_operand.vmem [shape: f32[1,1024], index: 12, kind: input, shape index: {}]   ;;  %s2407_s13 = inlined_call_operand.vmem [shape: bf16[2,16,64], index: 13, kind: output, shape index: {0}]   ;;  %s2408_s14 = inlined_call_operand.vmem [shape: f32[2,1,1024], index: 14, kind: output, shape index: {1}]  }
   0x1   :  { %s2092_s15 = smov 0  }
   0x2 LB: > { %s44_s16 = sadd.s32 1, %s2002_s30  ;;  %p1804_p0 = scmp.ge.s32.totalorder %s2006_s15, 1  ;;  %s2006_s15 = sphi %s2092_s15, %s25_s15   ;;  %s2002_s30 = sphi %s2090_s30, %s2410_s30   ;;  %s1998_s29 = sphi %s2088_s29, %s2409_s29  }
   0x3   : > { %p46_p1 = scmp.ge.s32.totalorder %s44_s16, 2  ;;  %p461_p2 = scmp.lt.s32.totalorder %s2006_s15, 3 }
   0x5   : > { %s2412_s16 = smov (%p46_p1, %s44_s16), 0  ;;  %p462_p3 = pnand %p1804_p0, %p461_p2 }
   0x6   : > { %p529_p4 = scmp.lt.s32.totalorder (!%p462_p3), %s1998_s29, 1 }
   0x7   : > { %465 = sbr.rel (%p462_p3) target bundleno = 898 (0x382), region = 72 }
   0xc   : > { %vm577_vm0 = vcmask 1043456   ;;  %vm578_vm1 = vcmask 1044480   ;;  %v1976_v0 = vld [vmem:[%s2398_s4 + $0x18] sm:$0xff]   ;;  %v2008_v1 = vmov 0.0   ;;  %v2009_v2 = vmov 65535   ;;  %s2414_s29 = smov (!%p529_p4, %s1998_s29), 1 }
   0xd   : > { %1915 = vmatprep.subr.bf16.mxu0 %v2008_v1  ;;  %v579_v3 = vsel %vm577_vm0, 4294967295, %v2009_v2  ;;  %1921 = vmatprep.subr.bf16.mxu1 %v2008_v1  ;;  %vm2010_vm2 = vmmov 0   ;;  %s2111_s19 = sshll.u32 %s2414_s29, 3  ;;  %s1898_s20 = sshll.u32 %s2414_s29, 4  ;;  %vm573_vm3 = vcmask 72704   ;;  %v1977_v10 = vld [vmem:[%s2398_s4 + $0x10] sm:$0xff]  }
   0xe   : > { %v580_v4 = vsel %vm578_vm1, %v579_v3, 0  ;;  %1917 = vmatprep.mubr.msk.bf16.mxu0 %vm2010_vm2, %v2008_v1  ;;  %1922 = vmatpush3.bf16.msra.mxu1 %v1976_v0  ;;  %s543_s23 = scalar_lea.vmem %s2395_s1, %s2111_s19  ;;  %s536_s26 = scalar_lea.vmem %s2394_s0, %s1898_s20  ;;  %v1978_v11 = vld [vmem:[%s2398_s4 + $0x8] sm:$0xff]   ;;  %v1979_v12 = vld [vmem:[%s2398_s4] sm:$0xff]   ;;  %v1980_v13 = vld [vmem:[%s2401_s7 + $0x18] sm:$0xff]   ;;  %vm653_vm4 = vcmask 519168   ;;  %vm688_vm5 = vcmask 523264  }
   0xf   : > { %1923 = vmatprep.subr.bf16.mxu1 %v2008_v1  ;;  %1929 = vmatprep.mubr.msk.bf16.mxu1 %vm2010_vm2, %v2008_v1  ;;  %v1975_v5 = vld [vmem:[%s543_s23] sm:$0x1f]   ;;  %v564_v7 = vld [vmem:[%s536_s26 + $0x8] sm:$0xff]  ;;  %s553_s29 = scalar_lea.vmem %s2407_s13, %s2111_s19  ;;  %v1981_v29 = vld [vmem:[%s2401_s7 + $0x10] sm:$0xff]   ;;  %s560_s22 = scalar_lea.vmem %s2408_s14, %s2111_s19 }
  0x10   : > { %v563_v6 = vld [vmem:[%s536_s26] sm:$0xff]  ;;  %v582_v8 = vand.u32 %v1975_v5, %v580_v4  ;;  %v1982_v30 = vld [vmem:[%s2401_s7 + $0x8] sm:$0xff]  }
  0x11   : > { %v565_v9 = vpack.c.bf16 %v564_v7, %v563_v6  ;;  %v1814_v14 = vld [vmem:[%s2396_s2] ss:$0 sm:$0xff]  ;;  %v908_v34 = vld [vmem:[%s2404_s10 + $0x1c8] sm:$0xff] }
  0x12   : > { %1916 = vmatpush3.bf16.msra.mxu0 %v582_v8  ;;  %1924 = vmatpush3.bf16.msra.mxu1 %v1977_v10  ;;  %v1815_v16 = vld [vmem:[%s2397_s3] ss:$0 sm:$0xff]  ;;  %v912_v37 = vld [vmem:[%s2404_s10 + $0x1e8] sm:$0xff] }
  0x13   : > { %1933 = vmatprep.subr.bf16.mxu0 %v2008_v1  ;;  %1925 = vmatprep.subr.bf16.mxu1 %v2008_v1  ;;  %v1983_v31 = vld [vmem:[%s2401_s7] sm:$0xff]   ;;  %v1890_v40 = vcombine.low %v908_v34, %v912_v37  ;;  %v1891_v41 = vcombine.high %v908_v34, %v912_v37  ;;  %v900_v2 = vld [vmem:[%s2404_s10 + $0x188] sm:$0xff] }
  0x14   : > { %v907_v32 = vld [vmem:[%s2404_s10 + $0x1c0] sm:$0xff]  ;;  %v904_v3 = vld [vmem:[%s2404_s10 + $0x1a8] sm:$0xff] }
  0x15   : > { %1918 = vmatmul.mubr.msk.bf16.vlgmr.msra.gmra.mxu0 %vm573_vm3, %v565_v9  ;;  %v911_v33 = vld [vmem:[%s2404_s10 + $0x1e0] sm:$0xff]  ;;  %v1883_v7 = vcombine.high %v900_v2, %v904_v3  ;;  %v892_v8 = vld [vmem:[%s2404_s10 + $0x148] sm:$0xff]  ;;  %v1882_v10 = vcombine.low %v900_v2, %v904_v3  ;;  %v902_v2 = vld [vmem:[%s2404_s10 + $0x198] sm:$0xff] }
  0x16   : > { %1941 = vmatprep.mubr.msk.bf16.mxu0 %vm2010_vm2, %v2008_v1  ;;  %1926 = vmatpush3.bf16.msra.mxu1 %v1978_v11  ;;  %v1888_v35 = vcombine.low %v907_v32, %v911_v33  ;;  %v1889_v36 = vcombine.high %v907_v32, %v911_v33  ;;  %v899_v38 = vld [vmem:[%s2404_s10 + $0x180] sm:$0xff]  ;;  %v896_v9 = vld [vmem:[%s2404_s10 + $0x168] sm:$0xff]  ;;  %v906_v3 = vld [vmem:[%s2404_s10 + $0x1b8] sm:$0xff] }
  0x17   : > { %1927 = vmatprep.subr.bf16.mxu1 %v2008_v1  ;;  %1934 = vmatpush3.bf16.msra.mxu0 %v1980_v13  ;;  %v903_v39 = vld [vmem:[%s2404_s10 + $0x1a0] sm:$0xff]  ;;  %v1875_v11 = vcombine.high %v892_v8, %v896_v9  ;;  %v888_v13 = vld [vmem:[%s2404_s10 + $0x128] sm:$0xff] }
  0x18   : > { %1935 = vmatprep.subr.bf16.mxu0 %v2008_v1  ;;  %v1881_v42 = vcombine.high %v899_v38, %v903_v39  ;;  %v1880_v43 = vcombine.low %v899_v38, %v903_v39  ;;  %v891_v44 = vld [vmem:[%s2404_s10 + $0x140] sm:$0xff]  ;;  %v860_v32 = vld [vmem:[%s2404_s10 + $0x48] sm:$0xff] }
  0x19   : > { %v895_v45 = vld [vmem:[%s2404_s10 + $0x160] sm:$0xff]  ;;  %v864_v33 = vld [vmem:[%s2404_s10 + $0x68] sm:$0xff] }
  0x1a   : > { %1928 = vmatpush3.bf16.msra.mxu1 %v1979_v12  ;;  %v1873_v46 = vcombine.high %v891_v44, %v895_v45  ;;  %v1872_v47 = vcombine.low %v891_v44, %v895_v45  ;;  %v883_v48 = vld [vmem:[%s2404_s10 + $0x100] sm:$0xff]  ;;  %v884_v12 = vld [vmem:[%s2404_s10 + $0x108] sm:$0xff]  ;;  %v909_v45 = vld [vmem:[%s2404_s10 + $0x1d0] sm:$0xff] }
  0x1b   : > { %1936 = vmatpush3.bf16.msra.mxu0 %v1981_v29  ;;  %1235 = vmatprep.subr.bf16.mxu1 %v1889_v36  ;;  %v887_v49 = vld [vmem:[%s2404_s10 + $0x120] sm:$0xff]  ;;  %v1843_v36 = vcombine.high %v860_v32, %v864_v33  ;;  %v852_v39 = vld [vmem:[%s2404_s10 + $0x8] sm:$0xff] }
  0x1c   : > { %1937 = vmatprep.subr.bf16.mxu0 %v2008_v1  ;;  %v1865_v50 = vcombine.high %v883_v48, %v887_v49  ;;  %v1864_v51 = vcombine.low %v883_v48, %v887_v49  ;;  %v875_v52 = vld [vmem:[%s2404_s10 + $0xc0] sm:$0xff]  ;;  %v914_v49 = vld [vmem:[%s2404_s10 + $0x1f8] sm:$0xff] }
  0x1d   : > { %v879_v53 = vld [vmem:[%s2404_s10 + $0xe0] sm:$0xff] }
  0x1e   : > { %v1857_v54 = vcombine.high %v875_v52, %v879_v53  ;;  %v1856_v55 = vcombine.low %v875_v52, %v879_v53  ;;  %v1823_v56 = vld [vmem:[%s2399_s5] ss:$0 sm:$0xff]  ;;  %v2011_v53 = vmov 0  }
  0x1f   : > { %1938 = vmatpush3.bf16.msra.mxu0 %v1982_v30  ;;  %v1824_v59 = vld [vmem:[%s2400_s6] ss:$0 sm:$0xff] }
  0x20   : > { %1939 = vmatprep.subr.bf16.mxu0 %v2008_v1  ;;  %v859_v29 = vld [vmem:[%s2404_s10 + $0x40] sm:$0xff] }
  0x21   : > { %v863_v30 = vld [vmem:[%s2404_s10 + $0x60] sm:$0xff] }
  0x22   : > { %v1840_v34 = vcombine.low %v859_v29, %v863_v30  ;;  %v851_v37 = vld [vmem:[%s2404_s10] sm:$0xff] }
  0x23   : > { %1940 = vmatpush3.bf16.msra.mxu0 %v1983_v31  ;;  %v1841_v31 = vcombine.high %v859_v29, %v863_v30  ;;  %v855_v38 = vld [vmem:[%s2404_s10 + $0x20] sm:$0xff] }
  0x24   : > { %1278 = vmatprep.subr.bf16.mxu0 %v1891_v41  ;;  %v856_v41 = vld [vmem:[%s2404_s10 + $0x28] sm:$0xff] }
  0x25   : > { %v1835_v44 = vcombine.high %v852_v39, %v856_v41 }
  0xd5   : > { %v618_v15 = vpop.f32.mrf.mxu0 }
  0xd6   : > { %v632_v17 = vmul.f32 %v1814_v14, %v618_v15  ;;  %v1867_v15 = vcombine.high %v884_v12, %v888_v13 }
  0xd7   : > { %v1919_v18 = vpop.f32.mrf.mxu0 }
  0xd8   : > { %v641_v19 = vadd.f32 %v1815_v16, %v632_v17  ;;  %v880_v17 = vld [vmem:[%s2404_s10 + $0xe8] sm:$0xff]  ;;  %v1866_v18 = vcombine.low %v884_v12, %v888_v13  ;;  %v898_v12 = vld [vmem:[%s2404_s10 + $0x178] sm:$0xff] }
  0xd9   : > { %v621_v20 = vpop.f32.mrf.mxu0 }
  0xda   : > { %v643_v21 = vmax.f32 %v641_v19, 0.0  ;;  %v633_v22 = vmul.f32 %v1814_v14, %v621_v20  ;;  %v1874_v14 = vcombine.low %v892_v8, %v896_v9  ;;  %v1887_v8 = vcombine.high %v902_v2, %v906_v3  ;;  %v893_v9 = vld [vmem:[%s2404_s10 + $0x150] sm:$0xff] }
  0xdb   : > { %v1920_v23 = vpop.f32.mrf.mxu0 }
  0xdc   : > { %v1901_v24 = vpack.c.bf16 %v643_v21, %v643_v21  ;;  %v642_v25 = vadd.f32 %v1815_v16, %v633_v22  ;;  %v876_v16 = vld [vmem:[%s2404_s10 + $0xc8] sm:$0xff]  ;;  %v871_v22 = vld [vmem:[%s2404_s10 + $0xa0] sm:$0xff] }
  0xdd   : > { %v1859_v19 = vcombine.high %v876_v16, %v880_v17  ;;  %v1858_v20 = vcombine.low %v876_v16, %v880_v17  ;;  %v868_v23 = vld [vmem:[%s2404_s10 + $0x88] sm:$0xff]  ;;  %v885_v17 = vld [vmem:[%s2404_s10 + $0x110] sm:$0xff] }
  0xde   : > { %654 = vst.msk [vmem:[%s553_s29] sm:$0xf] %vm653_vm4, %v1901_v24  ;;  %v644_v26 = vmax.f32 %v642_v25, 0.0  ;;  %v872_v25 = vld [vmem:[%s2404_s10 + $0xa8] sm:$0xff] }
  0xe0   : > { %v645_v27 = vpack.c.bf16 %v644_v26, %v643_v21  ;;  %v1902_v28 = vpack.c.bf16 %v644_v26, %v644_v26  ;;  %v867_v21 = vld [vmem:[%s2404_s10 + $0x80] sm:$0xff] }
  0xe1   : > { %v1849_v24 = vcombine.high %v867_v21, %v871_v22  ;;  %v1848_v26 = vcombine.low %v867_v21, %v871_v22 }
  0xe2   : > { %655 = vst.msk [vmem:[%s553_s29 + $0x4] sm:$0xf] %vm653_vm4, %v1902_v28  ;;  %1930 = vmatmul.mubr.msk.bf16.vlgmr.msra.gmra.mxu1 %vm688_vm5, %v645_v27  ;;  %v1850_v27 = vcombine.low %v868_v23, %v872_v25  ;;  %v1851_v28 = vcombine.high %v868_v23, %v872_v25  ;;  %v877_v25 = vld [vmem:[%s2404_s10 + $0xd0] sm:$0xff] }
  0xe3   : > { %1236 = vmatpush1.bf16.msra.mxu1 %v1888_v35  ;;  %v1842_v35 = vcombine.low %v860_v32, %v864_v33  ;;  %1267 = vmatprep.mubr.bf16.mxu1 %v2011_v53  ;;  %v869_v33 = vld [vmem:[%s2404_s10 + $0x90] sm:$0xff] }
  0xe4   : > { %1237 = vmatprep.subr.bf16.mxu1 %v1881_v42  ;;  %v1832_v42 = vcombine.low %v851_v37, %v855_v38 }
  0xe7   : > { %1238 = vmatpush1.bf16.msra.mxu1 %v1880_v43  ;;  %v1834_v43 = vcombine.low %v852_v39, %v856_v41  ;;  %v861_v41 = vld [vmem:[%s2404_s10 + $0x50] sm:$0xff] }
  0xe8   : > { %1239 = vmatprep.subr.bf16.mxu1 %v1873_v46  ;;  %v913_v46 = vld [vmem:[%s2404_s10 + $0x1f0] sm:$0xff] }
  0xe9   : > { %v1893_v48 = vcombine.high %v909_v45, %v913_v46 }
  0xeb   : > { %1240 = vmatpush1.bf16.msra.mxu1 %v1872_v47  ;;  %v910_v47 = vld [vmem:[%s2404_s10 + $0x1d8] sm:$0xff] }
  0xec   : > { %1241 = vmatprep.subr.bf16.mxu1 %v1865_v50  ;;  %v1892_v50 = vcombine.low %v909_v45, %v913_v46  ;;  %v1895_v52 = vcombine.high %v910_v47, %v914_v49 }
  0xef   : > { %1242 = vmatpush1.bf16.msra.mxu1 %v1864_v51  ;;  %v1894_v51 = vcombine.low %v910_v47, %v914_v49  ;;  %v853_v49 = vld [vmem:[%s2404_s10 + $0x10] sm:$0xff] }
  0xf0   : > { %1243 = vmatprep.subr.bf16.mxu1 %v1857_v54  ;;  %v1830_v54 = vld [vmem:[%s2402_s8] ss:$0 sm:$0xff] }
  0xf3   : > { %1244 = vmatpush1.bf16.msra.mxu1 %v1856_v55 }
  0xf4   : > { %1245 = vmatprep.subr.bf16.mxu1 %v1849_v24 }
  0xf7   : > { %1246 = vmatpush1.bf16.msra.mxu1 %v1848_v26  ;;  %v881_v26 = vld [vmem:[%s2404_s10 + $0xf0] sm:$0xff] }
  0xf8   : > { %1247 = vmatprep.subr.bf16.mxu1 %v1841_v31  ;;  %v1861_v31 = vcombine.high %v877_v25, %v881_v26 }
  0xfb   : > { %1248 = vmatpush1.bf16.msra.mxu1 %v1840_v34  ;;  %v873_v34 = vld [vmem:[%s2404_s10 + $0xb0] sm:$0xff] }
  0xfc   : > { %v1853_v39 = vcombine.high %v869_v33, %v873_v34  ;;  %v1852_v45 = vcombine.low %v869_v33, %v873_v34 }
 0x1a2   : > { %v726_v57 = vpop.f32.mrf.mxu1 }
 0x1a3   : > { %v740_v58 = vmul.f32 %v1823_v56, %v726_v57  ;;  %v1831_v57 = vld [vmem:[%s2403_s9] ss:$0 sm:$0xff] }
 0x1a4   : > { %v1931_v60 = vpop.f32.mrf.mxu1 }
 0x1a5   : > { %v749_v62 = vadd.f32 %v1824_v59, %v740_v58 }
 0x1a6   : > { %v729_v61 = vpop.f32.mrf.mxu1 }
 0x1a7   : > { %v741_v63 = vmul.f32 %v1823_v56, %v729_v61  ;;  %v751_v4 = vmax.f32 %v749_v62, 0.0 }
 0x1a8   : > { %v1932_v0 = vpop.f32.mrf.mxu1 }
 0x1a9   : > { %v750_v1 = vadd.f32 %v1824_v59, %v741_v63  ;;  %v901_v0 = vld [vmem:[%s2404_s10 + $0x190] sm:$0xff] }
 0x1ab   : > { %v752_v5 = vmax.f32 %v750_v1, 0.0  ;;  %v905_v1 = vld [vmem:[%s2404_s10 + $0x1b0] sm:$0xff] }
 0x1ac   : > { %v1884_v13 = vcombine.low %v901_v0, %v905_v1 }
 0x1ad   : > { %v753_v6 = vpack.c.bf16 %v752_v5, %v751_v4 }
 0x1af   : > { %1942 = vmatmul.mubr.msk.bf16.vlgmr.msra.gmra.mxu0 %vm688_vm5, %v753_v6 }
 0x1b0   : > { %1279 = vmatpush1.bf16.msra.mxu0 %v1890_v40  ;;  %v1833_v40 = vcombine.high %v851_v37, %v855_v38  ;;  %1310 = vmatprep.mubr.bf16.mxu0 %v2011_v53  ;;  %v1860_v37 = vcombine.low %v877_v25, %v881_v26 }
 0x1b1   : > { %1280 = vmatprep.subr.bf16.mxu0 %v1883_v7  ;;  %v1885_v7 = vcombine.high %v901_v0, %v905_v1 }
 0x1b2   : > { %1249 = vmatprep.subr.bf16.mxu1 %v1833_v40 }
 0x1b3   : > { %1250 = vmatpush1.bf16.msra.mxu1 %v1832_v42  ;;  %v865_v42 = vld [vmem:[%s2404_s10 + $0x70] sm:$0xff] }
 0x1b4   : > { %1281 = vmatpush1.bf16.msra.mxu0 %v1882_v10  ;;  %1321 = vmatprep.subr.bf16.mxu1 %v1893_v48  ;;  %v897_v10 = vld [vmem:[%s2404_s10 + $0x170] sm:$0xff]  ;;  %v1845_v47 = vcombine.high %v861_v41, %v865_v42 }
 0x1b5   : > { %1282 = vmatprep.subr.bf16.mxu0 %v1875_v11  ;;  %v894_v11 = vld [vmem:[%s2404_s10 + $0x158] sm:$0xff]  ;;  %v1876_v21 = vcombine.low %v893_v9, %v897_v10 }
 0x1b6   : > { %v1879_v16 = vcombine.high %v894_v11, %v898_v12  ;;  %v1878_v22 = vcombine.low %v894_v11, %v898_v12 }
 0x1b8   : > { %1283 = vmatpush1.bf16.msra.mxu0 %v1874_v14  ;;  %v1886_v14 = vcombine.low %v902_v2, %v906_v3 }
 0x1b9   : > { %1284 = vmatprep.subr.bf16.mxu0 %v1867_v15  ;;  %v1877_v15 = vcombine.high %v893_v9, %v897_v10 }
 0x1bc   : > { %1285 = vmatpush1.bf16.msra.mxu0 %v1866_v18  ;;  %v889_v18 = vld [vmem:[%s2404_s10 + $0x130] sm:$0xff] }
 0x1bd   : > { %1286 = vmatprep.subr.bf16.mxu0 %v1859_v19  ;;  %v886_v19 = vld [vmem:[%s2404_s10 + $0x118] sm:$0xff]  ;;  %v1869_v23 = vcombine.high %v885_v17, %v889_v18  ;;  %v1868_v29 = vcombine.low %v885_v17, %v889_v18 }
 0x1c0   : > { %1287 = vmatpush1.bf16.msra.mxu0 %v1858_v20  ;;  %v890_v20 = vld [vmem:[%s2404_s10 + $0x138] sm:$0xff] }
 0x1c1   : > { %1288 = vmatprep.subr.bf16.mxu0 %v1851_v28  ;;  %v1871_v24 = vcombine.high %v886_v19, %v890_v20  ;;  %v882_v28 = vld [vmem:[%s2404_s10 + $0xf8] sm:$0xff]  ;;  %v1870_v30 = vcombine.low %v886_v19, %v890_v20 }
 0x1c4   : > { %1289 = vmatpush1.bf16.msra.mxu0 %v1850_v27  ;;  %v878_v27 = vld [vmem:[%s2404_s10 + $0xd8] sm:$0xff] }
 0x1c5   : > { %1290 = vmatprep.subr.bf16.mxu0 %v1843_v36  ;;  %v1863_v32 = vcombine.high %v878_v27, %v882_v28  ;;  %v874_v36 = vld [vmem:[%s2404_s10 + $0xb8] sm:$0xff]  ;;  %v1862_v38 = vcombine.low %v878_v27, %v882_v28 }
 0x1c8   : > { %1291 = vmatpush1.bf16.msra.mxu0 %v1842_v35  ;;  %v870_v35 = vld [vmem:[%s2404_s10 + $0x98] sm:$0xff] }
 0x1c9   : > { %1292 = vmatprep.subr.bf16.mxu0 %v1835_v44  ;;  %v1855_v40 = vcombine.high %v870_v35, %v874_v36  ;;  %v866_v44 = vld [vmem:[%s2404_s10 + $0x78] sm:$0xff]  ;;  %v1854_v46 = vcombine.low %v870_v35, %v874_v36 }
 0x1cc   : > { %1293 = vmatpush1.bf16.msra.mxu0 %v1834_v43  ;;  %v862_v43 = vld [vmem:[%s2404_s10 + $0x58] sm:$0xff] }
 0x1cd   : > { %1364 = vmatprep.subr.bf16.mxu0 %v1895_v52  ;;  %v1847_v48 = vcombine.high %v862_v43, %v866_v44  ;;  %v858_v52 = vld [vmem:[%s2404_s10 + $0x38] sm:$0xff] }
 0x26f   : > { %v823_v55 = vpop.f32.mrf.mxu0 }
 0x270   : > { %v837_v56 = vmul.f32 %v1830_v54, %v823_v55 }
 0x271   : > { %v1943_v58 = vpop.f32.mrf.mxu0 }
 0x272   : > { %v846_v60 = vadd.f32 %v1831_v57, %v837_v56 }
 0x273   : > { %v826_v59 = vpop.f32.mrf.mxu0 }
 0x274   : > { %v838_v61 = vmul.f32 %v1830_v54, %v826_v59  ;;  %v848_v4 = vmax.f32 %v846_v60, 0.0  ;;  %v1846_v54 = vcombine.low %v862_v43, %v866_v44  ;;  %v1409_v59 = vlaneseq }
 0x275   : > { %v1944_v62 = vpop.f32.mrf.mxu0 }
 0x276   : > { %v847_v63 = vadd.f32 %v1831_v57, %v838_v61  ;;  %v2364_v0 = vshrl.u32 %v1409_v59, 7 }
 0x278   : > { %v849_v5 = vmax.f32 %v847_v63, 0.0  ;;  %v1415_v3 = vsub.s32 1, %v2364_v0 }
 0x27a   : > { %v2286_v6 = vpack.c.bf16 %v849_v5, %v848_v4  ;;  %v1423_v4 = vsub.s32 3, %v2364_v0  ;;  %v1411_v5 = vsub.s32 0, %v2364_v0 }
 0x27c   : > { %1268 = vmatmul.mubr.bf16.vlgmr.msra.gmra.mxu1 %v2286_v6  ;;  %1311 = vmatmul.mubr.bf16.vlgmr.msra.gmra.mxu0 %v2286_v6 }
 0x27d   : > { %1322 = vmatpush1.bf16.msra.mxu1 %v1892_v50  ;;  %1365 = vmatpush1.bf16.msra.mxu0 %v1894_v51  ;;  %v857_v50 = vld [vmem:[%s2404_s10 + $0x30] sm:$0xff]  ;;  %v854_v51 = vld [vmem:[%s2404_s10 + $0x18] sm:$0xff] }
 0x27e   : > { %1323 = vmatprep.subr.bf16.mxu1 %v1885_v7  ;;  %1366 = vmatprep.subr.bf16.mxu0 %v1887_v8  ;;  %v1837_v55 = vcombine.high %v853_v49, %v857_v50  ;;  %v1839_v56 = vcombine.high %v854_v51, %v858_v52  ;;  %v1836_v57 = vcombine.low %v853_v49, %v857_v50  ;;  %v1419_v7 = vsub.s32 2, %v2364_v0 }
 0x27f   : > { %1353 = vmatprep.mubr.bf16.mxu1 %v2011_v53  ;;  %1396 = vmatprep.mubr.bf16.mxu0 %v2011_v53  ;;  %v1844_v53 = vcombine.low %v861_v41, %v865_v42  ;;  %v1838_v58 = vcombine.low %v854_v51, %v858_v52  ;;  %v1431_v49 = vsub.s32 5, %v2364_v0  ;;  %v1439_v50 = vsub.s32 7, %v2364_v0 }
 0x281   : > { %1324 = vmatpush1.bf16.msra.mxu1 %v1884_v13  ;;  %1367 = vmatpush1.bf16.msra.mxu0 %v1886_v14  ;;  %v1465_v14 = vld [vmem:[%s2406_s12] sm:$0xff] }
 0x282   : > { %1325 = vmatprep.subr.bf16.mxu1 %v1877_v15  ;;  %1368 = vmatprep.subr.bf16.mxu0 %v1879_v16  ;;  %v1474_v20 = vrot.slane %v1465_v14, %v1415_v3  ;;  %v1478_v26 = vrot.slane %v1465_v14, %v1419_v7 }
 0x285   : > { %1326 = vmatpush1.bf16.msra.mxu1 %v1876_v21  ;;  %1369 = vmatpush1.bf16.msra.mxu0 %v1878_v22  ;;  %v1482_v22 = vrot.slane %v1465_v14, %v1423_v4 }
 0x286   : > { %1327 = vmatprep.subr.bf16.mxu1 %v1869_v23  ;;  %1370 = vmatprep.subr.bf16.mxu0 %v1871_v24  ;;  %v1470_v24 = vrot.slane %v1465_v14, %v1411_v5 }
 0x289   : > { %1328 = vmatpush1.bf16.msra.mxu1 %v1868_v29  ;;  %1371 = vmatpush1.bf16.msra.mxu0 %v1870_v30 }
 0x28a   : > { %1329 = vmatprep.subr.bf16.mxu1 %v1861_v31  ;;  %1372 = vmatprep.subr.bf16.mxu0 %v1863_v32 }
 0x28d   : > { %1330 = vmatpush1.bf16.msra.mxu1 %v1860_v37  ;;  %1373 = vmatpush1.bf16.msra.mxu0 %v1862_v38 }
 0x28e   : > { %1331 = vmatprep.subr.bf16.mxu1 %v1853_v39  ;;  %1374 = vmatprep.subr.bf16.mxu0 %v1855_v40 }
 0x291   : > { %1332 = vmatpush1.bf16.msra.mxu1 %v1852_v45  ;;  %1375 = vmatpush1.bf16.msra.mxu0 %v1854_v46 }
 0x292   : > { %1333 = vmatprep.subr.bf16.mxu1 %v1845_v47  ;;  %1376 = vmatprep.subr.bf16.mxu0 %v1847_v48  ;;  %v1427_v47 = vsub.s32 4, %v2364_v0  ;;  %v1435_v48 = vsub.s32 6, %v2364_v0 }
 0x295   : > { %1334 = vmatpush1.bf16.msra.mxu1 %v1844_v53  ;;  %1377 = vmatpush1.bf16.msra.mxu0 %v1846_v54 }
 0x296   : > { %1335 = vmatprep.subr.bf16.mxu1 %v1837_v55  ;;  %1378 = vmatprep.subr.bf16.mxu0 %v1839_v56 }
 0x299   : > { %1336 = vmatpush1.bf16.msra.mxu1 %v1836_v57  ;;  %1379 = vmatpush1.bf16.msra.mxu0 %v1838_v58 }
 0x29c   : > { %1354 = vmatmul.mubr.bf16.vlgmr.msra.gmra.mxu1 %v2286_v6  ;;  %1397 = vmatmul.mubr.bf16.vlgmr.msra.gmra.mxu0 %v2286_v6  ;;  %v1407_v6 = vld [vmem:[%s2405_s11] sm:$0xff] }
 0x29d   : > { %v1416_v10 = vrot.slane %v1407_v6, %v1415_v3  ;;  %v1424_v11 = vrot.slane %v1407_v6, %v1423_v4  ;;  %v1412_v12 = vrot.slane %v1407_v6, %v1411_v5  ;;  %v1420_v13 = vrot.slane %v1407_v6, %v1419_v7 }
 0x29e   : > { %v1428_v55 = vrot.slane %v1407_v6, %v1427_v47  ;;  %v1436_v56 = vrot.slane %v1407_v6, %v1435_v48  ;;  %v1432_v57 = vrot.slane %v1407_v6, %v1431_v49  ;;  %v1440_v58 = vrot.slane %v1407_v6, %v1439_v50 }
 0x29f   : > { %v1486_v3 = vrot.slane %v1465_v14, %v1427_v47  ;;  %v1494_v5 = vrot.slane %v1465_v14, %v1435_v48 }
 0x33c   : > { %v1269_v60 = vpop.f32.mrf.mxu1  ;;  %v1312_v61 = vpop.f32.mrf.mxu0 }
 0x33d   : > { %v1449_v23 = vmul.f32 %v1412_v12, %v1269_v60  ;;  %v1451_v25 = vmul.f32 %v1420_v13, %v1312_v61 }
 0x33e   : > { %v1271_v62 = vpop.f32.mrf.mxu1  ;;  %v1314_v63 = vpop.f32.mrf.mxu0 }
 0x33f   : > { %v1450_v19 = vmul.f32 %v1416_v10, %v1271_v62  ;;  %v1452_v21 = vmul.f32 %v1424_v11, %v1314_v63  ;;  %v1507_v33 = vadd.f32 %v1470_v24, %v1449_v23  ;;  %v1509_v34 = vadd.f32 %v1478_v26, %v1451_v25 }
 0x340   : > { %v1273_v1 = vpop.f32.mrf.mxu1  ;;  %v1316_v2 = vpop.f32.mrf.mxu0 }
 0x341   : > { %v1457_v17 = vmul.f32 %v1412_v12, %v1273_v1  ;;  %v1459_v18 = vmul.f32 %v1420_v13, %v1316_v2  ;;  %v1508_v31 = vadd.f32 %v1474_v20, %v1450_v19  ;;  %v1510_v32 = vadd.f32 %v1482_v22, %v1452_v21 }
 0x342   : > { %v1275_v8 = vpop.f32.mrf.mxu1  ;;  %v1318_v9 = vpop.f32.mrf.mxu0  ;;  %v1523_v41 = vmax.f32 %v1507_v33, 0.0  ;;  %v1525_v42 = vmax.f32 %v1509_v34, 0.0  ;;  %v1498_v12 = vrot.slane %v1465_v14, %v1439_v50  ;;  %v2012_v19 = vmov 1966171168  }
 0x343   : > { %v1458_v15 = vmul.f32 %v1416_v10, %v1275_v8  ;;  %v1460_v16 = vmul.f32 %v1424_v11, %v1318_v9  ;;  %v1515_v29 = vadd.f32 %v1470_v24, %v1457_v17  ;;  %v1517_v30 = vadd.f32 %v1478_v26, %v1459_v18 }
 0x344   : > { %v1524_v39 = vmax.f32 %v1508_v31, 0.0  ;;  %v1526_v40 = vmax.f32 %v1510_v32, 0.0  ;;  %v1490_v10 = vrot.slane %v1465_v14, %v1431_v49 }
 0x345   : > { %v1516_v27 = vadd.f32 %v1474_v20, %v1458_v15  ;;  %v1518_v28 = vadd.f32 %v1482_v22, %v1460_v16  ;;  %v1531_v37 = vmax.f32 %v1515_v29, 0.0  ;;  %v1533_v38 = vmax.f32 %v1517_v30, 0.0 }
 0x346   : > { %v1614_v20 = vunpack.c.l.s4 %v2012_v19 }
 0x347   : > { %v1532_v35 = vmax.f32 %v1516_v27, 0.0  ;;  %v1534_v36 = vmax.f32 %v1518_v28, 0.0  ;;  %v1539_v45 = vmax.f32 %v1523_v41, %v1531_v37  ;;  %v1553_v46 = vmax.f32 %v1525_v42, %v1533_v38 }
 0x349   : > { %v1546_v43 = vmax.f32 %v1524_v39, %v1532_v35  ;;  %v1560_v44 = vmax.f32 %v1526_v40, %v1534_v36  ;;  %v1540_v53 = vrot.slane %v1539_v45, 4  ;;  %v1554_v54 = vrot.slane %v1553_v46, 4 }
 0x34b   : > { %v1547_v51 = vrot.slane %v1546_v43, 4  ;;  %v1561_v52 = vrot.slane %v1560_v44, 4  ;;  %v1541_v63 = vmax.f32 %v1539_v45, %v1540_v53  ;;  %v1555_v1 = vmax.f32 %v1553_v46, %v1554_v54 }
 0x34d   : > { %v1548_v59 = vmax.f32 %v1546_v43, %v1547_v51  ;;  %v1562_v60 = vmax.f32 %v1560_v44, %v1561_v52  ;;  %v1542_v17 = vrot.slane %v1541_v63, 2  ;;  %v1556_v18 = vrot.slane %v1555_v1, 2 }
 0x34f   : > { %v1549_v13 = vrot.slane %v1548_v59, 2  ;;  %v1563_v15 = vrot.slane %v1562_v60, 2  ;;  %v1543_v34 = vmax.f32 %v1541_v63, %v1542_v17  ;;  %v1557_v35 = vmax.f32 %v1555_v1, %v1556_v18 }
 0x351   : > { %v1550_v31 = vmax.f32 %v1548_v59, %v1549_v13  ;;  %v1564_v14 = vmax.f32 %v1562_v60, %v1563_v15  ;;  %v1544_v52 = vrot.slane %v1543_v34, 1  ;;  %v1558_v53 = vrot.slane %v1557_v35, 1 }
 0x353   : > { %v1551_v46 = vrot.slane %v1550_v31, 1  ;;  %v1565_v47 = vrot.slane %v1564_v14, 1 }
 0x355   : > { %v1552_v59 = vmax.f32 %v1550_v31, %v1551_v46  ;;  %v1566_v60 = vmax.f32 %v1564_v14, %v1565_v47 }
 0x35c   : > { %v1355_v61 = vpop.f32.mrf.mxu1  ;;  %v1398_v62 = vpop.f32.mrf.mxu0 }
 0x35d   : > { %v1453_v2 = vmul.f32 %v1428_v55, %v1355_v61  ;;  %v1455_v4 = vmul.f32 %v1436_v56, %v1398_v62 }
 0x35e   : > { %v1357_v7 = vpop.f32.mrf.mxu1  ;;  %v1400_v8 = vpop.f32.mrf.mxu0 }
 0x35f   : > { %v1454_v9 = vmul.f32 %v1432_v57, %v1357_v7  ;;  %v1456_v11 = vmul.f32 %v1440_v58, %v1400_v8  ;;  %v1511_v21 = vadd.f32 %v1486_v3, %v1453_v2  ;;  %v1513_v22 = vadd.f32 %v1494_v5, %v1455_v4 }
 0x360   : > { %v1359_v16 = vpop.f32.mrf.mxu1  ;;  %v1402_v6 = vpop.f32.mrf.mxu0  ;;  %v1545_v2 = vmax.f32 %v1543_v34, %v1544_v52 }
 0x361   : > { %v1461_v23 = vmul.f32 %v1428_v55, %v1359_v16  ;;  %v1463_v24 = vmul.f32 %v1436_v56, %v1402_v6  ;;  %v1512_v27 = vadd.f32 %v1490_v10, %v1454_v9  ;;  %v1514_v28 = vadd.f32 %v1498_v12, %v1456_v11 }
 0x362   : > { %v1361_v25 = vpop.f32.mrf.mxu1  ;;  %v1404_v26 = vpop.f32.mrf.mxu0  ;;  %v1527_v38 = vmax.f32 %v1511_v21, 0.0  ;;  %v1529_v39 = vmax.f32 %v1513_v22, 0.0  ;;  %v1615_v56 = vunpack.c.0.s8 %v1614_v20 }
 0x363   : > { %v1462_v29 = vmul.f32 %v1432_v57, %v1361_v25  ;;  %v1464_v30 = vmul.f32 %v1440_v58, %v1404_v26  ;;  %v1519_v32 = vadd.f32 %v1486_v3, %v1461_v23  ;;  %v1521_v33 = vadd.f32 %v1494_v5, %v1463_v24 }
 0x364   : > { %v1528_v42 = vmax.f32 %v1512_v27, 0.0  ;;  %v1530_v43 = vmax.f32 %v1514_v28, 0.0  ;;  %v1559_v3 = vmax.f32 %v1557_v35, %v1558_v53  ;;  %v1618_v7 = vsub.s32 %v1615_v56, %v2364_v0 }
 0x365   : > { %v1520_v36 = vadd.f32 %v1490_v10, %v1462_v29  ;;  %v1522_v37 = vadd.f32 %v1498_v12, %v1464_v30  ;;  %v1535_v40 = vmax.f32 %v1519_v32, 0.0  ;;  %v1537_v41 = vmax.f32 %v1521_v33, 0.0 }
 0x366   : > { %v1609_v10 = vcombine.low %v1545_v2, %v1552_v59  ;;  %v1610_v11 = vcombine.low %v1559_v3, %v1566_v60 }
 0x367   : > { %v1536_v44 = vmax.f32 %v1520_v36, 0.0  ;;  %v1538_v45 = vmax.f32 %v1522_v37, 0.0  ;;  %v1567_v48 = vmax.f32 %v1527_v38, %v1535_v40  ;;  %v1581_v49 = vmax.f32 %v1529_v39, %v1537_v41 }
 0x368   : > { %v1619_v20 = vrot.slane %v1609_v10, %v1618_v7  ;;  %v1626_v21 = vrot.slane %v1610_v11, %v1618_v7 }
 0x369   : > { %v1574_v50 = vmax.f32 %v1528_v42, %v1536_v44  ;;  %v1588_v51 = vmax.f32 %v1530_v43, %v1538_v45  ;;  %v1568_v54 = vrot.slane %v1567_v48, 4  ;;  %v1582_v55 = vrot.slane %v1581_v49, 4 }
 0x36a   : > { %v1641_v27 = vcombine.low %v1619_v20, %v1626_v21 }
 0x36b   : > { %v1575_v57 = vrot.slane %v1574_v50, 4  ;;  %v1589_v58 = vrot.slane %v1588_v51, 4  ;;  %v1569_v61 = vmax.f32 %v1567_v48, %v1568_v54  ;;  %v1583_v62 = vmax.f32 %v1581_v49, %v1582_v55 }
 0x36c   : > { %v1649_v31 = vrot.slane %v1641_v27, %v1618_v7 }
 0x36d   : > { %v1576_v63 = vmax.f32 %v1574_v50, %v1575_v57  ;;  %v1590_v1 = vmax.f32 %v1588_v51, %v1589_v58  ;;  %v1570_v4 = vrot.slane %v1569_v61, 2  ;;  %v1584_v5 = vrot.slane %v1583_v62, 2 }
 0x36f   : > { %v1577_v8 = vrot.slane %v1576_v63, 2  ;;  %v1591_v9 = vrot.slane %v1590_v1, 2  ;;  %v1571_v12 = vmax.f32 %v1569_v61, %v1570_v4  ;;  %v1585_v13 = vmax.f32 %v1583_v62, %v1584_v5 }
 0x371   : > { %v1578_v15 = vmax.f32 %v1576_v63, %v1577_v8  ;;  %v1592_v16 = vmax.f32 %v1590_v1, %v1591_v9  ;;  %v1572_v6 = vrot.slane %v1571_v12, 1  ;;  %v1586_v17 = vrot.slane %v1585_v13, 1 }
 0x373   : > { %v1579_v18 = vrot.slane %v1578_v15, 1  ;;  %v1593_v19 = vrot.slane %v1592_v16, 1  ;;  %v1573_v22 = vmax.f32 %v1571_v12, %v1572_v6  ;;  %v1587_v23 = vmax.f32 %v1585_v13, %v1586_v17 }
 0x375   : > { %v1580_v24 = vmax.f32 %v1578_v15, %v1579_v18  ;;  %v1594_v25 = vmax.f32 %v1592_v16, %v1593_v19 }
 0x377   : > { %v1611_v0 = vcombine.low %v1573_v22, %v1580_v24  ;;  %v1612_v26 = vcombine.low %v1587_v23, %v1594_v25 }
 0x379   : > { %v1633_v28 = vrot.slane %v1611_v0, %v1618_v7  ;;  %v1640_v29 = vrot.slane %v1612_v26, %v1618_v7 }
 0x37b   : > { %v1642_v30 = vcombine.low %v1633_v28, %v1640_v29 }
 0x37d   : > { %v1656_v14 = vrot.slane %v1642_v30, %v1618_v7 }
 0x37f   : > { %v1657_v32 = vcombine.low %v1649_v31, %v1656_v14 }
 0x381   : > { %1660 = vst [vmem:[%s560_s22] sm:$0xff] %v1657_v32 }
 0x382 PF: > { %s25_s15 = sadd.s32 1, %s2006_s15   ;;  %s2409_s29 = smov %s2002_s30 }
 0x383   : > { %p22_p5 = scmp.ge.s32.totalorder %s25_s15, 4   ;;  %s2410_s30 = smov %s2412_s16 }
 0x385   :  { %24 = sbr.rel (!%p22_p5) target bundleno = 2 (0x2), region = 121 }

// kernel: pointnet_semseg_forward.6
= control target key start
LH: loop header
LB: loop body
LE: loop exit
PB: predicated region body
PF: predicated region fallthrough
CT: control target
= control target key end

     0   :  { %s1535_s24 = smov 0   ;;  %s1537_s25 = smov 0   ;;  %s1800_s0 = inlined_call_operand.vmem [shape: bf16[2,16,64], index: 0, kind: input, shape index: {}]   ;;  %s1801_s1 = inlined_call_operand.vmem [shape: bf16[2,64,128], index: 1, kind: input, shape index: {}]   ;;  %s1802_s2 = inlined_call_operand.vmem [shape: f32[1,128], index: 2, kind: input, shape index: {}]   ;;  %s1803_s3 = inlined_call_operand.vmem [shape: f32[1,128], index: 3, kind: input, shape index: {}]   ;;  %s1804_s4 = inlined_call_operand.vmem [shape: bf16[128,1024], index: 4, kind: input, shape index: {}]   ;;  %s1805_s5 = inlined_call_operand.vmem [shape: f32[1,1024], index: 5, kind: input, shape index: {}]   ;;  %s1806_s6 = inlined_call_operand.vmem [shape: f32[1,1024], index: 6, kind: input, shape index: {}]   ;;  %s1807_s7 = inlined_call_operand.vmem [shape: f32[2,1,1024], index: 7, kind: output, shape index: {}]  }
   0x1   :  { %s1539_s26 = smov 0  }
   0x2 LB: > { %s36_s27 = sadd.s32 1, %s1485_s25  ;;  %p1334_p0 = scmp.ge.s32.totalorder %s1489_s26, 1  ;;  %s1489_s26 = sphi %s1539_s26, %s17_s26   ;;  %s1485_s25 = sphi %s1537_s25, %s1809_s25   ;;  %s1481_s24 = sphi %s1535_s24, %s1808_s24  }
   0x3   : > { %p38_p1 = scmp.ge.s32.totalorder %s36_s27, 2  ;;  %p279_p2 = scmp.lt.s32.totalorder %s1489_s26, 3 }
   0x5   : > { %s1811_s27 = smov (%p38_p1, %s36_s27), 0  ;;  %p280_p3 = pnand %p1334_p0, %p279_p2 }
   0x6   : > { %p323_p4 = scmp.lt.s32.totalorder (!%p280_p3), %s1481_s24, 1 }
   0x7   : > { %283 = sbr.rel (%p280_p3) target bundleno = 496 (0x1f0), region = 48 }
   0xc   : > { %v506_v0 = vld [vmem:[%s1804_s4 + $0x1c0] sm:$0xff]  ;;  %v1491_v1 = vmov 0.0   ;;  %vm1492_vm0 = vmmov 0   ;;  %s1813_s24 = smov (!%p323_p4, %s1481_s24), 1  ;;  %v507_v22 = vld [vmem:[%s1804_s4 + $0x1c8] sm:$0xff]  ;;  %vm384_vm1 = vcmask 523264  }
   0xd   : > { %1421 = vmatprep.subr.bf16.mxu0 %v1491_v1  ;;  %1429 = vmatprep.mubr.msk.bf16.mxu0 %vm1492_vm0, %v1491_v1  ;;  %v510_v2 = vld [vmem:[%s1804_s4 + $0x1e0] sm:$0xff]  ;;  %s1415_s17 = sshll.u32 %s1813_s24, 5  ;;  %s1414_s23 = sshll.u32 %s1813_s24, 3  ;;  %v511_v23 = vld [vmem:[%s1804_s4 + $0x1e8] sm:$0xff] }
   0xe   : > { %v1405_v3 = vcombine.high %v506_v0, %v510_v2  ;;  %v1404_v4 = vcombine.low %v506_v0, %v510_v2  ;;  %v498_v5 = vld [vmem:[%s1804_s4 + $0x180] sm:$0xff]  ;;  %s337_s20 = scalar_lea.vmem %s1801_s1, %s1415_s17  ;;  %s330_s9 = scalar_lea.vmem %s1800_s0, %s1414_s23  ;;  %v1407_v26 = vcombine.high %v507_v22, %v511_v23  ;;  %v499_v28 = vld [vmem:[%s1804_s4 + $0x188] sm:$0xff]  ;;  %v1406_v31 = vcombine.low %v507_v22, %v511_v23 }
   0xf   : > { %v502_v6 = vld [vmem:[%s1804_s4 + $0x1a0] sm:$0xff]  ;;  %v1462_v12 = vld [vmem:[%s337_s20 + $0x18] sm:$0xff]   ;;  %v1463_v15 = vld [vmem:[%s337_s20 + $0x10] sm:$0xff]   ;;  %s342_s29 = scalar_lea.vmem %s1807_s7, %s1414_s23 }
  0x10   : > { %v1397_v7 = vcombine.high %v498_v5, %v502_v6  ;;  %v490_v8 = vld [vmem:[%s1804_s4 + $0x140] sm:$0xff]  ;;  %834 = vmatprep.subr.bf16.mxu1 %v1405_v3  ;;  %v1396_v10 = vcombine.low %v498_v5, %v502_v6  ;;  %1422 = vmatpush3.bf16.msra.mxu0 %v1462_v12  ;;  %v1464_v20 = vld [vmem:[%s337_s20 + $0x8] sm:$0xff]   ;;  %v508_v6 = vld [vmem:[%s1804_s4 + $0x1d0] sm:$0xff] }
  0x11   : > { %v494_v9 = vld [vmem:[%s1804_s4 + $0x160] sm:$0xff]  ;;  %835 = vmatpush1.bf16.msra.mxu1 %v1404_v4  ;;  %1423 = vmatprep.subr.bf16.mxu0 %v1491_v1  ;;  %v503_v29 = vld [vmem:[%s1804_s4 + $0x1a8] sm:$0xff] }
  0x12   : > { %v482_v11 = vld [vmem:[%s1804_s4 + $0x100] sm:$0xff]  ;;  %836 = vmatprep.subr.bf16.mxu1 %v1397_v7  ;;  %v1389_v13 = vcombine.high %v490_v8, %v494_v9  ;;  %v1388_v16 = vcombine.low %v490_v8, %v494_v9  ;;  %v1399_v32 = vcombine.high %v499_v28, %v503_v29  ;;  %v491_v33 = vld [vmem:[%s1804_s4 + $0x148] sm:$0xff]  ;;  %v1398_v35 = vcombine.low %v499_v28, %v503_v29  ;;  %v512_v7 = vld [vmem:[%s1804_s4 + $0x1f0] sm:$0xff] }
  0x13   : > { %v486_v14 = vld [vmem:[%s1804_s4 + $0x120] sm:$0xff]  ;;  %v495_v34 = vld [vmem:[%s1804_s4 + $0x168] sm:$0xff]  ;;  %v509_v8 = vld [vmem:[%s1804_s4 + $0x1d8] sm:$0xff]  ;;  %v1409_v9 = vcombine.high %v508_v6, %v512_v7 }
  0x14   : > { %v1381_v17 = vcombine.high %v482_v11, %v486_v14  ;;  %v474_v18 = vld [vmem:[%s1804_s4 + $0xc0] sm:$0xff]  ;;  %1424 = vmatpush3.bf16.msra.mxu0 %v1463_v15  ;;  %v1380_v21 = vcombine.low %v482_v11, %v486_v14  ;;  %v1391_v36 = vcombine.high %v491_v33, %v495_v34  ;;  %v483_v37 = vld [vmem:[%s1804_s4 + $0x108] sm:$0xff]  ;;  %v1390_v39 = vcombine.low %v491_v33, %v495_v34  ;;  %v505_v28 = vld [vmem:[%s1804_s4 + $0x1b8] sm:$0xff] }
  0x15   : > { %837 = vmatpush1.bf16.msra.mxu1 %v1396_v10  ;;  %v478_v19 = vld [vmem:[%s1804_s4 + $0xe0] sm:$0xff]  ;;  %1425 = vmatprep.subr.bf16.mxu0 %v1491_v1  ;;  %v487_v38 = vld [vmem:[%s1804_s4 + $0x128] sm:$0xff]  ;;  %v513_v10 = vld [vmem:[%s1804_s4 + $0x1f8] sm:$0xff]  ;;  %v1408_v11 = vcombine.low %v508_v6, %v512_v7  ;;  %v1493_v14 = vmov 0  }
  0x16   : > { %838 = vmatprep.subr.bf16.mxu1 %v1389_v13  ;;  %v1373_v24 = vcombine.high %v474_v18, %v478_v19  ;;  %v1465_v25 = vld [vmem:[%s337_s20] sm:$0xff]   ;;  %v1372_v27 = vcombine.low %v474_v18, %v478_v19  ;;  %v1383_v40 = vcombine.high %v483_v37, %v487_v38  ;;  %v475_v41 = vld [vmem:[%s1804_s4 + $0xc8] sm:$0xff]  ;;  %v1382_v43 = vcombine.low %v483_v37, %v487_v38  ;;  %v492_v34 = vld [vmem:[%s1804_s4 + $0x150] sm:$0xff] }
  0x17   : > { %v1466_v30 = vld [vmem:[%s330_s9] sm:$0xff]   ;;  %v479_v42 = vld [vmem:[%s1804_s4 + $0xe8] sm:$0xff]  ;;  %v1410_v12 = vcombine.low %v509_v8, %v513_v10  ;;  %v1411_v13 = vcombine.high %v509_v8, %v513_v10  ;;  %866 = vmatprep.mubr.bf16.mxu1 %v1493_v14  ;;  %v497_v37 = vld [vmem:[%s1804_s4 + $0x178] sm:$0xff] }
  0x18   : > { %1426 = vmatpush3.bf16.msra.mxu0 %v1464_v20  ;;  %v1375_v44 = vcombine.high %v475_v41, %v479_v42  ;;  %v1374_v45 = vcombine.low %v475_v41, %v479_v42  ;;  %v466_v46 = vld [vmem:[%s1804_s4 + $0x80] sm:$0xff]  ;;  %v467_v48 = vld [vmem:[%s1804_s4 + $0x88] sm:$0xff]  ;;  %v484_v42 = vld [vmem:[%s1804_s4 + $0x110] sm:$0xff] }
  0x19   : > { %839 = vmatpush1.bf16.msra.mxu1 %v1388_v16  ;;  %1427 = vmatprep.subr.bf16.mxu0 %v1491_v1  ;;  %v470_v47 = vld [vmem:[%s1804_s4 + $0xa0] sm:$0xff]  ;;  %v471_v50 = vld [vmem:[%s1804_s4 + $0xa8] sm:$0xff]  ;;  %v452_v10 = vld [vmem:[%s1804_s4 + $0x10] sm:$0xff] }
  0x1a   : > { %840 = vmatprep.subr.bf16.mxu1 %v1381_v17  ;;  %v1365_v49 = vcombine.high %v466_v46, %v470_v47  ;;  %v1366_v51 = vcombine.low %v467_v48, %v471_v50  ;;  %v1367_v52 = vcombine.high %v467_v48, %v471_v50  ;;  %v1364_v53 = vcombine.low %v466_v46, %v470_v47  ;;  %v458_v54 = vld [vmem:[%s1804_s4 + $0x40] sm:$0xff]  ;;  %v459_v57 = vld [vmem:[%s1804_s4 + $0x48] sm:$0xff]  ;;  %v476_v50 = vld [vmem:[%s1804_s4 + $0xd0] sm:$0xff] }
  0x1b   : > { %v462_v55 = vld [vmem:[%s1804_s4 + $0x60] sm:$0xff]  ;;  %v463_v58 = vld [vmem:[%s1804_s4 + $0x68] sm:$0xff] }
  0x1c   : > { %1428 = vmatpush3.bf16.msra.mxu0 %v1465_v25  ;;  %v1357_v56 = vcombine.high %v458_v54, %v462_v55  ;;  %v1358_v59 = vcombine.low %v459_v57, %v463_v58  ;;  %v1359_v60 = vcombine.high %v459_v57, %v463_v58  ;;  %v1356_v61 = vcombine.low %v458_v54, %v462_v55  ;;  %v450_v62 = vld [vmem:[%s1804_s4] sm:$0xff]  ;;  %v451_v0 = vld [vmem:[%s1804_s4 + $0x8] sm:$0xff]  ;;  %v500_v25 = vld [vmem:[%s1804_s4 + $0x190] sm:$0xff] }
  0x1d   : > { %841 = vmatpush1.bf16.msra.mxu1 %v1380_v21  ;;  %877 = vmatprep.subr.bf16.mxu0 %v1407_v26  ;;  %v454_v63 = vld [vmem:[%s1804_s4 + $0x20] sm:$0xff]  ;;  %v455_v2 = vld [vmem:[%s1804_s4 + $0x28] sm:$0xff]  ;;  %v504_v26 = vld [vmem:[%s1804_s4 + $0x1b0] sm:$0xff] }
  0x1e   : > { %842 = vmatprep.subr.bf16.mxu1 %v1373_v24  ;;  %v1349_v1 = vcombine.high %v450_v62, %v454_v63  ;;  %v1350_v3 = vcombine.low %v451_v0, %v455_v2  ;;  %v1351_v4 = vcombine.high %v451_v0, %v455_v2  ;;  %v1348_v5 = vcombine.low %v450_v62, %v454_v63  ;;  %v1346_v15 = vld [vmem:[%s1802_s2] ss:$0 sm:$0xff]  ;;  %v468_v58 = vld [vmem:[%s1804_s4 + $0x90] sm:$0xff] }
  0x1f   : > { %1430 = vmatmul.mubr.msk.bf16.vlgmr.msra.gmra.mxu0 %vm384_vm1, %v1466_v30  ;;  %v1347_v18 = vld [vmem:[%s1803_s3] ss:$0 sm:$0xff]  ;;  %v1400_v38 = vcombine.low %v500_v25, %v504_v26  ;;  %v460_v2 = vld [vmem:[%s1804_s4 + $0x50] sm:$0xff] }
  0x20   : > { %878 = vmatpush1.bf16.msra.mxu0 %v1406_v31  ;;  %909 = vmatprep.mubr.bf16.mxu0 %v1493_v14 }
  0x21   : > { %843 = vmatpush1.bf16.msra.mxu1 %v1372_v27  ;;  %879 = vmatprep.subr.bf16.mxu0 %v1399_v32  ;;  %v501_v27 = vld [vmem:[%s1804_s4 + $0x198] sm:$0xff]  ;;  %v1401_v32 = vcombine.high %v500_v25, %v504_v26 }
  0x22   : > { %844 = vmatprep.subr.bf16.mxu1 %v1365_v49  ;;  %v1403_v33 = vcombine.high %v501_v27, %v505_v28 }
  0x24   : > { %880 = vmatpush1.bf16.msra.mxu0 %v1398_v35  ;;  %v496_v35 = vld [vmem:[%s1804_s4 + $0x170] sm:$0xff] }
  0x25   : > { %881 = vmatprep.subr.bf16.mxu0 %v1391_v36  ;;  %845 = vmatpush1.bf16.msra.mxu1 %v1364_v53  ;;  %v493_v36 = vld [vmem:[%s1804_s4 + $0x158] sm:$0xff]  ;;  %v1392_v46 = vcombine.low %v492_v34, %v496_v35 }
  0x26   : > { %846 = vmatprep.subr.bf16.mxu1 %v1357_v56  ;;  %v1395_v41 = vcombine.high %v493_v36, %v497_v37  ;;  %v1394_v47 = vcombine.low %v493_v36, %v497_v37  ;;  %v481_v53 = vld [vmem:[%s1804_s4 + $0xf8] sm:$0xff] }
  0x28   : > { %882 = vmatpush1.bf16.msra.mxu0 %v1390_v39  ;;  %v1402_v39 = vcombine.low %v501_v27, %v505_v28 }
  0x29   : > { %883 = vmatprep.subr.bf16.mxu0 %v1383_v40  ;;  %847 = vmatpush1.bf16.msra.mxu1 %v1356_v61  ;;  %v1393_v40 = vcombine.high %v492_v34, %v496_v35  ;;  %v473_v61 = vld [vmem:[%s1804_s4 + $0xb8] sm:$0xff] }
  0x2a   : > { %848 = vmatprep.subr.bf16.mxu1 %v1349_v1 }
  0x2c   : > { %884 = vmatpush1.bf16.msra.mxu0 %v1382_v43  ;;  %v488_v43 = vld [vmem:[%s1804_s4 + $0x130] sm:$0xff] }
  0x2d   : > { %885 = vmatprep.subr.bf16.mxu0 %v1375_v44  ;;  %849 = vmatpush1.bf16.msra.mxu1 %v1348_v5  ;;  %v485_v44 = vld [vmem:[%s1804_s4 + $0x118] sm:$0xff]  ;;  %v1385_v48 = vcombine.high %v484_v42, %v488_v43  ;;  %v1384_v54 = vcombine.low %v484_v42, %v488_v43 }
  0x2e   : > { %920 = vmatprep.subr.bf16.mxu1 %v1409_v9  ;;  %v465_v5 = vld [vmem:[%s1804_s4 + $0x78] sm:$0xff] }
  0x30   : > { %886 = vmatpush1.bf16.msra.mxu0 %v1374_v45  ;;  %v489_v45 = vld [vmem:[%s1804_s4 + $0x138] sm:$0xff] }
  0x31   : > { %887 = vmatprep.subr.bf16.mxu0 %v1367_v52  ;;  %v1387_v49 = vcombine.high %v485_v44, %v489_v45  ;;  %v477_v52 = vld [vmem:[%s1804_s4 + $0xd8] sm:$0xff]  ;;  %v1386_v55 = vcombine.low %v485_v44, %v489_v45 }
  0x32   : > { %v1379_v57 = vcombine.high %v477_v52, %v481_v53  ;;  %v1378_v63 = vcombine.low %v477_v52, %v481_v53 }
  0x34   : > { %888 = vmatpush1.bf16.msra.mxu0 %v1366_v51  ;;  %v480_v51 = vld [vmem:[%s1804_s4 + $0xf0] sm:$0xff] }
  0x35   : > { %889 = vmatprep.subr.bf16.mxu0 %v1359_v60  ;;  %v1377_v56 = vcombine.high %v476_v50, %v480_v51  ;;  %v469_v60 = vld [vmem:[%s1804_s4 + $0x98] sm:$0xff]  ;;  %v1376_v62 = vcombine.low %v476_v50, %v480_v51 }
  0x36   : > { %v1371_v1 = vcombine.high %v469_v60, %v473_v61  ;;  %v1370_v7 = vcombine.low %v469_v60, %v473_v61 }
  0x38   : > { %890 = vmatpush1.bf16.msra.mxu0 %v1358_v59  ;;  %v472_v59 = vld [vmem:[%s1804_s4 + $0xb0] sm:$0xff] }
  0x39   : > { %891 = vmatprep.subr.bf16.mxu0 %v1351_v4  ;;  %v1369_v0 = vcombine.high %v468_v58, %v472_v59  ;;  %v461_v4 = vld [vmem:[%s1804_s4 + $0x58] sm:$0xff]  ;;  %v1368_v6 = vcombine.low %v468_v58, %v472_v59 }
  0x3a   : > { %v1363_v9 = vcombine.high %v461_v4, %v465_v5 }
  0x3c   : > { %892 = vmatpush1.bf16.msra.mxu0 %v1350_v3  ;;  %v464_v3 = vld [vmem:[%s1804_s4 + $0x70] sm:$0xff] }
  0x3d   : > { %963 = vmatprep.subr.bf16.mxu0 %v1411_v13  ;;  %v1361_v8 = vcombine.high %v460_v2, %v464_v3  ;;  %v457_v13 = vld [vmem:[%s1804_s4 + $0x38] sm:$0xff] }
  0xdf   : > { %v422_v16 = vpop.f32.mrf.mxu0 }
  0xe0   : > { %v436_v17 = vmul.f32 %v1346_v15, %v422_v16 }
  0xe1   : > { %v1431_v19 = vpop.f32.mrf.mxu0 }
  0xe2   : > { %v445_v21 = vadd.f32 %v1347_v18, %v436_v17 }
  0xe3   : > { %v425_v20 = vpop.f32.mrf.mxu0 }
  0xe4   : > { %v437_v22 = vmul.f32 %v1346_v15, %v425_v20  ;;  %v447_v29 = vmax.f32 %v445_v21, 0.0  ;;  %v1362_v15 = vcombine.low %v461_v4, %v465_v5 }
  0xe5   : > { %v1432_v23 = vpop.f32.mrf.mxu0 }
  0xe6   : > { %v446_v24 = vadd.f32 %v1347_v18, %v437_v22  ;;  %v1008_v22 = vlaneseq }
  0xe8   : > { %v448_v30 = vmax.f32 %v446_v24, 0.0  ;;  %v1769_v25 = vshrl.u32 %v1008_v22, 7 }
  0xea   : > { %v1691_v31 = vpack.c.bf16 %v448_v30, %v447_v29  ;;  %v1014_v28 = vsub.s32 1, %v1769_v25  ;;  %v1022_v29 = vsub.s32 3, %v1769_v25  ;;  %v1010_v30 = vsub.s32 0, %v1769_v25 }
  0xec   : > { %867 = vmatmul.mubr.bf16.vlgmr.msra.gmra.mxu1 %v1691_v31  ;;  %910 = vmatmul.mubr.bf16.vlgmr.msra.gmra.mxu0 %v1691_v31 }
  0xed   : > { %921 = vmatpush1.bf16.msra.mxu1 %v1408_v11  ;;  %964 = vmatpush1.bf16.msra.mxu0 %v1410_v12  ;;  %v456_v11 = vld [vmem:[%s1804_s4 + $0x30] sm:$0xff]  ;;  %v453_v12 = vld [vmem:[%s1804_s4 + $0x18] sm:$0xff] }
  0xee   : > { %922 = vmatprep.subr.bf16.mxu1 %v1401_v32  ;;  %965 = vmatprep.subr.bf16.mxu0 %v1403_v33  ;;  %v1353_v16 = vcombine.high %v452_v10, %v456_v11  ;;  %v1355_v17 = vcombine.high %v453_v12, %v457_v13  ;;  %v1352_v18 = vcombine.low %v452_v10, %v456_v11  ;;  %v1018_v32 = vsub.s32 2, %v1769_v25 }
  0xef   : > { %952 = vmatprep.mubr.bf16.mxu1 %v1493_v14  ;;  %995 = vmatprep.mubr.bf16.mxu0 %v1493_v14  ;;  %v1360_v14 = vcombine.low %v460_v2, %v464_v3  ;;  %v1354_v19 = vcombine.low %v453_v12, %v457_v13  ;;  %v1026_v2 = vsub.s32 4, %v1769_v25  ;;  %v1034_v3 = vsub.s32 6, %v1769_v25 }
  0xf1   : > { %923 = vmatpush1.bf16.msra.mxu1 %v1400_v38  ;;  %966 = vmatpush1.bf16.msra.mxu0 %v1402_v39  ;;  %v1064_v38 = vld [vmem:[%s1806_s6] sm:$0xff] }
  0xf2   : > { %924 = vmatprep.subr.bf16.mxu1 %v1393_v40  ;;  %967 = vmatprep.subr.bf16.mxu0 %v1395_v41  ;;  %v1073_v42 = vrot.slane %v1064_v38, %v1014_v28  ;;  %v1081_v43 = vrot.slane %v1064_v38, %v1022_v29 }
  0xf5   : > { %925 = vmatpush1.bf16.msra.mxu1 %v1392_v46  ;;  %968 = vmatpush1.bf16.msra.mxu0 %v1394_v47 }
  0xf6   : > { %926 = vmatprep.subr.bf16.mxu1 %v1385_v48  ;;  %969 = vmatprep.subr.bf16.mxu0 %v1387_v49  ;;  %v1069_v48 = vrot.slane %v1064_v38, %v1010_v30  ;;  %v1077_v49 = vrot.slane %v1064_v38, %v1018_v32 }
  0xf9   : > { %927 = vmatpush1.bf16.msra.mxu1 %v1384_v54  ;;  %970 = vmatpush1.bf16.msra.mxu0 %v1386_v55 }
  0xfa   : > { %928 = vmatprep.subr.bf16.mxu1 %v1377_v56  ;;  %971 = vmatprep.subr.bf16.mxu0 %v1379_v57 }
  0xfd   : > { %929 = vmatpush1.bf16.msra.mxu1 %v1376_v62  ;;  %972 = vmatpush1.bf16.msra.mxu0 %v1378_v63 }
  0xfe   : > { %930 = vmatprep.subr.bf16.mxu1 %v1369_v0  ;;  %973 = vmatprep.subr.bf16.mxu0 %v1371_v1 }
 0x101   : > { %931 = vmatpush1.bf16.msra.mxu1 %v1368_v6  ;;  %974 = vmatpush1.bf16.msra.mxu0 %v1370_v7  ;;  %v1030_v6 = vsub.s32 5, %v1769_v25  ;;  %v1038_v7 = vsub.s32 7, %v1769_v25 }
 0x102   : > { %932 = vmatprep.subr.bf16.mxu1 %v1361_v8  ;;  %975 = vmatprep.subr.bf16.mxu0 %v1363_v9 }
 0x105   : > { %933 = vmatpush1.bf16.msra.mxu1 %v1360_v14  ;;  %976 = vmatpush1.bf16.msra.mxu0 %v1362_v15 }
 0x106   : > { %934 = vmatprep.subr.bf16.mxu1 %v1353_v16  ;;  %977 = vmatprep.subr.bf16.mxu0 %v1355_v17 }
 0x109   : > { %935 = vmatpush1.bf16.msra.mxu1 %v1352_v18  ;;  %978 = vmatpush1.bf16.msra.mxu0 %v1354_v19  ;;  %v1085_v18 = vrot.slane %v1064_v38, %v1026_v2  ;;  %v1093_v19 = vrot.slane %v1064_v38, %v1034_v3 }
 0x10c   : > { %953 = vmatmul.mubr.bf16.vlgmr.msra.gmra.mxu1 %v1691_v31  ;;  %996 = vmatmul.mubr.bf16.vlgmr.msra.gmra.mxu0 %v1691_v31  ;;  %v1006_v31 = vld [vmem:[%s1805_s5] sm:$0xff] }
 0x10d   : > { %v1015_v35 = vrot.slane %v1006_v31, %v1014_v28  ;;  %v1023_v36 = vrot.slane %v1006_v31, %v1022_v29  ;;  %v1011_v37 = vrot.slane %v1006_v31, %v1010_v30  ;;  %v1019_v39 = vrot.slane %v1006_v31, %v1018_v32 }
 0x10e   : > { %v1027_v10 = vrot.slane %v1006_v31, %v1026_v2  ;;  %v1035_v11 = vrot.slane %v1006_v31, %v1034_v3  ;;  %v1031_v16 = vrot.slane %v1006_v31, %v1030_v6  ;;  %v1039_v17 = vrot.slane %v1006_v31, %v1038_v7 }
 0x10f   : > { %v1097_v28 = vrot.slane %v1064_v38, %v1038_v7 }
 0x1ac   : > { %v868_v20 = vpop.f32.mrf.mxu1  ;;  %v911_v21 = vpop.f32.mrf.mxu0 }
 0x1ad   : > { %v1048_v50 = vmul.f32 %v1011_v37, %v868_v20  ;;  %v1050_v51 = vmul.f32 %v1019_v39, %v911_v21 }
 0x1ae   : > { %v870_v23 = vpop.f32.mrf.mxu1  ;;  %v913_v24 = vpop.f32.mrf.mxu0 }
 0x1af   : > { %v1049_v44 = vmul.f32 %v1015_v35, %v870_v23  ;;  %v1051_v45 = vmul.f32 %v1023_v36, %v913_v24  ;;  %v1106_v58 = vadd.f32 %v1069_v48, %v1048_v50  ;;  %v1108_v59 = vadd.f32 %v1077_v49, %v1050_v51 }
 0x1b0   : > { %v872_v26 = vpop.f32.mrf.mxu1  ;;  %v915_v27 = vpop.f32.mrf.mxu0 }
 0x1b1   : > { %v1056_v46 = vmul.f32 %v1011_v37, %v872_v26  ;;  %v1058_v47 = vmul.f32 %v1019_v39, %v915_v27  ;;  %v1107_v54 = vadd.f32 %v1073_v42, %v1049_v44  ;;  %v1109_v55 = vadd.f32 %v1081_v43, %v1051_v45 }
 0x1b2   : > { %v874_v33 = vpop.f32.mrf.mxu1  ;;  %v917_v34 = vpop.f32.mrf.mxu0  ;;  %v1089_v27 = vrot.slane %v1064_v38, %v1030_v6 }
 0x1b3   : > { %v1057_v40 = vmul.f32 %v1015_v35, %v874_v33  ;;  %v1059_v41 = vmul.f32 %v1023_v36, %v917_v34  ;;  %v1114_v56 = vadd.f32 %v1069_v48, %v1056_v46  ;;  %v1116_v57 = vadd.f32 %v1077_v49, %v1058_v47 }
 0x1b5   : > { %v1115_v52 = vadd.f32 %v1073_v42, %v1057_v40  ;;  %v1117_v53 = vadd.f32 %v1081_v43, %v1059_v41  ;;  %v1122_v62 = vmax.f32 %v1106_v58, %v1114_v56  ;;  %v1136_v63 = vmax.f32 %v1108_v59, %v1116_v57 }
 0x1b6   : > { %v1494_v56 = vmov 1966171168  }
 0x1b7   : > { %v1129_v60 = vmax.f32 %v1107_v54, %v1115_v52  ;;  %v1143_v61 = vmax.f32 %v1109_v55, %v1117_v53  ;;  %v1123_v4 = vrot.slane %v1122_v62, 4  ;;  %v1137_v5 = vrot.slane %v1136_v63, 4 }
 0x1b8   : > { %v1197_v57 = vunpack.c.l.s4 %v1494_v56 }
 0x1b9   : > { %v1130_v0 = vrot.slane %v1129_v60, 4  ;;  %v1144_v1 = vrot.slane %v1143_v61, 4  ;;  %v1124_v12 = vmax.f32 %v1122_v62, %v1123_v4  ;;  %v1138_v13 = vmax.f32 %v1136_v63, %v1137_v5 }
 0x1ba   : > { %v1198_v6 = vunpack.c.0.s8 %v1197_v57 }
 0x1bb   : > { %v1131_v8 = vmax.f32 %v1129_v60, %v1130_v0  ;;  %v1145_v9 = vmax.f32 %v1143_v61, %v1144_v1  ;;  %v1125_v29 = vrot.slane %v1124_v12, 2  ;;  %v1139_v30 = vrot.slane %v1138_v13, 2 }
 0x1bd   : > { %v1132_v20 = vrot.slane %v1131_v8, 2  ;;  %v1146_v21 = vrot.slane %v1145_v9, 2  ;;  %v1126_v48 = vmax.f32 %v1124_v12, %v1125_v29  ;;  %v1140_v38 = vmax.f32 %v1138_v13, %v1139_v30 }
 0x1bf   : > { %v1133_v39 = vmax.f32 %v1131_v8, %v1132_v20  ;;  %v1147_v31 = vmax.f32 %v1145_v9, %v1146_v21  ;;  %v1127_v63 = vrot.slane %v1126_v48, 1  ;;  %v1141_v0 = vrot.slane %v1140_v38, 1 }
 0x1c1   : > { %v1134_v55 = vrot.slane %v1133_v39, 1  ;;  %v1148_v58 = vrot.slane %v1147_v31, 1  ;;  %v1128_v12 = vmax.f32 %v1126_v48, %v1127_v63  ;;  %v1142_v13 = vmax.f32 %v1140_v38, %v1141_v0 }
 0x1c3   : > { %v1135_v5 = vmax.f32 %v1133_v39, %v1134_v55  ;;  %v1149_v7 = vmax.f32 %v1147_v31, %v1148_v58 }
 0x1c5   : > { %v1193_v20 = vcombine.low %v1142_v13, %v1149_v7 }
 0x1cc   : > { %v954_v14 = vpop.f32.mrf.mxu1  ;;  %v997_v15 = vpop.f32.mrf.mxu0 }
 0x1cd   : > { %v1052_v22 = vmul.f32 %v1027_v10, %v954_v14  ;;  %v1054_v23 = vmul.f32 %v1035_v11, %v997_v15 }
 0x1ce   : > { %v956_v24 = vpop.f32.mrf.mxu1  ;;  %v999_v26 = vpop.f32.mrf.mxu0 }
 0x1cf   : > { %v1053_v32 = vmul.f32 %v1031_v16, %v956_v24  ;;  %v1055_v33 = vmul.f32 %v1039_v17, %v999_v26  ;;  %v1110_v40 = vadd.f32 %v1085_v18, %v1052_v22  ;;  %v1112_v41 = vadd.f32 %v1093_v19, %v1054_v23 }
 0x1d0   : > { %v958_v34 = vpop.f32.mrf.mxu1  ;;  %v1001_v35 = vpop.f32.mrf.mxu0 }
 0x1d1   : > { %v1060_v36 = vmul.f32 %v1027_v10, %v958_v34  ;;  %v1062_v37 = vmul.f32 %v1035_v11, %v1001_v35  ;;  %v1111_v49 = vadd.f32 %v1089_v27, %v1053_v32  ;;  %v1113_v50 = vadd.f32 %v1097_v28, %v1055_v33 }
 0x1d2   : > { %v960_v42 = vpop.f32.mrf.mxu1  ;;  %v1003_v43 = vpop.f32.mrf.mxu0 }
 0x1d3   : > { %v1118_v44 = vadd.f32 %v1085_v18, %v1060_v36  ;;  %v1120_v45 = vadd.f32 %v1093_v19, %v1062_v37  ;;  %v1061_v46 = vmul.f32 %v1031_v16, %v960_v42  ;;  %v1063_v47 = vmul.f32 %v1039_v17, %v1003_v43 }
 0x1d4   : > { %v1192_v18 = vcombine.low %v1128_v12, %v1135_v5  ;;  %v1201_v19 = vsub.s32 %v1198_v6, %v1769_v25 }
 0x1d5   : > { %v1150_v51 = vmax.f32 %v1110_v40, %v1118_v44  ;;  %v1164_v52 = vmax.f32 %v1112_v41, %v1120_v45  ;;  %v1119_v53 = vadd.f32 %v1089_v27, %v1061_v46  ;;  %v1121_v54 = vadd.f32 %v1097_v28, %v1063_v47 }
 0x1d6   : > { %v1202_v28 = vrot.slane %v1192_v18, %v1201_v19  ;;  %v1209_v29 = vrot.slane %v1193_v20, %v1201_v19 }
 0x1d7   : > { %v1151_v59 = vrot.slane %v1150_v51, 4  ;;  %v1165_v60 = vrot.slane %v1164_v52, 4  ;;  %v1157_v61 = vmax.f32 %v1111_v49, %v1119_v53  ;;  %v1171_v62 = vmax.f32 %v1113_v50, %v1121_v54 }
 0x1d8   : > { %v1224_v37 = vcombine.low %v1202_v28, %v1209_v29 }
 0x1d9   : > { %v1152_v1 = vmax.f32 %v1150_v51, %v1151_v59  ;;  %v1166_v2 = vmax.f32 %v1164_v52, %v1165_v60  ;;  %v1158_v3 = vrot.slane %v1157_v61, 4  ;;  %v1172_v4 = vrot.slane %v1171_v62, 4 }
 0x1da   : > { %v1232_v40 = vrot.slane %v1224_v37, %v1201_v19 }
 0x1db   : > { %v1153_v8 = vrot.slane %v1152_v1, 2  ;;  %v1167_v9 = vrot.slane %v1166_v2, 2  ;;  %v1159_v10 = vmax.f32 %v1157_v61, %v1158_v3  ;;  %v1173_v11 = vmax.f32 %v1171_v62, %v1172_v4 }
 0x1dd   : > { %v1154_v14 = vmax.f32 %v1152_v1, %v1153_v8  ;;  %v1168_v15 = vmax.f32 %v1166_v2, %v1167_v9  ;;  %v1160_v16 = vrot.slane %v1159_v10, 2  ;;  %v1174_v17 = vrot.slane %v1173_v11, 2 }
 0x1df   : > { %v1155_v21 = vrot.slane %v1154_v14, 1  ;;  %v1169_v22 = vrot.slane %v1168_v15, 1  ;;  %v1161_v23 = vmax.f32 %v1159_v10, %v1160_v16  ;;  %v1175_v24 = vmax.f32 %v1173_v11, %v1174_v17 }
 0x1e1   : > { %v1162_v26 = vrot.slane %v1161_v23, 1  ;;  %v1176_v27 = vrot.slane %v1175_v24, 1  ;;  %v1156_v30 = vmax.f32 %v1154_v14, %v1155_v21  ;;  %v1170_v32 = vmax.f32 %v1168_v15, %v1169_v22 }
 0x1e3   : > { %v1163_v33 = vmax.f32 %v1161_v23, %v1162_v26  ;;  %v1177_v34 = vmax.f32 %v1175_v24, %v1176_v27 }
 0x1e5   : > { %v1194_v35 = vcombine.low %v1156_v30, %v1163_v33  ;;  %v1195_v36 = vcombine.low %v1170_v32, %v1177_v34 }
 0x1e7   : > { %v1216_v39 = vrot.slane %v1194_v35, %v1201_v19  ;;  %v1223_v31 = vrot.slane %v1195_v36, %v1201_v19 }
 0x1e9   : > { %v1225_v25 = vcombine.low %v1216_v39, %v1223_v31 }
 0x1eb   : > { %v1239_v41 = vrot.slane %v1225_v25, %v1201_v19 }
 0x1ed   : > { %v1240_v42 = vcombine.low %v1232_v40, %v1239_v41 }
 0x1ef   : > { %1243 = vst [vmem:[%s342_s29] sm:$0xff] %v1240_v42 }
 0x1f0 PF: > { %s17_s26 = sadd.s32 1, %s1489_s26   ;;  %s1808_s24 = smov %s1485_s25 }
 0x1f1   : > { %p14_p5 = scmp.ge.s32.totalorder %s17_s26, 4   ;;  %s1809_s25 = smov %s1811_s27 }
 0x1f3   :  { %16 = sbr.rel (!%p14_p5) target bundleno = 2 (0x2), region = 85 }

// kernel: pointnet_semseg_forward.7
= control target key start
LH: loop header
LB: loop body
LE: loop exit
PB: predicated region body
PF: predicated region fallthrough
CT: control target
= control target key end

     0   :  { %s2149_s21 = smov 0   ;;  %s2151_s22 = smov 0   ;;  %s2488_s0 = inlined_call_operand.vmem [shape: bf16[2,16,64], index: 0, kind: input, shape index: {}]   ;;  %s2489_s1 = inlined_call_operand.vmem [shape: bf16[2,64,512], index: 1, kind: input, shape index: {}]   ;;  %s2490_s2 = inlined_call_operand.vmem [shape: f32[1,512], index: 2, kind: input, shape index: {}]   ;;  %s2491_s3 = inlined_call_operand.vmem [shape: f32[2,1,512], index: 3, kind: input, shape index: {}]   ;;  %s2492_s4 = inlined_call_operand.vmem [shape: bf16[512,256], index: 4, kind: input, shape index: {}]   ;;  %s2493_s5 = inlined_call_operand.vmem [shape: f32[1,256], index: 5, kind: input, shape index: {}]   ;;  %s2494_s6 = inlined_call_operand.vmem [shape: f32[1,256], index: 6, kind: input, shape index: {}]   ;;  %s2495_s7 = inlined_call_operand.vmem [shape: bf16[256,128], index: 7, kind: input, shape index: {}]   ;;  %s2496_s8 = inlined_call_operand.vmem [shape: f32[1,128], index: 8, kind: input, shape index: {}]   ;;  %s2497_s9 = inlined_call_operand.vmem [shape: f32[1,128], index: 9, kind: input, shape index: {}]   ;;  %s2498_s10 = inlined_call_operand.vmem [shape: bf16[128,128], index: 10, kind: input, shape index: {}]   ;;  %s2499_s11 = inlined_call_operand.vmem [shape: f32[1,128], index: 11, kind: input, shape index: {}]   ;;  %s2500_s12 = inlined_call_operand.vmem [shape: f32[2,16,128], index: 12, kind: output, shape index: {}]  }
   0x1   :  { %s2153_s23 = smov 0  }
   0x2 LB: > { %s34_s24 = sadd.s32 1, %s2075_s22  ;;  %p1703_p0 = scmp.ge.s32.totalorder %s2079_s23, 1  ;;  %s2079_s23 = sphi %s2153_s23, %s22_s23   ;;  %s2075_s22 = sphi %s2151_s22, %s2502_s22   ;;  %s2071_s21 = sphi %s2149_s21, %s2501_s21  }
   0x3   : > { %p36_p1 = scmp.ge.s32.totalorder %s34_s24, 2  ;;  %p402_p2 = scmp.lt.s32.totalorder %s2079_s23, 3 }
   0x5   : > { %s2504_s24 = smov (%p36_p1, %s34_s24), 0  ;;  %p403_p3 = pnand %p1703_p0, %p402_p2 }
   0x6   : > { %p462_p4 = scmp.lt.s32.totalorder (!%p403_p3), %s2071_s21, 1 }
   0x7   : > { %406 = sbr.rel (%p403_p3) target bundleno = 1171 (0x493), region = 68 }
   0xc   : > { %v2081_v0 = vmov 0   ;;  %s2506_s21 = smov (!%p462_p4, %s2071_s21), 1  ;;  %v1931_v17 = vld [vmem:[%s2492_s4 + $0x74] ss:$8 sps:$4 sm:$0xff]   ;;  %v1929_v19 = vld [vmem:[%s2492_s4 + $0x70] ss:$8 sps:$4 sm:$0xff]  }
   0xd   : > { %630 = vmatprep.mubr.bf16.mxu0 %v2081_v0  ;;  %673 = vmatprep.mubr.bf16.mxu1 %v2081_v0  ;;  %s1824_s25 = sshll.u32 %s2506_s21, 7  ;;  %s1823_s29 = sshll.u32 %s2506_s21, 3  ;;  %v1934_v18 = vld [vmem:[%s2492_s4 + $0x174] ss:$8 sps:$4 sm:$0xff]   ;;  %vm594_vm0 = vcmask 523264   ;;  %vm2083_vm1 = vmmov 0  }
   0xe   : > { %s475_s28 = scalar_lea.vmem %s2489_s1, %s1824_s25  ;;  %s469_s14 = scalar_lea.vmem %s2488_s0, %s1823_s29  ;;  %v1932_v21 = vld [vmem:[%s2492_s4 + $0x170] ss:$8 sps:$4 sm:$0xff]   ;;  %v1937_v22 = vld [vmem:[%s2492_s4 + $0x64] ss:$8 sps:$4 sm:$0xff]   ;;  %v1935_v24 = vld [vmem:[%s2492_s4 + $0x60] ss:$8 sps:$4 sm:$0xff]  }
   0xf   : > { %v1904_v1 = vld [vmem:[%s475_s28 + $0x64] ss:$16 sps:$4 sm:$0xff]   ;;  %v1906_v2 = vld [vmem:[%s475_s28 + $0x6c] ss:$16 sps:$4 sm:$0xff]   ;;  %v1908_v3 = vld [vmem:[%s475_s28 + $0x60] ss:$16 sps:$4 sm:$0xff]  }
  0x10   : > { %606 = vmatprep.subr.bf16.mxu0 %v1904_v1  ;;  %v1909_v4 = vld [vmem:[%s475_s28 + $0x68] ss:$16 sps:$4 sm:$0xff]   ;;  %649 = vmatprep.subr.bf16.mxu1 %v1906_v2  ;;  %v1910_v5 = vld [vmem:[%s475_s28 + $0x44] ss:$16 sps:$4 sm:$0xff]   ;;  %v1912_v6 = vld [vmem:[%s475_s28 + $0x4c] ss:$16 sps:$4 sm:$0xff]  }
  0x11   : > { %607 = vmatpush1.bf16.msra.mxu0 %v1908_v3  ;;  %650 = vmatpush1.bf16.msra.mxu1 %v1909_v4  ;;  %v1914_v7 = vld [vmem:[%s475_s28 + $0x40] ss:$16 sps:$4 sm:$0xff]   ;;  %v1915_v8 = vld [vmem:[%s475_s28 + $0x48] ss:$16 sps:$4 sm:$0xff]   ;;  %v1916_v9 = vld [vmem:[%s475_s28 + $0x24] ss:$16 sps:$4 sm:$0xff]  }
  0x12   : > { %608 = vmatprep.subr.bf16.mxu0 %v1910_v5  ;;  %651 = vmatprep.subr.bf16.mxu1 %v1912_v6  ;;  %v1918_v10 = vld [vmem:[%s475_s28 + $0x2c] ss:$16 sps:$4 sm:$0xff]   ;;  %v1920_v11 = vld [vmem:[%s475_s28 + $0x20] ss:$16 sps:$4 sm:$0xff]   ;;  %v1921_v12 = vld [vmem:[%s475_s28 + $0x28] ss:$16 sps:$4 sm:$0xff]  }
  0x13   : > { %v1922_v13 = vld [vmem:[%s475_s28 + $0x4] ss:$16 sps:$4 sm:$0xff]   ;;  %v1924_v14 = vld [vmem:[%s475_s28 + $0xc] ss:$16 sps:$4 sm:$0xff]   ;;  %v1926_v15 = vld [vmem:[%s475_s28] ss:$16 sps:$4 sm:$0xff]  }
  0x14   : > { %v1927_v16 = vld [vmem:[%s475_s28 + $0x8] ss:$16 sps:$4 sm:$0xff]   ;;  %v1928_v20 = vld [vmem:[%s469_s14] sm:$0xff]   ;;  %v1943_v26 = vld [vmem:[%s2492_s4 + $0x54] ss:$8 sps:$4 sm:$0xff]   ;;  %s1708_s19 = sshll.u32 %s2506_s21, 2 }
  0x15   : > { %609 = vmatpush1.bf16.msra.mxu0 %v1914_v7  ;;  %652 = vmatpush1.bf16.msra.mxu1 %v1915_v8  ;;  %v1940_v23 = vld [vmem:[%s2492_s4 + $0x164] ss:$8 sps:$4 sm:$0xff]   ;;  %v1938_v25 = vld [vmem:[%s2492_s4 + $0x160] ss:$8 sps:$4 sm:$0xff]   ;;  %v1946_v27 = vld [vmem:[%s2492_s4 + $0x154] ss:$8 sps:$4 sm:$0xff]   ;;  %s479_s28 = scalar_lea.vmem %s2491_s3, %s1708_s19 }
  0x16   : > { %610 = vmatprep.subr.bf16.mxu0 %v1916_v9  ;;  %653 = vmatprep.subr.bf16.mxu1 %v1918_v10  ;;  %v1941_v28 = vld [vmem:[%s2492_s4 + $0x50] ss:$8 sps:$4 sm:$0xff]   ;;  %v1949_v30 = vld [vmem:[%s2492_s4 + $0x44] ss:$8 sps:$4 sm:$0xff]   ;;  %v1947_v32 = vld [vmem:[%s2492_s4 + $0x40] ss:$8 sps:$4 sm:$0xff]  }
  0x17   : > { %v1944_v29 = vld [vmem:[%s2492_s4 + $0x150] ss:$8 sps:$4 sm:$0xff]   ;;  %v1952_v31 = vld [vmem:[%s2492_s4 + $0x144] ss:$8 sps:$4 sm:$0xff]   ;;  %v1950_v33 = vld [vmem:[%s2492_s4 + $0x140] ss:$8 sps:$4 sm:$0xff]  }
  0x18   : > { %v1955_v34 = vld [vmem:[%s2492_s4 + $0x34] ss:$8 sps:$4 sm:$0xff]   ;;  %v1953_v36 = vld [vmem:[%s2492_s4 + $0x30] ss:$8 sps:$4 sm:$0xff]   ;;  %v1961_v38 = vld [vmem:[%s2492_s4 + $0x24] ss:$8 sps:$4 sm:$0xff]  }
  0x19   : > { %611 = vmatpush1.bf16.msra.mxu0 %v1920_v11  ;;  %654 = vmatpush1.bf16.msra.mxu1 %v1921_v12  ;;  %v1958_v35 = vld [vmem:[%s2492_s4 + $0x134] ss:$8 sps:$4 sm:$0xff]   ;;  %v1956_v37 = vld [vmem:[%s2492_s4 + $0x130] ss:$8 sps:$4 sm:$0xff]   ;;  %v1964_v39 = vld [vmem:[%s2492_s4 + $0x124] ss:$8 sps:$4 sm:$0xff]  }
  0x1a   : > { %612 = vmatprep.subr.bf16.mxu0 %v1922_v13  ;;  %655 = vmatprep.subr.bf16.mxu1 %v1924_v14  ;;  %v1959_v40 = vld [vmem:[%s2492_s4 + $0x20] ss:$8 sps:$4 sm:$0xff]   ;;  %v1967_v42 = vld [vmem:[%s2492_s4 + $0x14] ss:$8 sps:$4 sm:$0xff]   ;;  %v1965_v44 = vld [vmem:[%s2492_s4 + $0x10] ss:$8 sps:$4 sm:$0xff]  }
  0x1b   : > { %v1962_v41 = vld [vmem:[%s2492_s4 + $0x120] ss:$8 sps:$4 sm:$0xff]   ;;  %v1970_v43 = vld [vmem:[%s2492_s4 + $0x114] ss:$8 sps:$4 sm:$0xff]   ;;  %v1968_v45 = vld [vmem:[%s2492_s4 + $0x110] ss:$8 sps:$4 sm:$0xff]  }
  0x1c   : > { %v1973_v46 = vld [vmem:[%s2492_s4 + $0x4] ss:$8 sps:$4 sm:$0xff]   ;;  %v1971_v48 = vld [vmem:[%s2492_s4] ss:$8 sps:$4 sm:$0xff]   ;;  %v1979_v50 = vld [vmem:[%s2492_s4 + $0xf4] ss:$8 sps:$4 sm:$0xff]  }
  0x1d   : > { %613 = vmatpush1.bf16.msra.mxu0 %v1926_v15  ;;  %656 = vmatpush1.bf16.msra.mxu1 %v1927_v16  ;;  %v1976_v47 = vld [vmem:[%s2492_s4 + $0x104] ss:$8 sps:$4 sm:$0xff]   ;;  %v1974_v49 = vld [vmem:[%s2492_s4 + $0x100] ss:$8 sps:$4 sm:$0xff]   ;;  %v1982_v51 = vld [vmem:[%s2492_s4 + $0x1f4] ss:$8 sps:$4 sm:$0xff]  }
  0x1e   : > { %1140 = vmatprep.subr.bf16.mxu0 %v1931_v17  ;;  %1183 = vmatprep.subr.bf16.mxu1 %v1934_v18  ;;  %v1977_v52 = vld [vmem:[%s2492_s4 + $0xf0] ss:$8 sps:$4 sm:$0xff]   ;;  %v1985_v54 = vld [vmem:[%s2492_s4 + $0xe4] ss:$8 sps:$4 sm:$0xff]   ;;  %v1983_v56 = vld [vmem:[%s2492_s4 + $0xe0] ss:$8 sps:$4 sm:$0xff]  }
  0x1f   : > { %v1980_v53 = vld [vmem:[%s2492_s4 + $0x1f0] ss:$8 sps:$4 sm:$0xff]   ;;  %v1988_v55 = vld [vmem:[%s2492_s4 + $0x1e4] ss:$8 sps:$4 sm:$0xff]   ;;  %v1986_v57 = vld [vmem:[%s2492_s4 + $0x1e0] ss:$8 sps:$4 sm:$0xff]  }
  0x20   : > { %1728 = vmatmul.mubr.msk.bf16.vlgmr.msra.gmra.mxu0 %vm594_vm0, %v1928_v20  ;;  %1729 = vmatmul.mubr.msk.bf16.vlgmr.msra.gmra.mxu1 %vm594_vm0, %v1928_v20  ;;  %v1991_v58 = vld [vmem:[%s2492_s4 + $0xd4] ss:$8 sps:$4 sm:$0xff]   ;;  %v1989_v60 = vld [vmem:[%s2492_s4 + $0xd0] ss:$8 sps:$4 sm:$0xff]   ;;  %v1997_v62 = vld [vmem:[%s2492_s4 + $0xc4] ss:$8 sps:$4 sm:$0xff]  }
  0x21   : > { %1141 = vmatpush1.bf16.msra.mxu0 %v1929_v19  ;;  %1184 = vmatpush1.bf16.msra.mxu1 %v1932_v21  ;;  %v1994_v59 = vld [vmem:[%s2492_s4 + $0x1d4] ss:$8 sps:$4 sm:$0xff]   ;;  %v1992_v61 = vld [vmem:[%s2492_s4 + $0x1d0] ss:$8 sps:$4 sm:$0xff]   ;;  %v2000_v63 = vld [vmem:[%s2492_s4 + $0x1c4] ss:$8 sps:$4 sm:$0xff]   ;;  %v686_v19 = vlaneseq }
  0x22   : > { %1142 = vmatprep.subr.bf16.mxu0 %v1937_v22  ;;  %1185 = vmatprep.subr.bf16.mxu1 %v1940_v23  ;;  %v1995_v0 = vld [vmem:[%s2492_s4 + $0xc0] ss:$8 sps:$4 sm:$0xff]   ;;  %v2003_v2 = vld [vmem:[%s2492_s4 + $0xb4] ss:$8 sps:$4 sm:$0xff]   ;;  %v2001_v4 = vld [vmem:[%s2492_s4 + $0xb0] ss:$8 sps:$4 sm:$0xff]  }
  0x23   : > { %v1998_v1 = vld [vmem:[%s2492_s4 + $0x1c0] ss:$8 sps:$4 sm:$0xff]   ;;  %v2006_v3 = vld [vmem:[%s2492_s4 + $0x1b4] ss:$8 sps:$4 sm:$0xff]   ;;  %v2004_v5 = vld [vmem:[%s2492_s4 + $0x1b0] ss:$8 sps:$4 sm:$0xff]  }
  0x24   : > { %v2009_v6 = vld [vmem:[%s2492_s4 + $0xa4] ss:$8 sps:$4 sm:$0xff]   ;;  %v2007_v8 = vld [vmem:[%s2492_s4 + $0xa0] ss:$8 sps:$4 sm:$0xff]   ;;  %v2015_v10 = vld [vmem:[%s2492_s4 + $0x94] ss:$8 sps:$4 sm:$0xff]  }
  0x25   : > { %1143 = vmatpush1.bf16.msra.mxu0 %v1935_v24  ;;  %1186 = vmatpush1.bf16.msra.mxu1 %v1938_v25  ;;  %v2012_v7 = vld [vmem:[%s2492_s4 + $0x1a4] ss:$8 sps:$4 sm:$0xff]   ;;  %v2010_v9 = vld [vmem:[%s2492_s4 + $0x1a0] ss:$8 sps:$4 sm:$0xff]   ;;  %v2018_v11 = vld [vmem:[%s2492_s4 + $0x194] ss:$8 sps:$4 sm:$0xff]  }
  0x26   : > { %1144 = vmatprep.subr.bf16.mxu0 %v1943_v26  ;;  %1187 = vmatprep.subr.bf16.mxu1 %v1946_v27  ;;  %v2013_v12 = vld [vmem:[%s2492_s4 + $0x90] ss:$8 sps:$4 sm:$0xff]   ;;  %v2021_v14 = vld [vmem:[%s2492_s4 + $0x84] ss:$8 sps:$4 sm:$0xff]   ;;  %v2019_v16 = vld [vmem:[%s2492_s4 + $0x80] ss:$8 sps:$4 sm:$0xff]  }
  0x27   : > { %v2016_v13 = vld [vmem:[%s2492_s4 + $0x190] ss:$8 sps:$4 sm:$0xff]   ;;  %v2024_v15 = vld [vmem:[%s2492_s4 + $0x184] ss:$8 sps:$4 sm:$0xff]   ;;  %v2022_v17 = vld [vmem:[%s2492_s4 + $0x180] ss:$8 sps:$4 sm:$0xff]  }
  0x28   : > { %v2025_v18 = vld [vmem:[%s2495_s7 + $0x78] sm:$0xff]   ;;  %v687_v20 = vshrl.u32 %v686_v19, 7  ;;  %v684_v25 = vld [vmem:[%s2490_s2] sm:$0xf]  ;;  %v2038_v19 = vld [vmem:[%s2495_s7 + $0x8] sm:$0xff]   ;;  %s1825_s29 = sshll.u32 %s2506_s21, 4 }
  0x29   : > { %1145 = vmatpush1.bf16.msra.mxu0 %v1941_v28  ;;  %1188 = vmatpush1.bf16.msra.mxu1 %v1944_v29  ;;  %s488_s14 = scalar_lea.vmem %s2500_s12, %s1825_s29 }
  0x2a   : > { %1146 = vmatprep.subr.bf16.mxu0 %v1949_v30  ;;  %1189 = vmatprep.subr.bf16.mxu1 %v1952_v31  ;;  %v2373_v21 = vsub.s32 1, %v687_v20  ;;  %v700_v22 = vsub.s32 3, %v687_v20  ;;  %v2375_v23 = vsub.s32 0, %v687_v20  ;;  %v696_v24 = vsub.s32 2, %v687_v20  ;;  %v2039_v20 = vld [vmem:[%s2495_s7 + $0x40] sm:$0xff]  }
  0x2c   : > { %v693_v26 = vrot.slane %v684_v25, %v2373_v21  ;;  %v701_v27 = vrot.slane %v684_v25, %v700_v22  ;;  %v689_v29 = vrot.slane %v684_v25, %v2375_v23  ;;  %v697_v31 = vrot.slane %v684_v25, %v696_v24 }
  0x2d   : > { %1147 = vmatpush1.bf16.msra.mxu0 %v1947_v32  ;;  %1190 = vmatpush1.bf16.msra.mxu1 %v1950_v33  ;;  %v714_v32 = vld [vmem:[%s479_s28] sm:$0xf]  ;;  %v2082_v25 = vmov 0.0  }
  0x2e   : > { %1148 = vmatprep.subr.bf16.mxu0 %v1955_v34  ;;  %1191 = vmatprep.subr.bf16.mxu1 %v1958_v35 }
  0x31   : > { %1149 = vmatpush1.bf16.msra.mxu0 %v1953_v36  ;;  %1192 = vmatpush1.bf16.msra.mxu1 %v1956_v37  ;;  %v723_v36 = vrot.slane %v714_v32, %v2373_v21 }
  0x32   : > { %1150 = vmatprep.subr.bf16.mxu0 %v1961_v38  ;;  %1193 = vmatprep.subr.bf16.mxu1 %v1964_v39  ;;  %v731_v38 = vrot.slane %v714_v32, %v700_v22  ;;  %v2040_v22 = vld [vmem:[%s2495_s7] sm:$0xff]  }
  0x35   : > { %1151 = vmatpush1.bf16.msra.mxu0 %v1959_v40  ;;  %1194 = vmatpush1.bf16.msra.mxu1 %v1962_v41  ;;  %v719_v40 = vrot.slane %v714_v32, %v2375_v23 }
  0x36   : > { %1152 = vmatprep.subr.bf16.mxu0 %v1967_v42  ;;  %1195 = vmatprep.subr.bf16.mxu1 %v1970_v43  ;;  %v727_v42 = vrot.slane %v714_v32, %v696_v24  ;;  %v2041_v24 = vld [vmem:[%s2498_s10 + $0x38] sm:$0xff]  }
  0x39   : > { %1153 = vmatpush1.bf16.msra.mxu0 %v1965_v44  ;;  %1196 = vmatpush1.bf16.msra.mxu1 %v1968_v45 }
  0x3a   : > { %1154 = vmatprep.subr.bf16.mxu0 %v1973_v46  ;;  %1197 = vmatprep.subr.bf16.mxu1 %v1976_v47 }
  0x3d   : > { %1155 = vmatpush1.bf16.msra.mxu0 %v1971_v48  ;;  %1198 = vmatpush1.bf16.msra.mxu1 %v1974_v49 }
  0x3e   : > { %1156 = vmatprep.subr.bf16.mxu0 %v1979_v50  ;;  %1199 = vmatprep.subr.bf16.mxu1 %v1982_v51 }
  0x41   : > { %1157 = vmatpush2.bf16.msra.mxu0 %v1977_v52  ;;  %1200 = vmatpush2.bf16.msra.mxu1 %v1980_v53 }
  0x42   : > { %1158 = vmatprep.subr.bf16.mxu0 %v1985_v54  ;;  %1201 = vmatprep.subr.bf16.mxu1 %v1988_v55 }
  0x45   : > { %1159 = vmatpush2.bf16.msra.mxu0 %v1983_v56  ;;  %1202 = vmatpush2.bf16.msra.mxu1 %v1986_v57 }
  0x46   : > { %1160 = vmatprep.subr.bf16.mxu0 %v1991_v58  ;;  %1203 = vmatprep.subr.bf16.mxu1 %v1994_v59 }
  0x49   : > { %1161 = vmatpush2.bf16.msra.mxu0 %v1989_v60  ;;  %1204 = vmatpush2.bf16.msra.mxu1 %v1992_v61 }
  0x4a   : > { %1162 = vmatprep.subr.bf16.mxu0 %v1997_v62  ;;  %1205 = vmatprep.subr.bf16.mxu1 %v2000_v63 }
  0x4d   : > { %1163 = vmatpush2.bf16.msra.mxu0 %v1995_v0  ;;  %1206 = vmatpush2.bf16.msra.mxu1 %v1998_v1 }
  0x4e   : > { %1164 = vmatprep.subr.bf16.mxu0 %v2003_v2  ;;  %1207 = vmatprep.subr.bf16.mxu1 %v2006_v3 }
  0x51   : > { %1165 = vmatpush2.bf16.msra.mxu0 %v2001_v4  ;;  %1208 = vmatpush2.bf16.msra.mxu1 %v2004_v5  ;;  %v2026_v5 = vld [vmem:[%s2495_s7 + $0x38] sm:$0xff]  }
  0x52   : > { %1166 = vmatprep.subr.bf16.mxu0 %v2009_v6  ;;  %1209 = vmatprep.subr.bf16.mxu1 %v2012_v7 }
  0x55   : > { %1167 = vmatpush2.bf16.msra.mxu0 %v2007_v8  ;;  %1210 = vmatpush2.bf16.msra.mxu1 %v2010_v9  ;;  %v2027_v8 = vld [vmem:[%s2495_s7 + $0x70] sm:$0xff]  }
  0x56   : > { %1168 = vmatprep.subr.bf16.mxu0 %v2015_v10  ;;  %1211 = vmatprep.subr.bf16.mxu1 %v2018_v11  ;;  %v2028_v9 = vld [vmem:[%s2495_s7 + $0x30] sm:$0xff]   ;;  %v2029_v10 = vld [vmem:[%s2495_s7 + $0x68] sm:$0xff]  }
  0x57   : > { %v2030_v11 = vld [vmem:[%s2495_s7 + $0x28] sm:$0xff]  }
  0x59   : > { %1169 = vmatpush2.bf16.msra.mxu0 %v2013_v12  ;;  %1212 = vmatpush2.bf16.msra.mxu1 %v2016_v13  ;;  %v2031_v12 = vld [vmem:[%s2495_s7 + $0x60] sm:$0xff]  }
  0x5a   : > { %1170 = vmatprep.subr.bf16.mxu0 %v2021_v14  ;;  %1213 = vmatprep.subr.bf16.mxu1 %v2024_v15  ;;  %v2032_v13 = vld [vmem:[%s2495_s7 + $0x20] sm:$0xff]   ;;  %v2033_v14 = vld [vmem:[%s2495_s7 + $0x58] sm:$0xff]  }
  0x5b   : > { %v2034_v15 = vld [vmem:[%s2495_s7 + $0x18] sm:$0xff]  }
  0x5d   : > { %1171 = vmatpush2.bf16.msra.mxu0 %v2019_v16  ;;  %1214 = vmatpush2.bf16.msra.mxu1 %v2022_v17  ;;  %v2035_v16 = vld [vmem:[%s2495_s7 + $0x50] sm:$0xff]  }
  0x5e   : > { %1826 = vmatprep.subr.bf16.mxu0 %v2025_v18  ;;  %v2036_v17 = vld [vmem:[%s2495_s7 + $0x10] sm:$0xff]   ;;  %v2037_v18 = vld [vmem:[%s2495_s7 + $0x48] sm:$0xff]   ;;  %1857 = vmatprep.subr.bf16.mxu1 %v2082_v25 }
  0xe0   : > { %v632_v28 = vpop.f32.mrf.mxu0  ;;  %v675_v30 = vpop.f32.mrf.mxu1 }
  0xe1   : > { %v706_v39 = vmul.f32 %v689_v29, %v632_v28  ;;  %v708_v41 = vmul.f32 %v697_v31, %v675_v30  ;;  %v2044_v28 = vld [vmem:[%s2498_s10 + $0x20] sm:$0xff]  }
  0xe2   : > { %v634_v33 = vpop.f32.mrf.mxu0  ;;  %v677_v34 = vpop.f32.mrf.mxu1 }
  0xe3   : > { %v707_v35 = vmul.f32 %v693_v26, %v634_v33  ;;  %v709_v37 = vmul.f32 %v701_v27, %v677_v34  ;;  %v736_v53 = vadd.f32 %v719_v40, %v706_v39  ;;  %v738_v54 = vadd.f32 %v727_v42, %v708_v41 }
  0xe4   : > { %v636_v43 = vpop.f32.mrf.mxu0  ;;  %v679_v44 = vpop.f32.mrf.mxu1 }
  0xe5   : > { %v710_v45 = vmul.f32 %v689_v29, %v636_v43  ;;  %v712_v46 = vmul.f32 %v697_v31, %v679_v44  ;;  %v737_v49 = vadd.f32 %v723_v36, %v707_v35  ;;  %v739_v50 = vadd.f32 %v731_v38, %v709_v37  ;;  %v1226_v29 = vld [vmem:[%s2493_s5] sm:$0x3] }
  0xe6   : > { %v638_v47 = vpop.f32.mrf.mxu0  ;;  %v681_v48 = vpop.f32.mrf.mxu1  ;;  %v744_v1 = vmax.f32 %v736_v53, 0.0  ;;  %v746_v2 = vmax.f32 %v738_v54, 0.0  ;;  %v1235_v32 = vrot.slane %v1226_v29, %v2373_v21  ;;  %v1231_v34 = vrot.slane %v1226_v29, %v2375_v23  ;;  %v1242_v37 = vld [vmem:[%s2494_s6] sm:$0x3] }
  0xe7   : > { %v711_v51 = vmul.f32 %v693_v26, %v638_v47  ;;  %v713_v52 = vmul.f32 %v701_v27, %v681_v48  ;;  %v740_v55 = vadd.f32 %v719_v40, %v710_v45  ;;  %v742_v56 = vadd.f32 %v727_v42, %v712_v46  ;;  %v2042_v26 = vld [vmem:[%s2498_s10 + $0x30] sm:$0xff]   ;;  %v2043_v27 = vld [vmem:[%s2498_s10 + $0x28] sm:$0xff]  }
  0xe8   : > { %v745_v61 = vmax.f32 %v737_v49, 0.0  ;;  %v747_v62 = vmax.f32 %v739_v50, 0.0  ;;  %v1251_v42 = vrot.slane %v1242_v37, %v2373_v21  ;;  %v1247_v45 = vrot.slane %v1242_v37, %v2375_v23  ;;  %v2045_v21 = vld [vmem:[%s2498_s10 + $0x18] sm:$0xff]   ;;  %v2046_v23 = vld [vmem:[%s2498_s10 + $0x10] sm:$0xff]  }
  0xe9   : > { %v741_v57 = vadd.f32 %v723_v36, %v711_v51  ;;  %v743_v58 = vadd.f32 %v731_v38, %v713_v52  ;;  %v748_v59 = vmax.f32 %v740_v55, 0.0  ;;  %v750_v60 = vmax.f32 %v742_v56, 0.0 }
  0xeb   : > { %v749_v63 = vmax.f32 %v741_v57, 0.0  ;;  %v751_v0 = vmax.f32 %v743_v58, 0.0  ;;  %v752_v6 = vpack.c.bf16 %v748_v59, %v744_v1  ;;  %v754_v7 = vpack.c.bf16 %v750_v60, %v746_v2  ;;  %v1810_v1 = vld [vmem:[%s2496_s8] ss:$0 sm:$0xff] }
  0xed   : > { %v753_v3 = vpack.c.bf16 %v749_v63, %v745_v61  ;;  %v755_v4 = vpack.c.bf16 %v751_v0, %v747_v62  ;;  %v2047_v61 = vld [vmem:[%s2498_s10 + $0x8] sm:$0xff]   ;;  %v2048_v62 = vld [vmem:[%s2498_s10] sm:$0xff]  }
  0xef   : > { %1172 = vmatprep.mubr.bf16.mxu0 %v753_v3  ;;  %1215 = vmatprep.mubr.bf16.mxu1 %v755_v4 }
  0xf0   : > { %1173 = vmatmul.mubr.bf16.vlgmr.msra.gmra.mxu0 %v752_v6  ;;  %1216 = vmatmul.mubr.bf16.vlgmr.msra.gmra.mxu1 %v754_v7 }
  0xf1   : > { %1827 = vmatpush3.bf16.msra.mxu0 %v2026_v5  ;;  %1858 = vmatpush3.bf16.msra.mxu1 %v2041_v24  ;;  %v1811_v5 = vld [vmem:[%s2497_s9] ss:$0 sm:$0xff] }
  0xf2   : > { %1828 = vmatprep.subr.bf16.mxu0 %v2027_v8  ;;  %1859 = vmatprep.subr.bf16.mxu1 %v2082_v25 }
  0xf3   : > { %1873 = vmatprep.mubr.msk.bf16.mxu1 %vm2083_vm1, %v2082_v25 }
  0xf5   : > { %1829 = vmatpush3.bf16.msra.mxu0 %v2028_v9  ;;  %1860 = vmatpush3.bf16.msra.mxu1 %v2042_v26 }
  0xf6   : > { %1830 = vmatprep.subr.bf16.mxu0 %v2029_v10  ;;  %1861 = vmatprep.subr.bf16.mxu1 %v2082_v25 }
  0xf9   : > { %1831 = vmatpush3.bf16.msra.mxu0 %v2030_v11  ;;  %1862 = vmatpush3.bf16.msra.mxu1 %v2043_v27 }
  0xfa   : > { %1832 = vmatprep.subr.bf16.mxu0 %v2031_v12  ;;  %1863 = vmatprep.subr.bf16.mxu1 %v2082_v25 }
  0xfd   : > { %1833 = vmatpush3.bf16.msra.mxu0 %v2032_v13  ;;  %1864 = vmatpush3.bf16.msra.mxu1 %v2044_v28 }
  0xfe   : > { %1834 = vmatprep.subr.bf16.mxu0 %v2033_v14  ;;  %1865 = vmatprep.subr.bf16.mxu1 %v2082_v25  ;;  %v1812_v14 = vld [vmem:[%s2499_s11] ss:$0 sm:$0xff] }
 0x101   : > { %1835 = vmatpush3.bf16.msra.mxu0 %v2034_v15  ;;  %1866 = vmatpush3.bf16.msra.mxu1 %v2045_v21 }
 0x102   : > { %1836 = vmatprep.subr.bf16.mxu0 %v2035_v16  ;;  %1867 = vmatprep.subr.bf16.mxu1 %v2082_v25 }
 0x105   : > { %1837 = vmatpush3.bf16.msra.mxu0 %v2036_v17  ;;  %1868 = vmatpush3.bf16.msra.mxu1 %v2046_v23 }
 0x106   : > { %1838 = vmatprep.subr.bf16.mxu0 %v2037_v18  ;;  %1869 = vmatprep.subr.bf16.mxu1 %v2082_v25 }
 0x109   : > { %1839 = vmatpush3.bf16.msra.mxu0 %v2038_v19  ;;  %1870 = vmatpush3.bf16.msra.mxu1 %v2047_v61 }
 0x10a   : > { %1840 = vmatprep.subr.bf16.mxu0 %v2039_v20  ;;  %1871 = vmatprep.subr.bf16.mxu1 %v2082_v25 }
 0x10d   : > { %1841 = vmatpush3.bf16.msra.mxu0 %v2040_v22  ;;  %1872 = vmatpush3.bf16.msra.mxu1 %v2048_v62 }
 0x1b0   : > { %v1174_v30 = vpop.f32.mrf.mxu0  ;;  %v1217_v31 = vpop.f32.mrf.mxu1 }
 0x1b1   : > { %v1218_v33 = vadd.f32 %v1217_v31, %v1174_v30 }
 0x1b2   : > { %v1176_v35 = vpop.f32.mrf.mxu0  ;;  %v1219_v36 = vpop.f32.mrf.mxu1 }
 0x1b3   : > { %v1220_v38 = vadd.f32 %v1219_v36, %v1176_v35  ;;  %v1238_v44 = vmul.f32 %v1231_v34, %v1218_v33 }
 0x1b4   : > { %v1178_v39 = vpop.f32.mrf.mxu0  ;;  %v1221_v40 = vpop.f32.mrf.mxu1 }
 0x1b5   : > { %v1239_v41 = vmul.f32 %v1235_v32, %v1220_v38  ;;  %v1222_v43 = vadd.f32 %v1221_v40, %v1178_v39  ;;  %v1254_v53 = vadd.f32 %v1247_v45, %v1238_v44 }
 0x1b6   : > { %v1180_v46 = vpop.f32.mrf.mxu0  ;;  %v1223_v47 = vpop.f32.mrf.mxu1 }
 0x1b7   : > { %v1240_v48 = vmul.f32 %v1231_v34, %v1222_v43  ;;  %v1224_v49 = vadd.f32 %v1223_v47, %v1180_v46  ;;  %v1255_v50 = vadd.f32 %v1251_v42, %v1239_v41  ;;  %v1258_v58 = vmax.f32 %v1254_v53, 0.0 }
 0x1b9   : > { %v1256_v51 = vadd.f32 %v1247_v45, %v1240_v48  ;;  %v1241_v52 = vmul.f32 %v1235_v32, %v1224_v49  ;;  %v1259_v56 = vmax.f32 %v1255_v50, 0.0 }
 0x1bb   : > { %v1257_v54 = vadd.f32 %v1251_v42, %v1241_v52  ;;  %v1260_v55 = vmax.f32 %v1256_v51, 0.0 }
 0x1bd   : > { %v1261_v57 = vmax.f32 %v1257_v54, 0.0  ;;  %v1262_v60 = vpack.c.bf16 %v1260_v55, %v1258_v58 }
 0x1bf   : > { %v1263_v59 = vpack.c.bf16 %v1261_v57, %v1259_v56 }
 0x1c1   : > { %1424 = vmatprep.mubr.bf16.mxu0 %v1263_v59 }
 0x1c2   : > { %1425 = vmatmul.mubr.bf16.vlgmr.msra.gmra.mxu0 %v1262_v60 }
 0x282   : > { %v1842_v63 = vpop.f32.mrf.mxu0 }
 0x284   : > { %v1843_v0 = vpop.f32.mrf.mxu0 }
 0x285   : > { %v1844_v2 = vadd.f32 %v1843_v0, %v1842_v63 }
 0x286   : > { %v1845_v3 = vpop.f32.mrf.mxu0 }
 0x287   : > { %v1440_v4 = vmul.f32 %v1844_v2, %v1810_v1 }
 0x288   : > { %v1846_v6 = vpop.f32.mrf.mxu0 }
 0x289   : > { %v1847_v7 = vadd.f32 %v1846_v6, %v1845_v3  ;;  %v1449_v8 = vadd.f32 %v1811_v5, %v1440_v4 }
 0x28b   : > { %v1441_v9 = vmul.f32 %v1847_v7, %v1810_v1  ;;  %v1451_v11 = vmax.f32 %v1449_v8, 0.0 }
 0x28d   : > { %v1450_v10 = vadd.f32 %v1811_v5, %v1441_v9 }
 0x28f   : > { %v1452_v12 = vmax.f32 %v1450_v10, 0.0 }
 0x291   : > { %v1453_v13 = vpack.c.bf16 %v1452_v12, %v1451_v11 }
 0x293   : > { %1874 = vmatmul.mubr.bf16.vlgmr.msra.gmra.mxu1 %v1453_v13 }
 0x353   : > { %v1559_v15 = vpop.f32.mrf.mxu1 }
 0x354   : > { %v1560_v16 = vadd.f32 %v1812_v14, %v1559_v15 }
 0x355   : > { %v1875_v17 = vpop.f32.mrf.mxu1 }
 0x356   : > { %1566 = vmax.xlane.f32.xlu0 %v1560_v16 }
 0x357   : > { %v1562_v18 = vpop.f32.mrf.mxu1 }
 0x358   : > { %v1563_v19 = vadd.f32 %v1812_v14, %v1562_v18 }
 0x359   : > { %v1876_v20 = vpop.f32.mrf.mxu1 }
 0x35a   : > { %1568 = vmax.xlane.f32.xlu0 %v1563_v19 }
 0x3df   : > { %v1567_v22 = vpop.xlane.xlu0 %1566 }
 0x3e0   : > { %v1570_v24 = vsub.f32 %v1560_v16, %v1567_v22 }
 0x3e2   : > { %v1572_v25 = vmul.f32 1.442695, %v1570_v24 }
 0x3e3   : > { %v1569_v26 = vpop.xlane.xlu0 %1568 }
 0x3e4   : > { %v1571_v27 = vsub.f32 %v1563_v19, %v1569_v26  ;;  %2049 = vpow2.f32 %v1572_v25 }
 0x3e6   : > { %v1574_v28 = vmul.f32 1.442695, %v1571_v27 }
 0x3e8   : > { %2051 = vpow2.f32 %v1574_v28 }
 0x3f1   : > { %v2050_v29 = vpop.eup %2049 }
 0x3f2   : > { %1576 = vadd.xlane.f32.xlu1 %v2050_v29 }
 0x3f5   : > { %v2052_v30 = vpop.eup %2051 }
 0x3f6   : > { %1578 = vadd.xlane.f32.xlu1 %v2052_v30 }
 0x47b   : > { %v1577_v31 = vpop.xlane.xlu1 %1576 }
 0x47c   : > { %2053 = vlog2.f32 %v1577_v31 }
 0x47f   : > { %v1579_v32 = vpop.xlane.xlu1 %1578 }
 0x480   : > { %2055 = vlog2.f32 %v1579_v32 }
 0x489   : > { %v2054_v33 = vpop.eup %2053 }
 0x48a   : > { %v1581_v34 = vmul.f32 0.6931472, %v2054_v33 }
 0x48c   : > { %v1584_v35 = vsub.f32 %v1570_v24, %v1581_v34 }
 0x48d   : > { %v2056_v36 = vpop.eup %2055 }
 0x48e   : > { %1586 = vst [vmem:[%s488_s14] sm:$0xff] %v1584_v35  ;;  %v1583_v37 = vmul.f32 0.6931472, %v2056_v36 }
 0x490   : > { %v1585_v38 = vsub.f32 %v1571_v27, %v1583_v37 }
 0x492   : > { %1587 = vst [vmem:[%s488_s14 + $0x8] sm:$0xff] %v1585_v38 }
 0x493 PF: > { %s22_s23 = sadd.s32 1, %s2079_s23   ;;  %s2501_s21 = smov %s2075_s22 }
 0x494   : > { %p19_p5 = scmp.ge.s32.totalorder %s22_s23, 4   ;;  %s2502_s22 = smov %s2504_s24 }
 0x496   :  { %21 = sbr.rel (!%p19_p5) target bundleno = 2 (0x2), region = 104 }

</bundles_post_ra>
